<compile_context>
chip_gen: v6e
topology: v6e:2x2x1
jax: 0.10.0
libtpu: 0.0.40
codegen_flags: <defaults>
</compile_context>

<pallas_src>
import functools
import math

import jax
import jax.numpy as jnp
from jax import lax
from jax.experimental import pallas as pl
from jax.experimental.pallas import tpu as pltpu

_LN_EPS = 1e-5  # PyTorch nn.LayerNorm default


def _layernorm_f32(x, gamma, beta, eps=_LN_EPS):
    """LayerNorm over the last axis, statistics in f32, rsqrt on the EUP."""
    x = x.astype(jnp.float32)
    mean = jnp.mean(x, axis=-1, keepdims=True)
    var = jnp.mean(jnp.square(x - mean), axis=-1, keepdims=True)
    inv = lax.rsqrt(var + eps)
    return (x - mean) * inv * gamma + beta


def _supports_bf16_eup():
    """bf16 exp on the EUP exists on v6e / v7x but not on v5e."""
    try:
        kind = jax.devices()[0].device_kind.lower()
    except Exception:
        return False
    return ("v6" in kind) or ("v7" in kind)


def _encoder_layer_kernel(
    # inputs
    x_ref, q_ref, k_ref, v_ref,
    wo_ref, bo_ref, g1_ref, be1_ref,
    w1_ref, bf1_ref, w2_ref, bf2_ref,
    g2_ref, be2_ref, gf_ref, bef_ref,
    # output
    out_ref,
    # scratch
    m_sc, l_sc, acc_sc,
    *, apply_final_norm, activation, ff_chunk, exp_in_bf16,
):
    kv = pl.program_id(2)
    cdt = q_ref.dtype  # MXU input dtype (bf16 or f32); accumulation is always f32.

    # ---------------- init: first KV tile of this (batch, q-tile) group ----------------
    @pl.when(kv == 0)
    def _init():
        m_sc[...] = jnp.full_like(m_sc, -jnp.inf)
        l_sc[...] = jnp.zeros_like(l_sc)
        acc_sc[...] = jnp.zeros_like(acc_sc)

    # ---------------- per-KV-tile online-softmax update (all heads batched) ------------
    q = q_ref[...]                                   # [H, TQ, dh]
    k = k_ref[...]                                   # [H, TK, dh]
    v = v_ref[...]                                   # [H, TK, dh]
    s = lax.dot_general(q, k, (((2,), (2,)), ((0,), (0,))),
                        preferred_element_type=jnp.float32)          # [H, TQ, TK]

    m_prev = m_sc[...]                                               # [H, TQ, 1]
    m_new = jnp.maximum(m_prev, jnp.max(s, axis=-1, keepdims=True))
    alpha = jnp.exp(m_prev - m_new)                                  # [H, TQ, 1] f32
    delta = s - m_new
    if exp_in_bf16:
        # v6e/v7x: the inner loop is EUP-bound for small head_dim -> bf16 exp.
        p_mm = jnp.exp(delta.astype(jnp.bfloat16))                   # feeds PV directly
        p_sum = jnp.sum(p_mm.astype(jnp.float32), axis=-1, keepdims=True)
    else:
        p = jnp.exp(delta)
        p_sum = jnp.sum(p, axis=-1, keepdims=True)
        p_mm = p.astype(cdt)

    l_sc[...] = alpha * l_sc[...] + p_sum
    pv = lax.dot_general(p_mm, v, (((2,), (1,)), ((0,), (0,))),
                         preferred_element_type=jnp.float32)         # [H, TQ, dh]
    acc_sc[...] = alpha * acc_sc[...] + pv
    m_sc[...] = m_new

    # ---------------- finalize: out-proj + residual/LN + FFN + residual/LN -------------
    @pl.when(kv == pl.num_programs(2) - 1)
    def _finalize():
        l = l_sc[...]
        if out_ref.dtype == jnp.float32:
            inv_l = 1.0 / l                                  # exact on the f32 path
        else:
            inv_l = pl.reciprocal(l, approx=True)            # EUP slot, ~free
        o = (acc_sc[...] * inv_l).astype(cdt)                # [H, TQ, dh]

        # Output projection: head-batched [H,TQ,dh] x [H,dh,D] -> [H,TQ,D], sum heads.
        attn = lax.dot_general(o, wo_ref[...], (((2,), (1,)), ((0,), (0,))),
                               preferred_element_type=jnp.float32)
        attn = jnp.sum(attn, axis=0) + bo_ref[...]           # [TQ, D] f32

        # residual + norm1 (dropout is identity in eval mode)
        x_res = x_ref[...].astype(jnp.float32) + attn
        y1 = _layernorm_f32(x_res, g1_ref[...], be1_ref[...])
        y1c = y1.astype(cdt)

        # FFN == Conv1d(kernel_size=1) pair, chunked over d_ff so the [TQ, d_ff]
        # intermediate stays bounded in VMEM/vregs.
        d_ff = w1_ref.shape[1]
        ffn = None
        for c in range(d_ff // ff_chunk):
            sl = slice(c * ff_chunk, (c + 1) * ff_chunk)
            t = jnp.dot(y1c, w1_ref[:, sl], preferred_element_type=jnp.float32)
            t = t + bf1_ref[:, sl]
            if activation == "relu":
                t = jnp.maximum(t, 0.0)
            else:  # exact erf GELU (== PyTorch F.gelu default)
                t = 0.5 * t * (1.0 + lax.erf(t * (1.0 / math.sqrt(2.0))))
            part = jnp.dot(t.astype(cdt), w2_ref[sl, :],
                           preferred_element_type=jnp.float32)
            ffn = part if ffn is None else ffn + part
        ffn = ffn + bf2_ref[...]

        out = _layernorm_f32(y1 + ffn, g2_ref[...], be2_ref[...])
        if apply_final_norm:  # Encoder.norm fused into the last layer
            out = _layernorm_f32(out, gf_ref[...], bef_ref[...])
        out_ref[...] = out.astype(out_ref.dtype)


def _pick_block(L):
    # Prefer large, MXU-friendly tiles (>=128; 256 fits v6e/v7x's 2x256^2 MXU).
    for b in (256, 128, 64, 32, 16, 8):
        if L % b == 0:
            return b
    return L  # block == full dim also satisfies the (8,128) rule


def _pick_ff_chunk(d_ff):
    for c in (512, 256, 128):
        if d_ff % c == 0:
            return c
    return d_ff


def _estimate_vmem_bytes(block_q, block_k, D, H, dh, d_ff, ff_chunk, itemsize):
    weights = (H * dh * D + 2 * D * d_ff) * itemsize          # Wo, W1, W2 (1 copy)
    params = (10 * D + d_ff) * 4                               # biases + LN params, f32
    tiles = 2 * itemsize * (2 * block_q * D                    # x in, out (double-buffered)
                            + H * block_q * dh                 # q
                            + 2 * H * block_k * dh)            # k, v
    scratch = 4 * H * block_q * (dh + 2)                       # acc + m + l (f32)
    temps = 4 * (H * block_q * block_k                         # scores
                 + H * block_q * D                             # out-proj temp
                 + 2 * block_q * ff_chunk                      # FFN chunk
                 + 4 * block_q * D)                            # LN / residual temps
    return weights + params + tiles + scratch + temps


def _encoder_layer_pallas(x, qkv, p, final_norm, *, block_q, block_k,
                          apply_final_norm, activation, exp_in_bf16,
                          interpret=False):
    B, L, D = x.shape
    H = qkv.shape[1] // 3
    dh = qkv.shape[3]
    d_ff = p["w1"].shape[1]
    ff_chunk = _pick_ff_chunk(d_ff)
    cdt = x.dtype
    f32 = jnp.float32

    assert D % 128 == 0, "keep d_model a multiple of 128 for lane-dense tiles"
    assert L % block_q == 0 and L % block_k == 0
    assert block_q == L or block_q % 8 == 0
    assert block_k == L or block_k % 8 == 0

    # MXU operands in the compute dtype; LN params and biases stay f32 (precision).
    wo_r = p["wo"].reshape(H, dh, D).astype(cdt)
    w1 = p["w1"].astype(cdt)
    w2 = p["w2"].astype(cdt)
    bo = p["bo"].astype(f32)
    b1 = p["b1"].astype(f32)
    b2 = p["b2"].astype(f32)
    g1, be1 = p["ln1_g"].astype(f32), p["ln1_b"].astype(f32)
    g2, be2 = p["ln2_g"].astype(f32), p["ln2_b"].astype(f32)
    if final_norm is not None:
        gf, bef = final_norm["g"].astype(f32), final_norm["b"].astype(f32)
    else:
        gf, bef = jnp.ones((1, D), f32), jnp.zeros((1, D), f32)

    grid = (B, L // block_q, L // block_k)

    x_spec = pl.BlockSpec((None, block_q, D), lambda b, qi, ki: (b, qi, 0))
    q_spec = pl.BlockSpec((None, H, block_q, dh), lambda b, qi, ki: (b, 0, qi, 0))
    k_spec = pl.BlockSpec((None, H, block_k, dh), lambda b, qi, ki: (b, 1, ki, 0))
    v_spec = pl.BlockSpec((None, H, block_k, dh), lambda b, qi, ki: (b, 2, ki, 0))
    out_spec = pl.BlockSpec((None, block_q, D), lambda b, qi, ki: (b, qi, 0))

    def wspec(shape, single_buffer):
        imap = lambda b, qi, ki, _n=len(shape): (0,) * _n
        if single_buffer:
            # Constant-index weights don't need double buffering; halves their VMEM.
            return pl.BlockSpec(shape, imap, pipeline_mode=pl.Buffered(1))
        return pl.BlockSpec(shape, imap)

    est = _estimate_vmem_bytes(block_q, block_k, D, H, dh, d_ff, ff_chunk,
                               jnp.dtype(cdt).itemsize)
    # Headroom over the estimate.  On v7x (64 MiB physical VMEM) choose tiles so
    # this stays <= ~56 MiB; v5e/v6e have 128 MiB physical.
    vmem_limit = min(max(int(1.5 * est) + (4 << 20), 32 << 20), 100 << 20)

    kern = functools.partial(
        _encoder_layer_kernel,
        apply_final_norm=apply_final_norm, activation=activation,
        ff_chunk=ff_chunk, exp_in_bf16=exp_in_bf16)

    def build(single_buffer_weights):
        return pl.pallas_call(
            kern,
            out_shape=jax.ShapeDtypeStruct((B, L, D), x.dtype),
            grid_spec=pltpu.PrefetchScalarGridSpec(
                num_scalar_prefetch=0,
                grid=grid,
                in_specs=[
                    x_spec, q_spec, k_spec, v_spec,
                    wspec((H, dh, D), single_buffer_weights),   # Wo (head-major)
                    wspec((1, D), single_buffer_weights),       # bo
                    wspec((1, D), single_buffer_weights),       # LN1 gamma
                    wspec((1, D), single_buffer_weights),       # LN1 beta
                    wspec((D, d_ff), single_buffer_weights),    # W1 (conv1)
                    wspec((1, d_ff), single_buffer_weights),    # b1
                    wspec((d_ff, D), single_buffer_weights),    # W2 (conv2)
                    wspec((1, D), single_buffer_weights),       # b2
                    wspec((1, D), single_buffer_weights),       # LN2 gamma
                    wspec((1, D), single_buffer_weights),       # LN2 beta
                    wspec((1, D), single_buffer_weights),       # final-norm gamma
                    wspec((1, D), single_buffer_weights),       # final-norm beta
                ],
                out_specs=out_spec,
                scratch_shapes=[
                    pltpu.VMEM((H, block_q, 1), jnp.float32),   # running max m
                    pltpu.VMEM((H, block_q, 1), jnp.float32),   # running sum l
                    pltpu.VMEM((H, block_q, dh), jnp.float32),  # f32 PV accumulator
                ],
            ),
            compiler_params=pltpu.CompilerParams(
                dimension_semantics=("parallel", "parallel", "arbitrary"),
                vmem_limit_bytes=vmem_limit,
            ),
            interpret=interpret,
        )

    args = (x, qkv, qkv, qkv, wo_r, bo, g1, be1, w1, b1, w2, b2, g2, be2, gf, bef)
    try:
        return build(True)(*args)
    except Exception:  # pragma: no cover - fall back to default double-buffered weights
        return build(False)(*args)


def _project_qkv(x, p, n_heads, scale):
    """Per-layer fused Q/K/V projection (plain XLA batched matmul, f32 accumulation).

    Output: [B, 3H, L, dh] head-major, with 1/sqrt(head_dim) folded into the Q part.
    Doing this once per layer removes the (L/block_q)x redundant K/V projections
    the fused kernel would otherwise perform.
    """
    B, L, D = x.shape
    dh = D // n_heads
    cdt = x.dtype
    w = jnp.stack([p["wq"] * scale, p["wk"], p["wv"]], axis=0)            # [3, D, D]
    w = w.reshape(3, D, n_heads, dh).transpose(0, 2, 1, 3).reshape(3 * n_heads, D, dh)
    b = jnp.stack([p["bq"].reshape(-1) * scale,
                   p["bk"].reshape(-1),
                   p["bv"].reshape(-1)], axis=0)                           # [3, D]
    b = b.reshape(3, n_heads, dh).reshape(3 * n_heads, 1, dh)
    qkv = jnp.einsum("bld,cde->bcle", x, w.astype(cdt),
                     preferred_element_type=jnp.float32)
    qkv = qkv + b[None].astype(jnp.float32)
    return qkv.astype(cdt)


def encoder_forward(x, layer_params, norm_params=None, *, n_heads,
                    block_q=None, block_k=None, activation="relu",
                    softmax_exp_bf16=None, interpret=False):
    """Pallas Encoder.forward(x) -> (x, attns); matches the PyTorch module in eval mode."""
    B, L, D = x.shape
    assert D % n_heads == 0, "d_model must be divisible by n_heads"
    dh = D // n_heads

    if block_q is None:
        block_q = _pick_block(L)
    if block_k is None:
        block_k = _pick_block(L)
    # v7x megacore: keep the 'parallel' grid extent >= 2 so both TensorCores get work.
    if B * (L // block_q) < 2 and block_q >= 16 and L % (block_q // 2) == 0:
        block_q //= 2

    if softmax_exp_bf16 is None:
        softmax_exp_bf16 = _supports_bf16_eup()
    exp_in_bf16 = bool(softmax_exp_bf16) and x.dtype == jnp.bfloat16

    scale = 1.0 / math.sqrt(dh)
    n = len(layer_params)
    attns = []
    for i, p in enumerate(layer_params):
        qkv = _project_qkv(x, p, n_heads, scale)
        x = _encoder_layer_pallas(
            x, qkv, p, norm_params,
            block_q=block_q, block_k=block_k,
            apply_final_norm=(i == n - 1 and norm_params is not None),
            activation=activation, exp_in_bf16=exp_in_bf16,
            interpret=interpret)
        # FullAttention(output_attention=False) returns None per layer (SOFTS default).
        # TODO(synk): optional output_attention=True path would need a [B,H,L,L]
        # output spec + per-step probability writeback (O(L^2) HBM traffic).
        attns.append(None)
    return x, attns


# ----------------------------- pure-JAX reference (f32) -----------------------------
def encoder_forward_ref(x, layer_params, norm_params, n_heads, activation="relu"):
    x = x.astype(jnp.float32)

    def ln(v, g, b):
        m = jnp.mean(v, axis=-1, keepdims=True)
        var = jnp.mean((v - m) ** 2, axis=-1, keepdims=True)
        return (v - m) * lax.rsqrt(var + _LN_EPS) * g + b

    for p in layer_params:
        p = {k: v.astype(jnp.float32) for k, v in p.items()}
        B, L, D = x.shape
        dh = D // n_heads
        q = (x @ p["wq"] + p["bq"]).reshape(B, L, n_heads, dh)
        k = (x @ p["wk"] + p["bk"]).reshape(B, L, n_heads, dh)
        v = (x @ p["wv"] + p["bv"]).reshape(B, L, n_heads, dh)
        s = jnp.einsum("blhe,bshe->bhls", q, k) / math.sqrt(dh)
        a = jax.nn.softmax(s, axis=-1)
        o = jnp.einsum("bhls,bshd->blhd", a, v).reshape(B, L, D)
        o = o @ p["wo"] + p["bo"]
        x1 = ln(x + o, p["ln1_g"], p["ln1_b"])
        t = x1 @ p["w1"] + p["b1"]
        t = jnp.maximum(t, 0.0) if activation == "relu" else jax.nn.gelu(t, approximate=False)
        y = t @ p["w2"] + p["b2"]
        x = ln(x1 + y, p["ln2_g"], p["ln2_b"])
    if norm_params is not None:
        npar = {k: v.astype(jnp.float32) for k, v in norm_params.items()}
        x = ln(x, npar["g"], npar["b"])
    return x, [None] * len(layer_params)


def init_encoder_params(key, n_layers, d_model, n_heads, d_ff):
    def w(k, fi, fo):
        return jax.random.normal(k, (fi, fo), jnp.float32) / math.sqrt(fi)

    def b(k, fo):
        return 0.02 * jax.random.normal(k, (1, fo), jnp.float32)

    layers = []
    for i in range(n_layers):
        ks = jax.random.split(jax.random.fold_in(key, i), 16)
        layers.append(dict(
            wq=w(ks[0], d_model, d_model), bq=b(ks[1], d_model),
            wk=w(ks[2], d_model, d_model), bk=b(ks[3], d_model),
            wv=w(ks[4], d_model, d_model), bv=b(ks[5], d_model),
            wo=w(ks[6], d_model, d_model), bo=b(ks[7], d_model),
            ln1_g=1.0 + 0.05 * jax.random.normal(ks[8], (1, d_model), jnp.float32),
            ln1_b=0.05 * jax.random.normal(ks[9], (1, d_model), jnp.float32),
            w1=w(ks[10], d_model, d_ff), b1=b(ks[11], d_ff),
            w2=w(ks[12], d_ff, d_model), b2=b(ks[13], d_model),
            ln2_g=1.0 + 0.05 * jax.random.normal(ks[14], (1, d_model), jnp.float32),
            ln2_b=0.05 * jax.random.normal(ks[15], (1, d_model), jnp.float32),
        ))
    kf = jax.random.split(jax.random.fold_in(key, 10_000), 2)
    norm = dict(
        g=1.0 + 0.05 * jax.random.normal(kf[0], (1, d_model), jnp.float32),
        b=0.05 * jax.random.normal(kf[1], (1, d_model), jnp.float32),
    )
    return layers, norm


if __name__ == "__main__":
    B, L, D, H, DFF, NLAYERS = 2, 32, 128, 4, 256, 2

    key = jax.random.PRNGKey(0)
    kx, kp = jax.random.split(key)
    x = jax.random.normal(kx, (B, L, D), jnp.float32)
    layers, norm = init_encoder_params(kp, NLAYERS, D, H, DFF)

    # f32 path with a 2x2 (q-tile, kv-tile) grid per batch so the online-softmax
    # accumulation across KV tiles is actually exercised; checked vs pure JAX.
    y_f32, attns = encoder_forward(x, layers, norm, n_heads=H, block_q=16, block_k=16)
    y_f32 = jax.block_until_ready(y_f32)
    y_ref, _ = encoder_forward_ref(x, layers, norm, H)
    assert y_f32.shape == (B, L, D)
    assert len(attns) == NLAYERS and all(a is None for a in attns)
    err = float(jnp.max(jnp.abs(y_f32 - y_ref)))
    assert err < 2e-2, err

    # bf16 activations/weights with f32 accumulation (bf16 exp auto-enabled on v6e/v7x).
    y_bf16, _ = encoder_forward(x.astype(jnp.bfloat16), layers, norm, n_heads=H)
    y_bf16 = jax.block_until_ready(y_bf16)
    assert y_bf16.shape == (B, L, D)
    assert bool(jnp.all(jnp.isfinite(y_bf16.astype(jnp.float32))))

    print("KERNEL_OK")
</pallas_src>

<mosaic_0001>
module attributes {stable_mosaic.version = 11 : i64} {
  func.func @_encoder_layer_kernel(%arg0: i32, %arg1: i32, %arg2: i32, %arg3: memref<1x16x128xf32, #tpu.memory_space<vmem>>, %arg4: memref<1x4x16x32xf32, #tpu.memory_space<vmem>>, %arg5: memref<1x4x16x32xf32, #tpu.memory_space<vmem>>, %arg6: memref<1x4x16x32xf32, #tpu.memory_space<vmem>>, %arg7: memref<4x32x128xf32, #tpu.memory_space<vmem>>, %arg8: memref<1x128xf32, #tpu.memory_space<vmem>>, %arg9: memref<1x128xf32, #tpu.memory_space<vmem>>, %arg10: memref<1x128xf32, #tpu.memory_space<vmem>>, %arg11: memref<128x256xf32, #tpu.memory_space<vmem>>, %arg12: memref<1x256xf32, #tpu.memory_space<vmem>>, %arg13: memref<256x128xf32, #tpu.memory_space<vmem>>, %arg14: memref<1x128xf32, #tpu.memory_space<vmem>>, %arg15: memref<1x128xf32, #tpu.memory_space<vmem>>, %arg16: memref<1x128xf32, #tpu.memory_space<vmem>>, %arg17: memref<1x128xf32, #tpu.memory_space<vmem>>, %arg18: memref<1x128xf32, #tpu.memory_space<vmem>>, %arg19: memref<1x16x128xf32, #tpu.memory_space<vmem>>, %arg20: memref<4x16x1xf32, #tpu.memory_space<vmem>>, %arg21: memref<4x16x1xf32, #tpu.memory_space<vmem>>, %arg22: memref<4x16x32xf32, #tpu.memory_space<vmem>>) attributes {dimension_semantics = [#tpu.dimension_semantics<parallel>, #tpu.dimension_semantics<parallel>, #tpu.dimension_semantics<arbitrary>], iteration_bounds = array<i64: 2, 2, 2>, scalar_prefetch = 0 : i64, scratch_operands = 3 : i64, tpu.core_type = #tpu.core_type<tc>, window_params = [{transform_indices = @transform_0, window_bounds = array<i64: 1, 16, 128>}, {transform_indices = @transform_1, window_bounds = array<i64: 1, 4, 16, 32>}, {transform_indices = @transform_2, window_bounds = array<i64: 1, 4, 16, 32>}, {transform_indices = @transform_3, window_bounds = array<i64: 1, 4, 16, 32>}, {pipeline_mode = #tpu.pipeline_mode<synchronous>, transform_indices = @transform_4, window_bounds = array<i64: 4, 32, 128>}, {pipeline_mode = #tpu.pipeline_mode<synchronous>, transform_indices = @transform_5, window_bounds = array<i64: 1, 128>}, {pipeline_mode = #tpu.pipeline_mode<synchronous>, transform_indices = @transform_6, window_bounds = array<i64: 1, 128>}, {pipeline_mode = #tpu.pipeline_mode<synchronous>, transform_indices = @transform_7, window_bounds = array<i64: 1, 128>}, {pipeline_mode = #tpu.pipeline_mode<synchronous>, transform_indices = @transform_8, window_bounds = array<i64: 128, 256>}, {pipeline_mode = #tpu.pipeline_mode<synchronous>, transform_indices = @transform_9, window_bounds = array<i64: 1, 256>}, {pipeline_mode = #tpu.pipeline_mode<synchronous>, transform_indices = @transform_10, window_bounds = array<i64: 256, 128>}, {pipeline_mode = #tpu.pipeline_mode<synchronous>, transform_indices = @transform_11, window_bounds = array<i64: 1, 128>}, {pipeline_mode = #tpu.pipeline_mode<synchronous>, transform_indices = @transform_12, window_bounds = array<i64: 1, 128>}, {pipeline_mode = #tpu.pipeline_mode<synchronous>, transform_indices = @transform_13, window_bounds = array<i64: 1, 128>}, {pipeline_mode = #tpu.pipeline_mode<synchronous>, transform_indices = @transform_14, window_bounds = array<i64: 1, 128>}, {pipeline_mode = #tpu.pipeline_mode<synchronous>, transform_indices = @transform_15, window_bounds = array<i64: 1, 128>}, {transform_indices = @transform_16, window_bounds = array<i64: 1, 16, 128>}]} {
    %c0_i32 = arith.constant 0 : i32
    %0 = arith.cmpi eq, %arg2, %c0_i32 : i32
    %1 = arith.extui %0 : i1 to i32
    %c0_i32_0 = arith.constant 0 : i32
    %2 = arith.cmpi ne, %1, %c0_i32_0 : i32
    scf.if %2 {
      %cst_34 = arith.constant 0xFF800000 : f32
      %35 = vector.broadcast %cst_34 : f32 to vector<4x16x1xf32>
      %c0_35 = arith.constant 0 : index
      %c0_36 = arith.constant 0 : index
      %c0_37 = arith.constant 0 : index
      %36 = vector.load %arg20[%c0_35, %c0_36, %c0_37] : memref<4x16x1xf32, #tpu.memory_space<vmem>>, vector<4x16x1xf32>
      tpu.vector_store %arg20[%c0_35, %c0_36, %c0_37], %35 {strides = array<i32>} : memref<4x16x1xf32, #tpu.memory_space<vmem>>, vector<4x16x1xf32>,
      %cst_38 = arith.constant 0.000000e+00 : f32
      %37 = vector.broadcast %cst_38 : f32 to vector<4x16x1xf32>
      %c0_39 = arith.constant 0 : index
      %c0_40 = arith.constant 0 : index
      %c0_41 = arith.constant 0 : index
      %38 = vector.load %arg21[%c0_39, %c0_40, %c0_41] : memref<4x16x1xf32, #tpu.memory_space<vmem>>, vector<4x16x1xf32>
      tpu.vector_store %arg21[%c0_39, %c0_40, %c0_41], %37 {strides = array<i32>} : memref<4x16x1xf32, #tpu.memory_space<vmem>>, vector<4x16x1xf32>,
      %cst_42 = arith.constant 0.000000e+00 : f32
      %39 = vector.broadcast %cst_42 : f32 to vector<4x16x32xf32>
      %c0_43 = arith.constant 0 : index
      %c0_44 = arith.constant 0 : index
      %c0_45 = arith.constant 0 : index
      %40 = vector.load %arg22[%c0_43, %c0_44, %c0_45] : memref<4x16x32xf32, #tpu.memory_space<vmem>>, vector<4x16x32xf32>
      tpu.vector_store %arg22[%c0_43, %c0_44, %c0_45], %39 {strides = array<i32>} : memref<4x16x32xf32, #tpu.memory_space<vmem>>, vector<4x16x32xf32>,
    } else {
    }
    %c0 = arith.constant 0 : index
    %c0_1 = arith.constant 0 : index
    %c0_2 = arith.constant 0 : index
    %c0_3 = arith.constant 0 : index
    %3 = vector.load %arg4[%c0, %c0_1, %c0_2, %c0_3] : memref<1x4x16x32xf32, #tpu.memory_space<vmem>>, vector<1x4x16x32xf32>
    %4 = vector.shape_cast %3 : vector<1x4x16x32xf32> to vector<4x16x32xf32>
    %c0_4 = arith.constant 0 : index
    %c0_5 = arith.constant 0 : index
    %c0_6 = arith.constant 0 : index
    %c0_7 = arith.constant 0 : index
    %5 = vector.load %arg5[%c0_4, %c0_5, %c0_6, %c0_7] : memref<1x4x16x32xf32, #tpu.memory_space<vmem>>, vector<1x4x16x32xf32>
    %6 = vector.shape_cast %5 : vector<1x4x16x32xf32> to vector<4x16x32xf32>
    %c0_8 = arith.constant 0 : index
    %c0_9 = arith.constant 0 : index
    %c0_10 = arith.constant 0 : index
    %c0_11 = arith.constant 0 : index
    %7 = vector.load %arg6[%c0_8, %c0_9, %c0_10, %c0_11] : memref<1x4x16x32xf32, #tpu.memory_space<vmem>>, vector<1x4x16x32xf32>
    %8 = vector.shape_cast %7 : vector<1x4x16x32xf32> to vector<4x16x32xf32>
    %cst = arith.constant dense<0.000000e+00> : vector<4x16x16xf32>
    %9 = tpu.matmul %4, %6, %cst {dimension_numbers = #tpu.dot_dimension_numbers<[2], [2], [1], [1], [0, 0, 0, 1, 1, 1], [0], [0]>} : vector<4x16x32xf32>, vector<4x16x32xf32>, vector<4x16x16xf32> -> vector<4x16x16xf32>
    %c0_12 = arith.constant 0 : index
    %c0_13 = arith.constant 0 : index
    %c0_14 = arith.constant 0 : index
    %10 = vector.load %arg20[%c0_12, %c0_13, %c0_14] : memref<4x16x1xf32, #tpu.memory_space<vmem>>, vector<4x16x1xf32>
    %cst_15 = arith.constant dense<0xFF800000> : vector<4x16xf32>
    %11 = vector.multi_reduction <maximumf>, %9, %cst_15 [2] : vector<4x16x16xf32> to vector<4x16xf32>
    %12 = vector.shape_cast %11 : vector<4x16xf32> to vector<4x16x1xf32>
    %13 = arith.maximumf %10, %12 : vector<4x16x1xf32>
    %14 = arith.subf %10, %13 : vector<4x16x1xf32>
    %15 = math.exp %14 : vector<4x16x1xf32>
    %16 = vector.broadcast %13 : vector<4x16x1xf32> to vector<4x16x16xf32>
    %17 = arith.subf %9, %16 : vector<4x16x16xf32>
    %18 = math.exp %17 : vector<4x16x16xf32>
    %cst_16 = arith.constant dense<0.000000e+00> : vector<4x16xf32>
    %19 = vector.multi_reduction <add>, %18, %cst_16 [2] : vector<4x16x16xf32> to vector<4x16xf32>
    %20 = vector.shape_cast %19 : vector<4x16xf32> to vector<4x16x1xf32>
    %c0_17 = arith.constant 0 : index
    %c0_18 = arith.constant 0 : index
    %c0_19 = arith.constant 0 : index
    %21 = vector.load %arg21[%c0_17, %c0_18, %c0_19] : memref<4x16x1xf32, #tpu.memory_space<vmem>>, vector<4x16x1xf32>
    %22 = arith.mulf %15, %21 : vector<4x16x1xf32>
    %23 = arith.addf %22, %20 : vector<4x16x1xf32>
    %c0_20 = arith.constant 0 : index
    %c0_21 = arith.constant 0 : index
    %c0_22 = arith.constant 0 : index
    %24 = vector.load %arg21[%c0_20, %c0_21, %c0_22] : memref<4x16x1xf32, #tpu.memory_space<vmem>>, vector<4x16x1xf32>
    tpu.vector_store %arg21[%c0_20, %c0_21, %c0_22], %23 {strides = array<i32>} : memref<4x16x1xf32, #tpu.memory_space<vmem>>, vector<4x16x1xf32>,
    %cst_23 = arith.constant dense<0.000000e+00> : vector<4x16x32xf32>
    %25 = tpu.matmul %18, %8, %cst_23 {dimension_numbers = #tpu.dot_dimension_numbers<[2], [1], [1], [2], [0, 0, 0, 1, 1, 2], [0], [0]>} : vector<4x16x16xf32>, vector<4x16x32xf32>, vector<4x16x32xf32> -> vector<4x16x32xf32>
    %c0_24 = arith.constant 0 : index
    %c0_25 = arith.constant 0 : index
    %c0_26 = arith.constant 0 : index
    %26 = vector.load %arg22[%c0_24, %c0_25, %c0_26] : memref<4x16x32xf32, #tpu.memory_space<vmem>>, vector<4x16x32xf32>
    %27 = vector.broadcast %15 : vector<4x16x1xf32> to vector<4x16x32xf32>
    %28 = arith.mulf %27, %26 : vector<4x16x32xf32>
    %29 = arith.addf %28, %25 : vector<4x16x32xf32>
    %c0_27 = arith.constant 0 : index
    %c0_28 = arith.constant 0 : index
    %c0_29 = arith.constant 0 : index
    %30 = vector.load %arg22[%c0_27, %c0_28, %c0_29] : memref<4x16x32xf32, #tpu.memory_space<vmem>>, vector<4x16x32xf32>
    tpu.vector_store %arg22[%c0_27, %c0_28, %c0_29], %29 {strides = array<i32>} : memref<4x16x32xf32, #tpu.memory_space<vmem>>, vector<4x16x32xf32>,
    %c0_30 = arith.constant 0 : index
    %c0_31 = arith.constant 0 : index
    %c0_32 = arith.constant 0 : index
    %31 = vector.load %arg20[%c0_30, %c0_31, %c0_32] : memref<4x16x1xf32, #tpu.memory_space<vmem>>, vector<4x16x1xf32>
    tpu.vector_store %arg20[%c0_30, %c0_31, %c0_32], %13 {strides = array<i32>} : memref<4x16x1xf32, #tpu.memory_space<vmem>>, vector<4x16x1xf32>,
    %c1_i32 = arith.constant 1 : i32
    %32 = arith.cmpi eq, %arg2, %c1_i32 : i32
    %33 = arith.extui %32 : i1 to i32
    %c0_i32_33 = arith.constant 0 : i32
    %34 = arith.cmpi ne, %33, %c0_i32_33 : i32
    scf.if %34 {
      %c0_34 = arith.constant 0 : index
      %c0_35 = arith.constant 0 : index
      %c0_36 = arith.constant 0 : index
      %35 = vector.load %arg21[%c0_34, %c0_35, %c0_36] : memref<4x16x1xf32, #tpu.memory_space<vmem>>, vector<4x16x1xf32>
      %cst_37 = arith.constant 1.000000e+00 : f32
      %36 = vector.broadcast %cst_37 : f32 to vector<4x16x1xf32>
      %37 = arith.divf %36, %35 : vector<4x16x1xf32>
      %c0_38 = arith.constant 0 : index
      %c0_39 = arith.constant 0 : index
      %c0_40 = arith.constant 0 : index
      %38 = vector.load %arg22[%c0_38, %c0_39, %c0_40] : memref<4x16x32xf32, #tpu.memory_space<vmem>>, vector<4x16x32xf32>
      %39 = vector.broadcast %37 : vector<4x16x1xf32> to vector<4x16x32xf32>
      %40 = arith.mulf %38, %39 : vector<4x16x32xf32>
      %c0_41 = arith.constant 0 : index
      %c0_42 = arith.constant 0 : index
      %c0_43 = arith.constant 0 : index
      %41 = vector.load %arg7[%c0_41, %c0_42, %c0_43] : memref<4x32x128xf32, #tpu.memory_space<vmem>>, vector<4x32x128xf32>
      %cst_44 = arith.constant dense<0.000000e+00> : vector<4x16x128xf32>
      %42 = tpu.matmul %40, %41, %cst_44 {dimension_numbers = #tpu.dot_dimension_numbers<[2], [1], [1], [2], [0, 0, 0, 1, 1, 2], [0], [0]>} : vector<4x16x32xf32>, vector<4x32x128xf32>, vector<4x16x128xf32> -> vector<4x16x128xf32>
      %cst_45 = arith.constant dense<0.000000e+00> : vector<16x128xf32>
      %43 = vector.multi_reduction <add>, %42, %cst_45 [0] : vector<4x16x128xf32> to vector<16x128xf32>
      %c0_46 = arith.constant 0 : index
      %c0_47 = arith.constant 0 : index
      %44 = vector.load %arg8[%c0_46, %c0_47] : memref<1x128xf32, #tpu.memory_space<vmem>>, vector<1x128xf32>
      %45 = vector.broadcast %44 : vector<1x128xf32> to vector<16x128xf32>
      %46 = arith.addf %43, %45 : vector<16x128xf32>
      %c0_48 = arith.constant 0 : index
      %c0_49 = arith.constant 0 : index
      %c0_50 = arith.constant 0 : index
      %47 = vector.load %arg3[%c0_48, %c0_49, %c0_50] : memref<1x16x128xf32, #tpu.memory_space<vmem>>, vector<1x16x128xf32>
      %48 = vector.shape_cast %47 : vector<1x16x128xf32> to vector<16x128xf32>
      %49 = arith.addf %48, %46 : vector<16x128xf32>
      %c0_51 = arith.constant 0 : index
      %c0_52 = arith.constant 0 : index
      %50 = vector.load %arg9[%c0_51, %c0_52] : memref<1x128xf32, #tpu.memory_space<vmem>>, vector<1x128xf32>
      %c0_53 = arith.constant 0 : index
      %c0_54 = arith.constant 0 : index
      %51 = vector.load %arg10[%c0_53, %c0_54] : memref<1x128xf32, #tpu.memory_space<vmem>>, vector<1x128xf32>
      %cst_55 = arith.constant dense<0.000000e+00> : vector<16xf32>
      %52 = vector.multi_reduction <add>, %49, %cst_55 [1] : vector<16x128xf32> to vector<16xf32>
      %53 = vector.shape_cast %52 : vector<16xf32> to vector<16x1xf32>
      %cst_56 = arith.constant 1.280000e+02 : f32
      %54 = vector.broadcast %cst_56 : f32 to vector<16x1xf32>
      %55 = arith.divf %53, %54 : vector<16x1xf32>
      %56 = vector.broadcast %55 : vector<16x1xf32> to vector<16x128xf32>
      %57 = arith.subf %49, %56 : vector<16x128xf32>
      %58 = arith.mulf %57, %57 : vector<16x128xf32>
      %cst_57 = arith.constant dense<0.000000e+00> : vector<16xf32>
      %59 = vector.multi_reduction <add>, %58, %cst_57 [1] : vector<16x128xf32> to vector<16xf32>
      %60 = vector.shape_cast %59 : vector<16xf32> to vector<16x1xf32>
      %cst_58 = arith.constant 1.280000e+02 : f32
      %61 = vector.broadcast %cst_58 : f32 to vector<16x1xf32>
      %62 = arith.divf %60, %61 : vector<16x1xf32>
      %cst_59 = arith.constant 9.99999974E-6 : f32
      %63 = vector.broadcast %cst_59 : f32 to vector<16x1xf32>
      %64 = arith.addf %62, %63 : vector<16x1xf32>
      %65 = math.rsqrt %64 : vector<16x1xf32>
      %66 = vector.broadcast %55 : vector<16x1xf32> to vector<16x128xf32>
      %67 = arith.subf %49, %66 : vector<16x128xf32>
      %68 = vector.broadcast %65 : vector<16x1xf32> to vector<16x128xf32>
      %69 = arith.mulf %67, %68 : vector<16x128xf32>
      %70 = vector.broadcast %50 : vector<1x128xf32> to vector<16x128xf32>
      %71 = arith.mulf %69, %70 : vector<16x128xf32>
      %72 = vector.broadcast %51 : vector<1x128xf32> to vector<16x128xf32>
      %73 = arith.addf %71, %72 : vector<16x128xf32>
      %c0_60 = arith.constant 0 : index
      %c0_61 = arith.constant 0 : index
      %74 = vector.load %arg11[%c0_60, %c0_61] : memref<128x256xf32, #tpu.memory_space<vmem>>, vector<128x256xf32>
      %cst_62 = arith.constant dense<0.000000e+00> : vector<16x256xf32>
      %75 = tpu.matmul %73, %74, %cst_62 {dimension_numbers = #tpu.dot_dimension_numbers<[1], [0], [0], [1], [0, 0, 1, 1], [], []>} : vector<16x128xf32>, vector<128x256xf32>, vector<16x256xf32> -> vector<16x256xf32>
      %c0_63 = arith.constant 0 : index
      %c0_64 = arith.constant 0 : index
      %76 = vector.load %arg12[%c0_63, %c0_64] : memref<1x256xf32, #tpu.memory_space<vmem>>, vector<1x256xf32>
      %77 = vector.broadcast %76 : vector<1x256xf32> to vector<16x256xf32>
      %78 = arith.addf %75, %77 : vector<16x256xf32>
      %cst_65 = arith.constant 0.000000e+00 : f32
      %79 = vector.broadcast %cst_65 : f32 to vector<16x256xf32>
      %80 = arith.maximumf %78, %79 : vector<16x256xf32>
      %c0_66 = arith.constant 0 : index
      %c0_67 = arith.constant 0 : index
      %81 = vector.load %arg13[%c0_66, %c0_67] : memref<256x128xf32, #tpu.memory_space<vmem>>, vector<256x128xf32>
      %cst_68 = arith.constant dense<0.000000e+00> : vector<16x128xf32>
      %82 = tpu.matmul %80, %81, %cst_68 {dimension_numbers = #tpu.dot_dimension_numbers<[1], [0], [0], [1], [0, 0, 1, 1], [], []>} : vector<16x256xf32>, vector<256x128xf32>, vector<16x128xf32> -> vector<16x128xf32>
      %c0_69 = arith.constant 0 : index
      %c0_70 = arith.constant 0 : index
      %83 = vector.load %arg14[%c0_69, %c0_70] : memref<1x128xf32, #tpu.memory_space<vmem>>, vector<1x128xf32>
      %84 = vector.broadcast %83 : vector<1x128xf32> to vector<16x128xf32>
      %85 = arith.addf %82, %84 : vector<16x128xf32>
      %86 = arith.addf %73, %85 : vector<16x128xf32>
      %c0_71 = arith.constant 0 : index
      %c0_72 = arith.constant 0 : index
      %87 = vector.load %arg15[%c0_71, %c0_72] : memref<1x128xf32, #tpu.memory_space<vmem>>, vector<1x128xf32>
      %c0_73 = arith.constant 0 : index
      %c0_74 = arith.constant 0 : index
      %88 = vector.load %arg16[%c0_73, %c0_74] : memref<1x128xf32, #tpu.memory_space<vmem>>, vector<1x128xf32>
      %cst_75 = arith.constant dense<0.000000e+00> : vector<16xf32>
      %89 = vector.multi_reduction <add>, %86, %cst_75 [1] : vector<16x128xf32> to vector<16xf32>
      %90 = vector.shape_cast %89 : vector<16xf32> to vector<16x1xf32>
      %cst_76 = arith.constant 1.280000e+02 : f32
      %91 = vector.broadcast %cst_76 : f32 to vector<16x1xf32>
      %92 = arith.divf %90, %91 : vector<16x1xf32>
      %93 = vector.broadcast %92 : vector<16x1xf32> to vector<16x128xf32>
      %94 = arith.subf %86, %93 : vector<16x128xf32>
      %95 = arith.mulf %94, %94 : vector<16x128xf32>
      %cst_77 = arith.constant dense<0.000000e+00> : vector<16xf32>
      %96 = vector.multi_reduction <add>, %95, %cst_77 [1] : vector<16x128xf32> to vector<16xf32>
      %97 = vector.shape_cast %96 : vector<16xf32> to vector<16x1xf32>
      %cst_78 = arith.constant 1.280000e+02 : f32
      %98 = vector.broadcast %cst_78 : f32 to vector<16x1xf32>
      %99 = arith.divf %97, %98 : vector<16x1xf32>
      %cst_79 = arith.constant 9.99999974E-6 : f32
      %100 = vector.broadcast %cst_79 : f32 to vector<16x1xf32>
      %101 = arith.addf %99, %100 : vector<16x1xf32>
      %102 = math.rsqrt %101 : vector<16x1xf32>
      %103 = vector.broadcast %92 : vector<16x1xf32> to vector<16x128xf32>
      %104 = arith.subf %86, %103 : vector<16x128xf32>
      %105 = vector.broadcast %102 : vector<16x1xf32> to vector<16x128xf32>
      %106 = arith.mulf %104, %105 : vector<16x128xf32>
      %107 = vector.broadcast %87 : vector<1x128xf32> to vector<16x128xf32>
      %108 = arith.mulf %106, %107 : vector<16x128xf32>
      %109 = vector.broadcast %88 : vector<1x128xf32> to vector<16x128xf32>
      %110 = arith.addf %108, %109 : vector<16x128xf32>
      %c0_80 = arith.constant 0 : index
      %c0_81 = arith.constant 0 : index
      %c0_82 = arith.constant 0 : index
      %111 = vector.load %arg19[%c0_80, %c0_81, %c0_82] : memref<1x16x128xf32, #tpu.memory_space<vmem>>, vector<1x16x128xf32>
      %112 = vector.shape_cast %111 : vector<1x16x128xf32> to vector<16x128xf32>
      %113 = vector.shape_cast %110 : vector<16x128xf32> to vector<1x16x128xf32>
      tpu.vector_store %arg19[%c0_80, %c0_81, %c0_82], %113 {strides = array<i32>} : memref<1x16x128xf32, #tpu.memory_space<vmem>>, vector<1x16x128xf32>,
    } else {
    }
    return
  }
  func.func @transform_0(%arg0: i32, %arg1: i32, %arg2: i32) -> (i32, i32, i32) {
    %c0_i32 = arith.constant 0 : i32
    %c0_i32_0 = arith.constant 0 : i32
    return %arg0, %arg1, %c0_i32 : i32, i32, i32
  }
  func.func @transform_1(%arg0: i32, %arg1: i32, %arg2: i32) -> (i32, i32, i32, i32) {
    %c0_i32 = arith.constant 0 : i32
    %c0_i32_0 = arith.constant 0 : i32
    %c0_i32_1 = arith.constant 0 : i32
    return %arg0, %c0_i32, %arg1, %c0_i32_0 : i32, i32, i32, i32
  }
  func.func @transform_2(%arg0: i32, %arg1: i32, %arg2: i32) -> (i32, i32, i32, i32) {
    %c1_i32 = arith.constant 1 : i32
    %c0_i32 = arith.constant 0 : i32
    %c0_i32_0 = arith.constant 0 : i32
    return %arg0, %c1_i32, %arg2, %c0_i32 : i32, i32, i32, i32
  }
  func.func @transform_3(%arg0: i32, %arg1: i32, %arg2: i32) -> (i32, i32, i32, i32) {
    %c2_i32 = arith.constant 2 : i32
    %c0_i32 = arith.constant 0 : i32
    %c0_i32_0 = arith.constant 0 : i32
    return %arg0, %c2_i32, %arg2, %c0_i32 : i32, i32, i32, i32
  }
  func.func @transform_4(%arg0: i32, %arg1: i32, %arg2: i32) -> (i32, i32, i32) {
    %c0_i32 = arith.constant 0 : i32
    %c0_i32_0 = arith.constant 0 : i32
    %c0_i32_1 = arith.constant 0 : i32
    %c0_i32_2 = arith.constant 0 : i32
    return %c0_i32, %c0_i32_0, %c0_i32_1 : i32, i32, i32
  }
  func.func @transform_5(%arg0: i32, %arg1: i32, %arg2: i32) -> (i32, i32) {
    %c0_i32 = arith.constant 0 : i32
    %c0_i32_0 = arith.constant 0 : i32
    %c0_i32_1 = arith.constant 0 : i32
    return %c0_i32, %c0_i32_0 : i32, i32
  }
  func.func @transform_6(%arg0: i32, %arg1: i32, %arg2: i32) -> (i32, i32) {
    %c0_i32 = arith.constant 0 : i32
    %c0_i32_0 = arith.constant 0 : i32
    %c0_i32_1 = arith.constant 0 : i32
    return %c0_i32, %c0_i32_0 : i32, i32
  }
  func.func @transform_7(%arg0: i32, %arg1: i32, %arg2: i32) -> (i32, i32) {
    %c0_i32 = arith.constant 0 : i32
    %c0_i32_0 = arith.constant 0 : i32
    %c0_i32_1 = arith.constant 0 : i32
    return %c0_i32, %c0_i32_0 : i32, i32
  }
  func.func @transform_8(%arg0: i32, %arg1: i32, %arg2: i32) -> (i32, i32) {
    %c0_i32 = arith.constant 0 : i32
    %c0_i32_0 = arith.constant 0 : i32
    %c0_i32_1 = arith.constant 0 : i32
    return %c0_i32, %c0_i32_0 : i32, i32
  }
  func.func @transform_9(%arg0: i32, %arg1: i32, %arg2: i32) -> (i32, i32) {
    %c0_i32 = arith.constant 0 : i32
    %c0_i32_0 = arith.constant 0 : i32
    %c0_i32_1 = arith.constant 0 : i32
    return %c0_i32, %c0_i32_0 : i32, i32
  }
  func.func @transform_10(%arg0: i32, %arg1: i32, %arg2: i32) -> (i32, i32) {
    %c0_i32 = arith.constant 0 : i32
    %c0_i32_0 = arith.constant 0 : i32
    %c0_i32_1 = arith.constant 0 : i32
    return %c0_i32, %c0_i32_0 : i32, i32
  }
  func.func @transform_11(%arg0: i32, %arg1: i32, %arg2: i32) -> (i32, i32) {
    %c0_i32 = arith.constant 0 : i32
    %c0_i32_0 = arith.constant 0 : i32
    %c0_i32_1 = arith.constant 0 : i32
    return %c0_i32, %c0_i32_0 : i32, i32
  }
  func.func @transform_12(%arg0: i32, %arg1: i32, %arg2: i32) -> (i32, i32) {
    %c0_i32 = arith.constant 0 : i32
    %c0_i32_0 = arith.constant 0 : i32
    %c0_i32_1 = arith.constant 0 : i32
    return %c0_i32, %c0_i32_0 : i32, i32
  }
  func.func @transform_13(%arg0: i32, %arg1: i32, %arg2: i32) -> (i32, i32) {
    %c0_i32 = arith.constant 0 : i32
    %c0_i32_0 = arith.constant 0 : i32
    %c0_i32_1 = arith.constant 0 : i32
    return %c0_i32, %c0_i32_0 : i32, i32
  }
  func.func @transform_14(%arg0: i32, %arg1: i32, %arg2: i32) -> (i32, i32) {
    %c0_i32 = arith.constant 0 : i32
    %c0_i32_0 = arith.constant 0 : i32
    %c0_i32_1 = arith.constant 0 : i32
    return %c0_i32, %c0_i32_0 : i32, i32
  }
  func.func @transform_15(%arg0: i32, %arg1: i32, %arg2: i32) -> (i32, i32) {
    %c0_i32 = arith.constant 0 : i32
    %c0_i32_0 = arith.constant 0 : i32
    %c0_i32_1 = arith.constant 0 : i32
    return %c0_i32, %c0_i32_0 : i32, i32
  }
  func.func @transform_16(%arg0: i32, %arg1: i32, %arg2: i32) -> (i32, i32, i32) {
    %c0_i32 = arith.constant 0 : i32
    %c0_i32_0 = arith.constant 0 : i32
    return %arg0, %arg1, %c0_i32 : i32, i32, i32
  }
}

module attributes {stable_mosaic.version = 11 : i64} {
  func.func @_encoder_layer_kernel(%arg0: i32, %arg1: i32, %arg2: i32, %arg3: memref<1x16x128xf32, #tpu.memory_space<vmem>>, %arg4: memref<1x4x16x32xf32, #tpu.memory_space<vmem>>, %arg5: memref<1x4x16x32xf32, #tpu.memory_space<vmem>>, %arg6: memref<1x4x16x32xf32, #tpu.memory_space<vmem>>, %arg7: memref<4x32x128xf32, #tpu.memory_space<vmem>>, %arg8: memref<1x128xf32, #tpu.memory_space<vmem>>, %arg9: memref<1x128xf32, #tpu.memory_space<vmem>>, %arg10: memref<1x128xf32, #tpu.memory_space<vmem>>, %arg11: memref<128x256xf32, #tpu.memory_space<vmem>>, %arg12: memref<1x256xf32, #tpu.memory_space<vmem>>, %arg13: memref<256x128xf32, #tpu.memory_space<vmem>>, %arg14: memref<1x128xf32, #tpu.memory_space<vmem>>, %arg15: memref<1x128xf32, #tpu.memory_space<vmem>>, %arg16: memref<1x128xf32, #tpu.memory_space<vmem>>, %arg17: memref<1x128xf32, #tpu.memory_space<vmem>>, %arg18: memref<1x128xf32, #tpu.memory_space<vmem>>, %arg19: memref<1x16x128xf32, #tpu.memory_space<vmem>>, %arg20: memref<4x16x1xf32, #tpu.memory_space<vmem>>, %arg21: memref<4x16x1xf32, #tpu.memory_space<vmem>>, %arg22: memref<4x16x32xf32, #tpu.memory_space<vmem>>) attributes {dimension_semantics = [#tpu.dimension_semantics<parallel>, #tpu.dimension_semantics<parallel>, #tpu.dimension_semantics<arbitrary>], iteration_bounds = array<i64: 2, 2, 2>, scalar_prefetch = 0 : i64, scratch_operands = 3 : i64, tpu.core_type = #tpu.core_type<tc>, window_params = [{transform_indices = @transform_0, window_bounds = array<i64: 1, 16, 128>}, {transform_indices = @transform_1, window_bounds = array<i64: 1, 4, 16, 32>}, {transform_indices = @transform_2, window_bounds = array<i64: 1, 4, 16, 32>}, {transform_indices = @transform_3, window_bounds = array<i64: 1, 4, 16, 32>}, {pipeline_mode = #tpu.pipeline_mode<synchronous>, transform_indices = @transform_4, window_bounds = array<i64: 4, 32, 128>}, {pipeline_mode = #tpu.pipeline_mode<synchronous>, transform_indices = @transform_5, window_bounds = array<i64: 1, 128>}, {pipeline_mode = #tpu.pipeline_mode<synchronous>, transform_indices = @transform_6, window_bounds = array<i64: 1, 128>}, {pipeline_mode = #tpu.pipeline_mode<synchronous>, transform_indices = @transform_7, window_bounds = array<i64: 1, 128>}, {pipeline_mode = #tpu.pipeline_mode<synchronous>, transform_indices = @transform_8, window_bounds = array<i64: 128, 256>}, {pipeline_mode = #tpu.pipeline_mode<synchronous>, transform_indices = @transform_9, window_bounds = array<i64: 1, 256>}, {pipeline_mode = #tpu.pipeline_mode<synchronous>, transform_indices = @transform_10, window_bounds = array<i64: 256, 128>}, {pipeline_mode = #tpu.pipeline_mode<synchronous>, transform_indices = @transform_11, window_bounds = array<i64: 1, 128>}, {pipeline_mode = #tpu.pipeline_mode<synchronous>, transform_indices = @transform_12, window_bounds = array<i64: 1, 128>}, {pipeline_mode = #tpu.pipeline_mode<synchronous>, transform_indices = @transform_13, window_bounds = array<i64: 1, 128>}, {pipeline_mode = #tpu.pipeline_mode<synchronous>, transform_indices = @transform_14, window_bounds = array<i64: 1, 128>}, {pipeline_mode = #tpu.pipeline_mode<synchronous>, transform_indices = @transform_15, window_bounds = array<i64: 1, 128>}, {transform_indices = @transform_16, window_bounds = array<i64: 1, 16, 128>}]} {
    %c0_i32 = arith.constant 0 : i32
    %0 = arith.cmpi eq, %arg2, %c0_i32 : i32
    %1 = arith.extui %0 : i1 to i32
    %c0_i32_0 = arith.constant 0 : i32
    %2 = arith.cmpi ne, %1, %c0_i32_0 : i32
    scf.if %2 {
      %cst_34 = arith.constant 0xFF800000 : f32
      %35 = vector.broadcast %cst_34 : f32 to vector<4x16x1xf32>
      %c0_35 = arith.constant 0 : index
      %c0_36 = arith.constant 0 : index
      %c0_37 = arith.constant 0 : index
      %36 = vector.load %arg20[%c0_35, %c0_36, %c0_37] : memref<4x16x1xf32, #tpu.memory_space<vmem>>, vector<4x16x1xf32>
      tpu.vector_store %arg20[%c0_35, %c0_36, %c0_37], %35 {strides = array<i32>} : memref<4x16x1xf32, #tpu.memory_space<vmem>>, vector<4x16x1xf32>,
      %cst_38 = arith.constant 0.000000e+00 : f32
      %37 = vector.broadcast %cst_38 : f32 to vector<4x16x1xf32>
      %c0_39 = arith.constant 0 : index
      %c0_40 = arith.constant 0 : index
      %c0_41 = arith.constant 0 : index
      %38 = vector.load %arg21[%c0_39, %c0_40, %c0_41] : memref<4x16x1xf32, #tpu.memory_space<vmem>>, vector<4x16x1xf32>
      tpu.vector_store %arg21[%c0_39, %c0_40, %c0_41], %37 {strides = array<i32>} : memref<4x16x1xf32, #tpu.memory_space<vmem>>, vector<4x16x1xf32>,
      %cst_42 = arith.constant 0.000000e+00 : f32
      %39 = vector.broadcast %cst_42 : f32 to vector<4x16x32xf32>
      %c0_43 = arith.constant 0 : index
      %c0_44 = arith.constant 0 : index
      %c0_45 = arith.constant 0 : index
      %40 = vector.load %arg22[%c0_43, %c0_44, %c0_45] : memref<4x16x32xf32, #tpu.memory_space<vmem>>, vector<4x16x32xf32>
      tpu.vector_store %arg22[%c0_43, %c0_44, %c0_45], %39 {strides = array<i32>} : memref<4x16x32xf32, #tpu.memory_space<vmem>>, vector<4x16x32xf32>,
    } else {
    }
    %c0 = arith.constant 0 : index
    %c0_1 = arith.constant 0 : index
    %c0_2 = arith.constant 0 : index
    %c0_3 = arith.constant 0 : index
    %3 = vector.load %arg4[%c0, %c0_1, %c0_2, %c0_3] : memref<1x4x16x32xf32, #tpu.memory_space<vmem>>, vector<1x4x16x32xf32>
    %4 = vector.shape_cast %3 : vector<1x4x16x32xf32> to vector<4x16x32xf32>
    %c0_4 = arith.constant 0 : index
    %c0_5 = arith.constant 0 : index
    %c0_6 = arith.constant 0 : index
    %c0_7 = arith.constant 0 : index
    %5 = vector.load %arg5[%c0_4, %c0_5, %c0_6, %c0_7] : memref<1x4x16x32xf32, #tpu.memory_space<vmem>>, vector<1x4x16x32xf32>
    %6 = vector.shape_cast %5 : vector<1x4x16x32xf32> to vector<4x16x32xf32>
    %c0_8 = arith.constant 0 : index
    %c0_9 = arith.constant 0 : index
    %c0_10 = arith.constant 0 : index
    %c0_11 = arith.constant 0 : index
    %7 = vector.load %arg6[%c0_8, %c0_9, %c0_10, %c0_11] : memref<1x4x16x32xf32, #tpu.memory_space<vmem>>, vector<1x4x16x32xf32>
    %8 = vector.shape_cast %7 : vector<1x4x16x32xf32> to vector<4x16x32xf32>
    %cst = arith.constant dense<0.000000e+00> : vector<4x16x16xf32>
    %9 = tpu.matmul %4, %6, %cst {dimension_numbers = #tpu.dot_dimension_numbers<[2], [2], [1], [1], [0, 0, 0, 1, 1, 1], [0], [0]>} : vector<4x16x32xf32>, vector<4x16x32xf32>, vector<4x16x16xf32> -> vector<4x16x16xf32>
    %c0_12 = arith.constant 0 : index
    %c0_13 = arith.constant 0 : index
    %c0_14 = arith.constant 0 : index
    %10 = vector.load %arg20[%c0_12, %c0_13, %c0_14] : memref<4x16x1xf32, #tpu.memory_space<vmem>>, vector<4x16x1xf32>
    %cst_15 = arith.constant dense<0xFF800000> : vector<4x16xf32>
    %11 = vector.multi_reduction <maximumf>, %9, %cst_15 [2] : vector<4x16x16xf32> to vector<4x16xf32>
    %12 = vector.shape_cast %11 : vector<4x16xf32> to vector<4x16x1xf32>
    %13 = arith.maximumf %10, %12 : vector<4x16x1xf32>
    %14 = arith.subf %10, %13 : vector<4x16x1xf32>
    %15 = math.exp %14 : vector<4x16x1xf32>
    %16 = vector.broadcast %13 : vector<4x16x1xf32> to vector<4x16x16xf32>
    %17 = arith.subf %9, %16 : vector<4x16x16xf32>
    %18 = math.exp %17 : vector<4x16x16xf32>
    %cst_16 = arith.constant dense<0.000000e+00> : vector<4x16xf32>
    %19 = vector.multi_reduction <add>, %18, %cst_16 [2] : vector<4x16x16xf32> to vector<4x16xf32>
    %20 = vector.shape_cast %19 : vector<4x16xf32> to vector<4x16x1xf32>
    %c0_17 = arith.constant 0 : index
    %c0_18 = arith.constant 0 : index
    %c0_19 = arith.constant 0 : index
    %21 = vector.load %arg21[%c0_17, %c0_18, %c0_19] : memref<4x16x1xf32, #tpu.memory_space<vmem>>, vector<4x16x1xf32>
    %22 = arith.mulf %15, %21 : vector<4x16x1xf32>
    %23 = arith.addf %22, %20 : vector<4x16x1xf32>
    %c0_20 = arith.constant 0 : index
    %c0_21 = arith.constant 0 : index
    %c0_22 = arith.constant 0 : index
    %24 = vector.load %arg21[%c0_20, %c0_21, %c0_22] : memref<4x16x1xf32, #tpu.memory_space<vmem>>, vector<4x16x1xf32>
    tpu.vector_store %arg21[%c0_20, %c0_21, %c0_22], %23 {strides = array<i32>} : memref<4x16x1xf32, #tpu.memory_space<vmem>>, vector<4x16x1xf32>,
    %cst_23 = arith.constant dense<0.000000e+00> : vector<4x16x32xf32>
    %25 = tpu.matmul %18, %8, %cst_23 {dimension_numbers = #tpu.dot_dimension_numbers<[2], [1], [1], [2], [0, 0, 0, 1, 1, 2], [0], [0]>} : vector<4x16x16xf32>, vector<4x16x32xf32>, vector<4x16x32xf32> -> vector<4x16x32xf32>
    %c0_24 = arith.constant 0 : index
    %c0_25 = arith.constant 0 : index
    %c0_26 = arith.constant 0 : index
    %26 = vector.load %arg22[%c0_24, %c0_25, %c0_26] : memref<4x16x32xf32, #tpu.memory_space<vmem>>, vector<4x16x32xf32>
    %27 = vector.broadcast %15 : vector<4x16x1xf32> to vector<4x16x32xf32>
    %28 = arith.mulf %27, %26 : vector<4x16x32xf32>
    %29 = arith.addf %28, %25 : vector<4x16x32xf32>
    %c0_27 = arith.constant 0 : index
    %c0_28 = arith.constant 0 : index
    %c0_29 = arith.constant 0 : index
    %30 = vector.load %arg22[%c0_27, %c0_28, %c0_29] : memref<4x16x32xf32, #tpu.memory_space<vmem>>, vector<4x16x32xf32>
    tpu.vector_store %arg22[%c0_27, %c0_28, %c0_29], %29 {strides = array<i32>} : memref<4x16x32xf32, #tpu.memory_space<vmem>>, vector<4x16x32xf32>,
    %c0_30 = arith.constant 0 : index
    %c0_31 = arith.constant 0 : index
    %c0_32 = arith.constant 0 : index
    %31 = vector.load %arg20[%c0_30, %c0_31, %c0_32] : memref<4x16x1xf32, #tpu.memory_space<vmem>>, vector<4x16x1xf32>
    tpu.vector_store %arg20[%c0_30, %c0_31, %c0_32], %13 {strides = array<i32>} : memref<4x16x1xf32, #tpu.memory_space<vmem>>, vector<4x16x1xf32>,
    %c1_i32 = arith.constant 1 : i32
    %32 = arith.cmpi eq, %arg2, %c1_i32 : i32
    %33 = arith.extui %32 : i1 to i32
    %c0_i32_33 = arith.constant 0 : i32
    %34 = arith.cmpi ne, %33, %c0_i32_33 : i32
    scf.if %34 {
      %c0_34 = arith.constant 0 : index
      %c0_35 = arith.constant 0 : index
      %c0_36 = arith.constant 0 : index
      %35 = vector.load %arg21[%c0_34, %c0_35, %c0_36] : memref<4x16x1xf32, #tpu.memory_space<vmem>>, vector<4x16x1xf32>
      %cst_37 = arith.constant 1.000000e+00 : f32
      %36 = vector.broadcast %cst_37 : f32 to vector<4x16x1xf32>
      %37 = arith.divf %36, %35 : vector<4x16x1xf32>
      %c0_38 = arith.constant 0 : index
      %c0_39 = arith.constant 0 : index
      %c0_40 = arith.constant 0 : index
      %38 = vector.load %arg22[%c0_38, %c0_39, %c0_40] : memref<4x16x32xf32, #tpu.memory_space<vmem>>, vector<4x16x32xf32>
      %39 = vector.broadcast %37 : vector<4x16x1xf32> to vector<4x16x32xf32>
      %40 = arith.mulf %38, %39 : vector<4x16x32xf32>
      %c0_41 = arith.constant 0 : index
      %c0_42 = arith.constant 0 : index
      %c0_43 = arith.constant 0 : index
      %41 = vector.load %arg7[%c0_41, %c0_42, %c0_43] : memref<4x32x128xf32, #tpu.memory_space<vmem>>, vector<4x32x128xf32>
      %cst_44 = arith.constant dense<0.000000e+00> : vector<4x16x128xf32>
      %42 = tpu.matmul %40, %41, %cst_44 {dimension_numbers = #tpu.dot_dimension_numbers<[2], [1], [1], [2], [0, 0, 0, 1, 1, 2], [0], [0]>} : vector<4x16x32xf32>, vector<4x32x128xf32>, vector<4x16x128xf32> -> vector<4x16x128xf32>
      %cst_45 = arith.constant dense<0.000000e+00> : vector<16x128xf32>
      %43 = vector.multi_reduction <add>, %42, %cst_45 [0] : vector<4x16x128xf32> to vector<16x128xf32>
      %c0_46 = arith.constant 0 : index
      %c0_47 = arith.constant 0 : index
      %44 = vector.load %arg8[%c0_46, %c0_47] : memref<1x128xf32, #tpu.memory_space<vmem>>, vector<1x128xf32>
      %45 = vector.broadcast %44 : vector<1x128xf32> to vector<16x128xf32>
      %46 = arith.addf %43, %45 : vector<16x128xf32>
      %c0_48 = arith.constant 0 : index
      %c0_49 = arith.constant 0 : index
      %c0_50 = arith.constant 0 : index
      %47 = vector.load %arg3[%c0_48, %c0_49, %c0_50] : memref<1x16x128xf32, #tpu.memory_space<vmem>>, vector<1x16x128xf32>
      %48 = vector.shape_cast %47 : vector<1x16x128xf32> to vector<16x128xf32>
      %49 = arith.addf %48, %46 : vector<16x128xf32>
      %c0_51 = arith.constant 0 : index
      %c0_52 = arith.constant 0 : index
      %50 = vector.load %arg9[%c0_51, %c0_52] : memref<1x128xf32, #tpu.memory_space<vmem>>, vector<1x128xf32>
      %c0_53 = arith.constant 0 : index
      %c0_54 = arith.constant 0 : index
      %51 = vector.load %arg10[%c0_53, %c0_54] : memref<1x128xf32, #tpu.memory_space<vmem>>, vector<1x128xf32>
      %cst_55 = arith.constant dense<0.000000e+00> : vector<16xf32>
      %52 = vector.multi_reduction <add>, %49, %cst_55 [1] : vector<16x128xf32> to vector<16xf32>
      %53 = vector.shape_cast %52 : vector<16xf32> to vector<16x1xf32>
      %cst_56 = arith.constant 1.280000e+02 : f32
      %54 = vector.broadcast %cst_56 : f32 to vector<16x1xf32>
      %55 = arith.divf %53, %54 : vector<16x1xf32>
      %56 = vector.broadcast %55 : vector<16x1xf32> to vector<16x128xf32>
      %57 = arith.subf %49, %56 : vector<16x128xf32>
      %58 = arith.mulf %57, %57 : vector<16x128xf32>
      %cst_57 = arith.constant dense<0.000000e+00> : vector<16xf32>
      %59 = vector.multi_reduction <add>, %58, %cst_57 [1] : vector<16x128xf32> to vector<16xf32>
      %60 = vector.shape_cast %59 : vector<16xf32> to vector<16x1xf32>
      %cst_58 = arith.constant 1.280000e+02 : f32
      %61 = vector.broadcast %cst_58 : f32 to vector<16x1xf32>
      %62 = arith.divf %60, %61 : vector<16x1xf32>
      %cst_59 = arith.constant 9.99999974E-6 : f32
      %63 = vector.broadcast %cst_59 : f32 to vector<16x1xf32>
      %64 = arith.addf %62, %63 : vector<16x1xf32>
      %65 = math.rsqrt %64 : vector<16x1xf32>
      %66 = vector.broadcast %55 : vector<16x1xf32> to vector<16x128xf32>
      %67 = arith.subf %49, %66 : vector<16x128xf32>
      %68 = vector.broadcast %65 : vector<16x1xf32> to vector<16x128xf32>
      %69 = arith.mulf %67, %68 : vector<16x128xf32>
      %70 = vector.broadcast %50 : vector<1x128xf32> to vector<16x128xf32>
      %71 = arith.mulf %69, %70 : vector<16x128xf32>
      %72 = vector.broadcast %51 : vector<1x128xf32> to vector<16x128xf32>
      %73 = arith.addf %71, %72 : vector<16x128xf32>
      %c0_60 = arith.constant 0 : index
      %c0_61 = arith.constant 0 : index
      %74 = vector.load %arg11[%c0_60, %c0_61] : memref<128x256xf32, #tpu.memory_space<vmem>>, vector<128x256xf32>
      %cst_62 = arith.constant dense<0.000000e+00> : vector<16x256xf32>
      %75 = tpu.matmul %73, %74, %cst_62 {dimension_numbers = #tpu.dot_dimension_numbers<[1], [0], [0], [1], [0, 0, 1, 1], [], []>} : vector<16x128xf32>, vector<128x256xf32>, vector<16x256xf32> -> vector<16x256xf32>
      %c0_63 = arith.constant 0 : index
      %c0_64 = arith.constant 0 : index
      %76 = vector.load %arg12[%c0_63, %c0_64] : memref<1x256xf32, #tpu.memory_space<vmem>>, vector<1x256xf32>
      %77 = vector.broadcast %76 : vector<1x256xf32> to vector<16x256xf32>
      %78 = arith.addf %75, %77 : vector<16x256xf32>
      %cst_65 = arith.constant 0.000000e+00 : f32
      %79 = vector.broadcast %cst_65 : f32 to vector<16x256xf32>
      %80 = arith.maximumf %78, %79 : vector<16x256xf32>
      %c0_66 = arith.constant 0 : index
      %c0_67 = arith.constant 0 : index
      %81 = vector.load %arg13[%c0_66, %c0_67] : memref<256x128xf32, #tpu.memory_space<vmem>>, vector<256x128xf32>
      %cst_68 = arith.constant dense<0.000000e+00> : vector<16x128xf32>
      %82 = tpu.matmul %80, %81, %cst_68 {dimension_numbers = #tpu.dot_dimension_numbers<[1], [0], [0], [1], [0, 0, 1, 1], [], []>} : vector<16x256xf32>, vector<256x128xf32>, vector<16x128xf32> -> vector<16x128xf32>
      %c0_69 = arith.constant 0 : index
      %c0_70 = arith.constant 0 : index
      %83 = vector.load %arg14[%c0_69, %c0_70] : memref<1x128xf32, #tpu.memory_space<vmem>>, vector<1x128xf32>
      %84 = vector.broadcast %83 : vector<1x128xf32> to vector<16x128xf32>
      %85 = arith.addf %82, %84 : vector<16x128xf32>
      %86 = arith.addf %73, %85 : vector<16x128xf32>
      %c0_71 = arith.constant 0 : index
      %c0_72 = arith.constant 0 : index
      %87 = vector.load %arg15[%c0_71, %c0_72] : memref<1x128xf32, #tpu.memory_space<vmem>>, vector<1x128xf32>
      %c0_73 = arith.constant 0 : index
      %c0_74 = arith.constant 0 : index
      %88 = vector.load %arg16[%c0_73, %c0_74] : memref<1x128xf32, #tpu.memory_space<vmem>>, vector<1x128xf32>
      %cst_75 = arith.constant dense<0.000000e+00> : vector<16xf32>
      %89 = vector.multi_reduction <add>, %86, %cst_75 [1] : vector<16x128xf32> to vector<16xf32>
      %90 = vector.shape_cast %89 : vector<16xf32> to vector<16x1xf32>
      %cst_76 = arith.constant 1.280000e+02 : f32
      %91 = vector.broadcast %cst_76 : f32 to vector<16x1xf32>
      %92 = arith.divf %90, %91 : vector<16x1xf32>
      %93 = vector.broadcast %92 : vector<16x1xf32> to vector<16x128xf32>
      %94 = arith.subf %86, %93 : vector<16x128xf32>
      %95 = arith.mulf %94, %94 : vector<16x128xf32>
      %cst_77 = arith.constant dense<0.000000e+00> : vector<16xf32>
      %96 = vector.multi_reduction <add>, %95, %cst_77 [1] : vector<16x128xf32> to vector<16xf32>
      %97 = vector.shape_cast %96 : vector<16xf32> to vector<16x1xf32>
      %cst_78 = arith.constant 1.280000e+02 : f32
      %98 = vector.broadcast %cst_78 : f32 to vector<16x1xf32>
      %99 = arith.divf %97, %98 : vector<16x1xf32>
      %cst_79 = arith.constant 9.99999974E-6 : f32
      %100 = vector.broadcast %cst_79 : f32 to vector<16x1xf32>
      %101 = arith.addf %99, %100 : vector<16x1xf32>
      %102 = math.rsqrt %101 : vector<16x1xf32>
      %103 = vector.broadcast %92 : vector<16x1xf32> to vector<16x128xf32>
      %104 = arith.subf %86, %103 : vector<16x128xf32>
      %105 = vector.broadcast %102 : vector<16x1xf32> to vector<16x128xf32>
      %106 = arith.mulf %104, %105 : vector<16x128xf32>
      %107 = vector.broadcast %87 : vector<1x128xf32> to vector<16x128xf32>
      %108 = arith.mulf %106, %107 : vector<16x128xf32>
      %109 = vector.broadcast %88 : vector<1x128xf32> to vector<16x128xf32>
      %110 = arith.addf %108, %109 : vector<16x128xf32>
      %c0_80 = arith.constant 0 : index
      %c0_81 = arith.constant 0 : index
      %c0_82 = arith.constant 0 : index
      %111 = vector.load %arg19[%c0_80, %c0_81, %c0_82] : memref<1x16x128xf32, #tpu.memory_space<vmem>>, vector<1x16x128xf32>
      %112 = vector.shape_cast %111 : vector<1x16x128xf32> to vector<16x128xf32>
      %113 = vector.shape_cast %110 : vector<16x128xf32> to vector<1x16x128xf32>
      tpu.vector_store %arg19[%c0_80, %c0_81, %c0_82], %113 {strides = array<i32>} : memref<1x16x128xf32, #tpu.memory_space<vmem>>, vector<1x16x128xf32>,
    } else {
    }
    return
  }
  func.func @transform_0(%arg0: i32, %arg1: i32, %arg2: i32) -> (i32, i32, i32) {
    %c0_i32 = arith.constant 0 : i32
    %c0_i32_0 = arith.constant 0 : i32
    return %arg0, %arg1, %c0_i32 : i32, i32, i32
  }
  func.func @transform_1(%arg0: i32, %arg1: i32, %arg2: i32) -> (i32, i32, i32, i32) {
    %c0_i32 = arith.constant 0 : i32
    %c0_i32_0 = arith.constant 0 : i32
    %c0_i32_1 = arith.constant 0 : i32
    return %arg0, %c0_i32, %arg1, %c0_i32_0 : i32, i32, i32, i32
  }
  func.func @transform_2(%arg0: i32, %arg1: i32, %arg2: i32) -> (i32, i32, i32, i32) {
    %c1_i32 = arith.constant 1 : i32
    %c0_i32 = arith.constant 0 : i32
    %c0_i32_0 = arith.constant 0 : i32
    return %arg0, %c1_i32, %arg2, %c0_i32 : i32, i32, i32, i32
  }
  func.func @transform_3(%arg0: i32, %arg1: i32, %arg2: i32) -> (i32, i32, i32, i32) {
    %c2_i32 = arith.constant 2 : i32
    %c0_i32 = arith.constant 0 : i32
    %c0_i32_0 = arith.constant 0 : i32
    return %arg0, %c2_i32, %arg2, %c0_i32 : i32, i32, i32, i32
  }
  func.func @transform_4(%arg0: i32, %arg1: i32, %arg2: i32) -> (i32, i32, i32) {
    %c0_i32 = arith.constant 0 : i32
    %c0_i32_0 = arith.constant 0 : i32
    %c0_i32_1 = arith.constant 0 : i32
    %c0_i32_2 = arith.constant 0 : i32
    return %c0_i32, %c0_i32_0, %c0_i32_1 : i32, i32, i32
  }
  func.func @transform_5(%arg0: i32, %arg1: i32, %arg2: i32) -> (i32, i32) {
    %c0_i32 = arith.constant 0 : i32
    %c0_i32_0 = arith.constant 0 : i32
    %c0_i32_1 = arith.constant 0 : i32
    return %c0_i32, %c0_i32_0 : i32, i32
  }
  func.func @transform_6(%arg0: i32, %arg1: i32, %arg2: i32) -> (i32, i32) {
    %c0_i32 = arith.constant 0 : i32
    %c0_i32_0 = arith.constant 0 : i32
    %c0_i32_1 = arith.constant 0 : i32
    return %c0_i32, %c0_i32_0 : i32, i32
  }
  func.func @transform_7(%arg0: i32, %arg1: i32, %arg2: i32) -> (i32, i32) {
    %c0_i32 = arith.constant 0 : i32
    %c0_i32_0 = arith.constant 0 : i32
    %c0_i32_1 = arith.constant 0 : i32
    return %c0_i32, %c0_i32_0 : i32, i32
  }
  func.func @transform_8(%arg0: i32, %arg1: i32, %arg2: i32) -> (i32, i32) {
    %c0_i32 = arith.constant 0 : i32
    %c0_i32_0 = arith.constant 0 : i32
    %c0_i32_1 = arith.constant 0 : i32
    return %c0_i32, %c0_i32_0 : i32, i32
  }
  func.func @transform_9(%arg0: i32, %arg1: i32, %arg2: i32) -> (i32, i32) {
    %c0_i32 = arith.constant 0 : i32
    %c0_i32_0 = arith.constant 0 : i32
    %c0_i32_1 = arith.constant 0 : i32
    return %c0_i32, %c0_i32_0 : i32, i32
  }
  func.func @transform_10(%arg0: i32, %arg1: i32, %arg2: i32) -> (i32, i32) {
    %c0_i32 = arith.constant 0 : i32
    %c0_i32_0 = arith.constant 0 : i32
    %c0_i32_1 = arith.constant 0 : i32
    return %c0_i32, %c0_i32_0 : i32, i32
  }
  func.func @transform_11(%arg0: i32, %arg1: i32, %arg2: i32) -> (i32, i32) {
    %c0_i32 = arith.constant 0 : i32
    %c0_i32_0 = arith.constant 0 : i32
    %c0_i32_1 = arith.constant 0 : i32
    return %c0_i32, %c0_i32_0 : i32, i32
  }
  func.func @transform_12(%arg0: i32, %arg1: i32, %arg2: i32) -> (i32, i32) {
    %c0_i32 = arith.constant 0 : i32
    %c0_i32_0 = arith.constant 0 : i32
    %c0_i32_1 = arith.constant 0 : i32
    return %c0_i32, %c0_i32_0 : i32, i32
  }
  func.func @transform_13(%arg0: i32, %arg1: i32, %arg2: i32) -> (i32, i32) {
    %c0_i32 = arith.constant 0 : i32
    %c0_i32_0 = arith.constant 0 : i32
    %c0_i32_1 = arith.constant 0 : i32
    return %c0_i32, %c0_i32_0 : i32, i32
  }
  func.func @transform_14(%arg0: i32, %arg1: i32, %arg2: i32) -> (i32, i32) {
    %c0_i32 = arith.constant 0 : i32
    %c0_i32_0 = arith.constant 0 : i32
    %c0_i32_1 = arith.constant 0 : i32
    return %c0_i32, %c0_i32_0 : i32, i32
  }
  func.func @transform_15(%arg0: i32, %arg1: i32, %arg2: i32) -> (i32, i32) {
    %c0_i32 = arith.constant 0 : i32
    %c0_i32_0 = arith.constant 0 : i32
    %c0_i32_1 = arith.constant 0 : i32
    return %c0_i32, %c0_i32_0 : i32, i32
  }
  func.func @transform_16(%arg0: i32, %arg1: i32, %arg2: i32) -> (i32, i32, i32) {
    %c0_i32 = arith.constant 0 : i32
    %c0_i32_0 = arith.constant 0 : i32
    return %arg0, %arg1, %c0_i32 : i32, i32, i32
  }
}

</mosaic_0001>

<bundles_post_ra>
// kernel: tpu_custom_call.1
= control target key start
LH: loop header
LB: loop body
LE: loop exit
PB: predicated region body
PF: predicated region fallthrough
CT: control target
= control target key end

     0   :  { %s4378_s0 = inlined_call_operand.hbm [shape: f32[2,32,128], index: 0, kind: input, shape index: {}]   ;;  %s4379_s1 = inlined_call_operand.hbm [shape: f32[2,12,32,32], index: 1, kind: input, shape index: {}]   ;;  %s4380_s2 = inlined_call_operand.hbm [shape: f32[2,12,32,32], index: 2, kind: input, shape index: {}]   ;;  %s4381_s3 = inlined_call_operand.hbm [shape: f32[2,12,32,32], index: 3, kind: input, shape index: {}]   ;;  %s4382_s4 = inlined_call_operand.hbm [shape: f32[4,32,128], index: 4, kind: input, shape index: {}]   ;;  %s4383_s5 = inlined_call_operand.vmem [shape: f32[1,128], index: 5, kind: input, shape index: {}]   ;;  %s4384_s6 = inlined_call_operand.vmem [shape: f32[1,128], index: 6, kind: input, shape index: {}]   ;;  %s4385_s7 = inlined_call_operand.vmem [shape: f32[1,128], index: 7, kind: input, shape index: {}]   ;;  %s4386_s8 = inlined_call_operand.hbm [shape: f32[128,256], index: 8, kind: input, shape index: {}]   ;;  %s4387_s9 = inlined_call_operand.vmem [shape: f32[1,256], index: 9, kind: input, shape index: {}]   ;;  %s4388_s10 = inlined_call_operand.hbm [shape: f32[256,128], index: 10, kind: input, shape index: {}]   ;;  %s4389_s11 = inlined_call_operand.vmem [shape: f32[1,128], index: 11, kind: input, shape index: {}]   ;;  %s4390_s12 = inlined_call_operand.vmem [shape: f32[1,128], index: 12, kind: input, shape index: {}]   ;;  %s4391_s13 = inlined_call_operand.vmem [shape: f32[1,128], index: 13, kind: input, shape index: {}]   ;;  %s4392_s14 = inlined_call_operand.vmem [shape: f32[1,128], index: 14, kind: input, shape index: {}]   ;;  %s4393_s15 = inlined_call_operand.vmem [shape: f32[1,128], index: 15, kind: input, shape index: {}]   ;;  %s4394_s16 = inlined_call_operand.hbm [shape: f32[2,32,128], index: 16, kind: output, shape index: {}]  }
   0x1   :  { %4411 = sst [smem:[#allocation48_spill]] %s4378_s0 }
   0x2   :  { %4412 = sst [smem:[#allocation49_spill]] %s4382_s4 }
   0x3   :  { %4413 = sst [smem:[#allocation50_spill]] %s4383_s5 }
   0x4   :  { %4414 = sst [smem:[#allocation51_spill]] %s4384_s6 }
   0x5   :  { %4415 = sst [smem:[#allocation52_spill]] %s4385_s7 }
   0x6   :  { %4416 = sst [smem:[#allocation53_spill]] %s4386_s8 }
   0x7   :  { %4417 = sst [smem:[#allocation54_spill]] %s4387_s9 }
   0x8   :  { %4418 = sst [smem:[#allocation55_spill]] %s4388_s10 }
   0x9   :  { %4419 = sst [smem:[#allocation56_spill]] %s4389_s11 }
   0xa   :  { %4420 = sst [smem:[#allocation57_spill]] %s4390_s12 }
   0xb   :  { %4421 = sst [smem:[#allocation58_spill]] %s4391_s13 }
   0xc   :  { %4422 = sst [smem:[#allocation59_spill]] %s4394_s16 }
   0xd   :  { %21 = vsyncpa [#allocation6], 0 }
   0xe   :  { %23 = vsyncpa [#allocation6 + $0x1], 0 }
   0xf   :  { %24 = vsyncpa [#allocation9], 0 }
  0x10   :  { %26 = vsyncpa [#allocation9 + $0x1], 0 }
  0x11   :  { %27 = vsyncpa [#allocation12], 0 }
  0x12   :  { %29 = vsyncpa [#allocation12 + $0x1], 0 }
  0x13   :  { %30 = vsyncpa [#allocation15], 0 }
  0x14   :  { %31 = vsyncpa [#allocation7], 0 }
  0x15   :  { %33 = vsyncpa [#allocation7 + $0x1], 0  ;;  %s3717_s21 = smov 0   ;;  %s3719_s22 = smov 0  }
  0x16   :  { %s3721_s14 = smov 0   ;;  %s3723_s23 = smov 0  }
  0x17   :  { %s3725_s15 = smov 0   ;;  %s3727_s24 = smov 0  }
  0x18   :  { %s3729_s25 = smov 0   ;;  %s3731_s26 = smov 0  }
  0x19   :  { %s3733_s27 = smov 0   ;;  %s3735_s28 = smov 0  }
  0x1a   :  { %s3737_s29 = smov 0   ;;  %s3739_s30 = smov 0  }
  0x1b   :  { %s3741_s0 = smov 0  }
  0x1c LB: > { %4423 = sst [smem:[#allocation34_spill]] %s3550_s22  ;;  %s3783_s17 = sadd.s32 4294967295, %s3594_s0   ;;  %s3594_s0 = sphi %s3741_s0, %s39_s0   ;;  %s3590_s30 = sphi %s3739_s30, %s4496_s30   ;;  %s3586_s29 = sphi %s3737_s29, %s4495_s29   ;;  %s3582_s28 = sphi %s3735_s28, %s4494_s28   ;;  %s3578_s27 = sphi %s3733_s27, %s4493_s27   ;;  %s3574_s26 = sphi %s3731_s26, %s4492_s26   ;;  %s3570_s25 = sphi %s3729_s25, %s4491_s25   ;;  %s3566_s24 = sphi %s3727_s24, %s4482_s24   ;;  %s3562_s15 = sphi %s3725_s15, %s4490_s15   ;;  %s3558_s23 = sphi %s3723_s23, %s4489_s23   ;;  %s3554_s14 = sphi %s3721_s14, %s4488_s14   ;;  %s3550_s22 = sphi %s3719_s22, %s4487_s22   ;;  %s3546_s21 = sphi %s3717_s21, %s4479_s21  }
  0x1d   : > { %4424 = sst [smem:[#allocation35_spill]] %s3558_s23  ;;  %s51_s19 = sadd.s32 1, %s3582_s28 }
  0x1e   : > { %4425 = sst [smem:[#allocation36_spill]] %s3566_s24  ;;  %s54_s20 = sadd.s32 1, %s3586_s29 }
  0x1f   : > { %4426 = sst [smem:[#allocation37_spill]] %s3570_s25  ;;  %p52_p0 = scmp.ge.s32.totalorder %s51_s19, 2 }
  0x20   : > { %4427 = sst [smem:[#allocation38_spill]] %s3574_s26  ;;  %s58_s16 = sadd.s32 1, %s3590_s30 }
  0x21   : > { %4428 = sst [smem:[#allocation39_spill]] %s3578_s27  ;;  %p74_p1 = scmp.ne.s32.totalorder %s3566_s24, %s3562_s15 }
  0x22   : > { %s4498_s19 = smov (%p52_p0, %s51_s19), 0  ;;  %s4500_s20 = smov (!%p52_p0, %s54_s20), %s3586_s29 }
  0x23   : > { %4429 = sst [smem:[#allocation40_spill]] %s4498_s19  ;;  %p75_p2 = scmp.eq.s32.totalorder %s3594_s0, 0 }
  0x24   : > { %p80_p3 = scmp.ne.s32.totalorder %s3562_s15, %s3558_s23  ;;  %p56_p4 = scmp.ge.s32.totalorder %s4500_s20, 2 }
  0x25   : > { %p4400_p5 = scmp.eq.s32.totalorder %s3783_s17, 0  ;;  %p3804_p6 = por %p75_p2, %p74_p1 }
  0x26   : > { %s119_s18 = ssub.s32 %s3582_s28, %s4498_s19  ;;  %s4502_s20 = smov (%p56_p4, %s4500_s20), 0 }
  0x27   : > { %4431 = sst [smem:[#allocation41_spill]] %s4502_s20  ;;  %s4504_s16 = smov (!%p56_p4, %s58_s16), %s3590_s30 }
  0x28   : > { %s63_s26 = ssub.s32 %s3586_s29, %s4502_s20  ;;  %p3820_p7 = por %p4400_p5, %p80_p3 }
  0x29   : > { %p60_p8 = scmp.ge.s32.totalorder %s4504_s16, 2  ;;  %s123_s12 = sadd.s32 1, %s3554_s14 }
  0x2a   : > { %s4432_s13 = scalar_select %p3820_p7, 1, 0 }
  0x2b   : > { %p130_p9 = scmp.ne.s32.totalorder %s3554_s14, %s3550_s22  ;;  %p136_p10 = scmp.ne.s32.totalorder %s3550_s22, %s3546_s21 }
  0x2c   : > { %s4506_s16 = smov (%p60_p8, %s4504_s16), 0  ;;  %p442_p13 = scmp.eq.s32.totalorder %s3783_s17, 7 }
  0x2d   : > { %4433 = sst [smem:[#allocation42_spill]] %s4506_s16  ;;  %p3833_p11 = por %p130_p9, %p75_p2 }
  0x2e   : > { %p3839_p12 = por %p136_p10, %p4400_p5  ;;  %s62_s11 = ssub.s32 %s3590_s30, %s4506_s16 }
  0x2f   : > { %s64_s9 = sor.u32 %s63_s26, %s62_s11  ;;  %s120_s7 = sor.u32 %s119_s18, %s62_s11 }
  0x30   : > { %s4435_s19 = scalar_select %p3839_p12, 1, 0 }
  0x31   : > { %p65_p0 = scmp.eq.s32.totalorder %s64_s9, 0  ;;  %p121_p4 = scmp.eq.s32.totalorder %s120_s7, 0 }
  0x32   : > { %4436 = sst [smem:[#allocation43_spill]] %s4435_s19  ;;  %p3849_p8 = por %p442_p13, %p74_p1 }
  0x33   : > { %s4439_s6 = sadd.s32 4294967294, %s3594_s0   ;;  %s4440_s5 = sadd.s32 1, %s3566_s24 }
  0x34   : > { %s4437_s21 = scalar_select %p3849_p8, 1, 0 }
  0x35   : > { %p448_p2 = scmp.eq.s32.totalorder %s4439_s6, 7  ;;  %p2798_p10 = scmp.ge.s32.totalorder %s3594_s0, 1 }
  0x36   : > { %4438 = sst [smem:[#allocation44_spill]] %s4437_s21  ;;  %p455_p5 = scmp.lt.s32.totalorder %s3594_s0, 9 }
  0x37   : > { %s3858_s25 = scalar_select %p65_p0, %s3566_s24, %s4440_s5  }
  0x38   : > { %s3861_s22 = scalar_select %p121_p4, %s3554_s14, %s123_s12  }
  0x39   : > { %4441 = sst [smem:[#allocation45_spill]] %s3858_s25  ;;  %p3866_p9 = por %p448_p2, %p80_p3 }
  0x3a   : > { %4442 = sst [smem:[#allocation46_spill]] %s3861_s22  ;;  %p3872_p12 = pnand %p2798_p10, %p455_p5 }
  0x3b   : > { %s4443_s16 = scalar_select %p3866_p9, 1, 0 }
  0x3c   : > { %s3596_s9 = smov [#allocation14]   ;;  %p3115_p1 = pneg %p3872_p12 }
  0x3d   : > { %4444 = sst [smem:[#allocation47_spill]] %s4443_s16  ;;  %s489_s11 = sshll.u32 %s3596_s9, 4  ;;  %s490_s11 = int_to_ptr.vmem [resolvable:$true] %s489_s11 }
  0x3e   : > { %p4446_p13 = scmp.eq.s32.totalorder %s3783_s17, 0  ;;  %s3345_s6 = scalar_lea.vmem %s490_s11, 4096 }
  0x3f   : > { %p3346_p5 = scmp.ne.s32.totalorder %s490_s11, %s3345_s6  ;;  %p3353_p10 = scmp.lt.s32.totalorder %s490_s11, %s490_s11 }
  0x40   : > { %p3880_p0 = pnand %p3115_p1, %p4446_p13  ;;  %p3354_p9 = scmp.lt.s32.totalorder %s3345_s6, %s3345_s6 }
  0x42   : > { %p3336_p3 = pneg %p3880_p0  ;;  %p3355_p8 = por %p3354_p9, %p3353_p10 }
  0x44   : > { %p3348_p4 = pnand %p3346_p5, %p3336_p3 }
  0x46   : > { %p3349_p2 = pneg %p3348_p4 }
  0x48   : > { %p3356_p7 = pnand %p3355_p8, %p3349_p2 }
  0x4a   : > { %3359 = shalt.err (!%p3356_p7)
}
  0x4b   : > { %s3597_s12 = smov 256   ;;  %s3598_s26 = smov 16  }
  0x4c   : > { %s4448_s8 = sld [smem:[#allocation53_spill]]  ;;  %s3599_s25 = smov [#allocation13]  }
  0x4d   : > { %s467_s22 = sshll.u32 %s3599_s25, 4  ;;  %s468_s22 = int_to_ptr.vmem [resolvable:$true] %s467_s22 }
  0x4e   : > { %s3371_s16 = scalar_lea.vmem %s468_s22, 2048  ;;  %p3379_p8 = scmp.lt.s32.totalorder %s468_s22, %s468_s22 }
  0x4f   : > { %p3372_p1 = scmp.ne.s32.totalorder %s468_s22, %s3371_s16  ;;  %p3380_p7 = scmp.lt.s32.totalorder %s3371_s16, %s3371_s16 }
  0x51   : > { %p3374_p13 = pnand %p3372_p1, %p3336_p3  ;;  %p3381_p5 = por %p3380_p7, %p3379_p8 }
  0x52   : > { %3121 = dma.hbm_to_vmem [thread:$0]  (!%p3880_p0), %s4448_s8, 4096, %s490_s11, [#allocation15], %s3597_s12, %s3597_s12, %s3598_s26  }
  0x53   : > { %p3375_p9 = pneg %p3374_p13 }
  0x55   : > { %p3382_p4 = pnand %p3381_p5, %p3375_p9 }
  0x57   : > { %3385 = shalt.err (!%p3382_p4)
}
  0x58   : > { %s3600_s6 = smov 128   ;;  %s3601_s23 = smov 8  }
  0x59   : > { %s4449_s4 = sld [smem:[#allocation49_spill]]  ;;  %s3602_s25 = smov [#allocation16]  }
  0x5a   : > { %s505_s26 = sshll.u32 %s3602_s25, 4  ;;  %s506_s26 = int_to_ptr.vmem [resolvable:$true] %s505_s26 }
  0x5b   : > { %s3397_s18 = scalar_lea.vmem %s506_s26, 4096  ;;  %p3405_p13 = scmp.lt.s32.totalorder %s506_s26, %s506_s26 }
  0x5c   : > { %p3398_p2 = scmp.ne.s32.totalorder %s506_s26, %s3397_s18  ;;  %p3406_p9 = scmp.lt.s32.totalorder %s3397_s18, %s3397_s18 }
  0x5e   : > { %p3400_p10 = pnand %p3398_p2, %p3336_p3  ;;  %p3407_p8 = por %p3406_p9, %p3405_p13 }
  0x5f   : > { %3118 = dma.hbm_to_vmem [thread:$0]  (!%p3880_p0), %s4449_s4, 2048, %s468_s22, [#allocation12], %s3600_s6, %s3600_s6, %s3601_s23  }
  0x60   : > { %p3401_p1 = pneg %p3400_p10 }
  0x62   : > { %p3408_p7 = pnand %p3407_p8, %p3401_p1 }
  0x64   : > { %3411 = shalt.err (!%p3408_p7)
}
  0x65   : > { %s4450_s10 = sld [smem:[#allocation55_spill]]  ;;  %p2802_p5 = scmp.ge.s32.totalorder %s3594_s0, 8 }
  0x66   : > { %s3912_s22 = sand.u32 (!%p2802_p5), 1, %s3566_s24   ;;  %s2804_s11 = sshll.u32 (!%p2802_p5), %s3586_s29, 1 }
  0x67   : > { %530 = sbr.rel (%p2802_p5) target bundleno = 164 (0xa4), region = 64  ;;  %s2803_s12 = sshll.u32 (!%p2802_p5), %s3912_s22, 4 }
  0x68   : > { %s2805_s25 = sshll.u32 (!%p2802_p5), %s3590_s30, 2  ;;  %s538_s18 = scalar_lea.vmem (!%p2802_p5), [#allocation5], %s2803_s12 }
  0x69   : > { %s544_s5 = sadd.s32 (!%p2802_p5), %s2805_s25, %s2804_s11  ;;  %s547_s16 = sshll.u32 (!%p2802_p5), %s538_s18, 4  ;;  %s548_s16 = int_to_ptr.vmem [resolvable:$true] %s547_s16 }
  0x6a   : > { %s4451_s9 = sld [smem:[#allocation48_spill]] (!%p2802_p5)  ;;  %s535_s8 = scalar_lea.sflag (!%p2802_p5), [#allocation6], %s3912_s22 }
  0x6b   : > { %3124 = dma.hbm_to_vmem [thread:$0]  (!%p3880_p0), %s4450_s10, 4096, %s506_s26, [#allocation15], %s3600_s6, %s3600_s6, %s3601_s23  }
  0x6c   : > { %s2806_s23 = sshll.u32 %s544_s5, 7  ;;  %s3424_s10 = scalar_lea.vmem %s548_s16, 256 }
  0x6d   : > { %p3425_p0 = scmp.ne.s32.totalorder %s548_s16, %s3424_s10  ;;  %s3603_s24 = smov [#allocation5]  }
  0x6e   : > { %s3428_s21 = sshll.u32 %s3603_s24, 4  ;;  %s3429_s21 = int_to_ptr.vmem [resolvable:$false] %s3428_s21 }
  0x6f   : > { %p3426_p3 = pnand %p3425_p0, %p3804_p6  ;;  %s3430_s19 = scalar_lea.vmem %s3429_s21, 512 }
  0x70   : > { %s546_s4 = scalar_lea.hbm %s4451_s9, %s2806_s23  ;;  %p3431_p2 = scmp.lt.s32.totalorder %s548_s16, %s3429_s21 }
  0x71   : > { %p3427_p4 = pneg %p3426_p3  ;;  %p3432_p10 = scmp.lt.s32.totalorder %s3430_s19, %s3424_s10 }
  0x73   : > { %p3433_p1 = por %p3432_p10, %p3431_p2 }
  0x75   : > { %p3434_p13 = pnand %p3433_p1, %p3427_p4 }
  0x77   : > { %3437 = shalt.err (!%p3434_p13)
}
  0x78   : > { %s3604_s12 = smov 128   ;;  %s3605_s25 = smov 8  }
  0x79   : > { %3078 = dma.hbm_to_vmem [thread:$0]  (%p3804_p6), %s546_s4, 256, %s548_s16, %s535_s8, %s3604_s12, %s3604_s12, %s3605_s25  }
  0x7a   : > { %s557_s24 = sand.u32 1, %s3594_s0   ;;  %s2807_s5 = sshll.u32 %s3912_s22, 6 }
  0x7b   : > { %s3071_s21 = smul.u32 48, %s3590_s30  ;;  %s561_s10 = scalar_lea.vmem [#allocation8], %s2807_s5 }
  0x7c   : > { %s582_s19 = sshll.u32 %s561_s10, 4  ;;  %s3606_s22 = smov 512   ;;  %s583_s19 = int_to_ptr.vmem [resolvable:$true] %s582_s19 }
  0x7d   : > { %s3079_s18 = scalar_select %p3804_p6, [#allocation0], [#allocation24] }
  0x7e   : > { %s567_s23 = sadd.s32 %s3071_s21, %s2804_s11  ;;  %3080 = sst [smem:[#allocation19]] (%p3804_p6), %s3606_s22 }
  0x7f   : > { %s2809_s4 = sshll.u32 %s567_s23, 7  ;;  %s574_s8 = sld [smem:[%s3079_s18]]  }
  0x80   : > { %s569_s26 = scalar_lea.hbm %s4379_s1, %s2809_s4  ;;  %s3607_s9 = smov 256  }
  0x81   : > { %3081 = sst [smem:[#allocation19 + $0x1]] (%p3804_p6), %s3607_s9  ;;  %s3608_s12 = smov 2  }
  0x82   : > { %3082 = sst [smem:[#allocation19 + $0x2]] (%p3804_p6), %s3608_s12  ;;  %s3609_s11 = smov 128  }
  0x83   : > { %3083 = sst [smem:[#allocation19 + $0x3]] (%p3804_p6), %s3609_s11  ;;  %s3610_s10 = smov 8  }
  0x84   : > { %3084 = sst [smem:[#allocation19 + $0x4]] (%p3804_p6), %s3609_s11  ;;  %s3951_s18 = scalar_lea.sflag [#allocation9], %s557_s24 }
  0x85   : > { %s2810_s25 = sshll.u32 %s574_s8, 26  ;;  %3085 = sst [smem:[#allocation19 + $0x5]] (%p3804_p6), %s3610_s10 }
  0x86   : > { %s2811_s5 = sadd.s32 134217728, %s2810_s25  ;;  %s3611_s23 = smov 131072  }
  0x87   : > { %3086 = dma.general (%p3804_p6), %s569_s26, 1024, %s583_s19, %s3951_s18, %s3611_s23, [#allocation19], %s2811_s5, 0  }
  0x88   : > { %s607_s4 = sand.u32 1, %s3554_s14   ;;  %s2813_s8 = sshll.u32 %s3582_s28, 1 }
  0x89   : > { %s2812_s16 = sshll.u32 %s607_s4, 6  ;;  %s2650_s6 = sadd.s32 %s3071_s21, %s2813_s8 }
  0x8a   : > { %s2814_s22 = sshll.u32 %s2650_s6, 7  ;;  %s609_s25 = scalar_lea.vmem [#allocation10], %s2812_s16 }
  0x8b   : > { %s2652_s11 = scalar_lea.hbm %s4380_s2, %s2814_s22  ;;  %s631_s27 = sshll.u32 %s609_s25, 4  ;;  %s632_s27 = int_to_ptr.vmem [resolvable:$true] %s631_s27 }
  0x8c   : > { %s3087_s19 = scalar_select %p3833_p11, [#allocation0], [#allocation25] }
  0x8d   : > { %s3612_s5 = smov 512   ;;  %s2653_s10 = scalar_lea.hbm %s2652_s11, 2048 }
  0x8e   : > { %s623_s26 = sld [smem:[%s3087_s19]]   ;;  %s3613_s21 = smov 256  }
  0x8f   : > { %3088 = sst [smem:[#allocation21]] (%p3833_p11), %s3612_s5  ;;  %s3614_s23 = smov 2  }
  0x90   : > { %3089 = sst [smem:[#allocation21 + $0x1]] (%p3833_p11), %s3613_s21  ;;  %s3615_s4 = smov 128  }
  0x91   : > { %3090 = sst [smem:[#allocation21 + $0x2]] (%p3833_p11), %s3614_s23  ;;  %s3616_s6 = smov 8  }
  0x92   : > { %3091 = sst [smem:[#allocation21 + $0x3]] (%p3833_p11), %s3615_s4  ;;  %s3617_s12 = smov 131072  }
  0x93   : > { %3092 = sst [smem:[#allocation21 + $0x4]] (%p3833_p11), %s3615_s4 }
  0x94   : > { %s2815_s8 = sshll.u32 %s623_s26, 26  ;;  %3093 = sst [smem:[#allocation21 + $0x5]] (%p3833_p11), %s3616_s6 }
  0x95   : > { %s2816_s9 = sadd.s32 134217728, %s2815_s8 }
  0x96   : > { %3094 = dma.general (%p3833_p11), %s2653_s10, 1024, %s632_s27, %s3951_s18, %s3617_s12, [#allocation21], %s2816_s9, 0  }
  0x97   : > { %s2661_s19 = scalar_lea.hbm %s4381_s3, %s2814_s22  ;;  %s658_s5 = scalar_lea.vmem [#allocation11], %s2812_s16 }
  0x98   : > { %s680_s21 = sshll.u32 %s658_s5, 4  ;;  %s3618_s4 = smov 512   ;;  %s681_s21 = int_to_ptr.vmem [resolvable:$true] %s680_s21 }
  0x99   : > { %s3095_s26 = scalar_select %p3833_p11, [#allocation0], [#allocation26] }
  0x9a   : > { %3096 = sst [smem:[#allocation23]] (%p3833_p11), %s3618_s4  ;;  %s2662_s18 = scalar_lea.hbm %s2661_s19, 4096 }
  0x9b   : > { %s672_s23 = sld [smem:[%s3095_s26]]   ;;  %s3619_s27 = smov 256  }
  0x9c   : > { %3097 = sst [smem:[#allocation23 + $0x1]] (%p3833_p11), %s3619_s27  ;;  %s3620_s10 = smov 2  }
  0x9d   : > { %3098 = sst [smem:[#allocation23 + $0x2]] (%p3833_p11), %s3620_s10  ;;  %s3621_s22 = smov 128  }
  0x9e   : > { %3099 = sst [smem:[#allocation23 + $0x3]] (%p3833_p11), %s3621_s22  ;;  %s3622_s8 = smov 8  }
  0x9f   : > { %3100 = sst [smem:[#allocation23 + $0x4]] (%p3833_p11), %s3621_s22  ;;  %s655_s9 = scalar_lea.sflag [#allocation12], %s557_s24 }
  0xa0   : > { %3101 = sst [smem:[#allocation23 + $0x5]] (%p3833_p11), %s3622_s8  ;;  %s3623_s12 = smov 131072  }
  0xa1   : > { %s2820_s16 = sshll.u32 %s672_s23, 26 }
  0xa2   : > { %s2821_s6 = sadd.s32 134217728, %s2820_s16 }
  0xa3   : > { %3102 = dma.general (%p3833_p11), %s2662_s18, 1024, %s681_s21, %s655_s9, %s3623_s12, [#allocation23], %s2821_s6, 0  }
  0xa4 PF: > { %705 = sbr.rel (%p3872_p12) target bundleno = 2332 (0x91c), region = 84  ;;  %s4002_s11 = sand.u32 (!%p3872_p12), 1, %s3562_s15  }
  0xa5   : > { %s2823_s25 = sshll.u32 (!%p3872_p12), %s4002_s11, 4  ;;  %s708_s19 = scalar_lea.sflag (!%p3872_p12), [#allocation6], %s4002_s11 }
  0xa6   : > { %s4006_s5 = scalar_lea.vmem (!%p3872_p12), [#allocation5], %s2823_s25  ;;  %p4452_p6 = scmp.ne.s32.totalorder (!%p3872_p12), %s4432_s13, 0 }
  0xa9   : > { %3517 = dma.done.wait (%p4452_p6), %s708_s19, 256  }
  0xaa   : > { %3519 = vsyncadd (%p4452_p6), %s708_s19, 4294967040  ;;  %s716_s20 = sand.u32 1, %s3783_s17   ;;  %s2824_s7 = sshll.u32 %s4002_s11, 6 }
  0xab   : > { %s717_s24 = scalar_lea.sflag [#allocation9], %s716_s20  ;;  %s4014_s21 = scalar_lea.vmem [#allocation8], %s2824_s7 }
  0xac   : > { %3521 = dma.done.wait (%p4452_p6), %s717_s24, 1024  }
  0xad   : > { %3523 = vsyncadd (%p4452_p6), %s717_s24, 4294966272  ;;  %s4453_s26 = sld [smem:[#allocation34_spill]] }
  0xae   : > { %s4454_s23 = sld [smem:[#allocation43_spill]] }
  0xb3   : > { %s727_s4 = sand.u32 1, %s4453_s26  }
  0xb4   : > { %s2825_s18 = sshll.u32 %s727_s4, 6  ;;  %p4455_p11 = scmp.ne.s32.totalorder %s4454_s23, 0 }
  0xb5   : > { %s4021_s27 = scalar_lea.vmem [#allocation10], %s2825_s18 }
  0xb6   : > { %3525 = dma.done.wait (%p4455_p11), %s717_s24, 1024  }
  0xb7   : > { %3527 = vsyncadd (%p4455_p11), %s717_s24, 4294966272  ;;  %s735_s10 = scalar_lea.sflag [#allocation12], %s716_s20  ;;  %s4027_s22 = scalar_lea.vmem [#allocation11], %s2825_s18 }
  0xb8   : > { %3529 = dma.done.wait (%p4455_p11), %s735_s10, 1024  }
  0xb9   : > { %3531 = vsyncadd (%p4455_p11), %s735_s10, 4294966272  ;;  %p4456_p12 = scmp.eq.s32.totalorder %s3783_s17, 0 }
  0xbb   : > { %3533 = dma.done.wait (%p4456_p12), [#allocation12], 2048   ;;  %p4457_p9 = pmov %p4456_p12 }
  0xbd   : > { %3535 = vsyncadd (%p4457_p9), [#allocation12], 4294965248  ;;  %p4458_p8 = pmov %p4457_p9 }
  0xbf   : > { %3537 = dma.done.wait (%p4458_p8), [#allocation15], 8192   ;;  %p4459_p7 = pmov %p4458_p8 }
  0xc0   : > { %s4041_s13 = scalar_lea.vmem [#allocation17], %s2823_s25  ;;  %s4460_s16 = sld [smem:[#allocation37_spill]] }
  0xc1   : > { %3539 = vsyncadd (%p4459_p7), [#allocation15], 4294959104 }
  0xc6   : > { %p2831_p5 = scmp.ne.s32.totalorder %s4460_s16, 0 }
  0xc8   : > { %822 = sbr.rel (%p2831_p5) target bundleno = 218 (0xda), region = 116 }
  0xcd   : > { %vm823_vm0 = vcmask 7168   ;;  %vm840_vm1 = vcmask 261120   ;;  %v3624_v0 = vmov -inf   ;;  %v3625_v1 = vmov 0.0  }
  0xce   : > { %824 = vst.msk [vmem:[#allocation2] sm:$0xff] %vm823_vm0, %v3624_v0  ;;  %825 = vst.msk [vmem:[#allocation2 + $0x8] sm:$0xff] %vm823_vm0, %v3624_v0 }
  0xcf   : > { %826 = vst.msk [vmem:[#allocation2 + $0x10] sm:$0xff] %vm823_vm0, %v3624_v0  ;;  %827 = vst.msk [vmem:[#allocation2 + $0x18] sm:$0xff] %vm823_vm0, %v3624_v0 }
  0xd0   : > { %828 = vst.msk [vmem:[#allocation2 + $0x20] sm:$0xff] %vm823_vm0, %v3624_v0  ;;  %829 = vst.msk [vmem:[#allocation2 + $0x28] sm:$0xff] %vm823_vm0, %v3624_v0 }
  0xd1   : > { %830 = vst.msk [vmem:[#allocation2 + $0x30] sm:$0xff] %vm823_vm0, %v3624_v0  ;;  %831 = vst.msk [vmem:[#allocation2 + $0x38] sm:$0xff] %vm823_vm0, %v3624_v0 }
  0xd2   : > { %832 = vst.msk [vmem:[#allocation3] sm:$0xff] %vm823_vm0, %v3625_v1  ;;  %833 = vst.msk [vmem:[#allocation3 + $0x8] sm:$0xff] %vm823_vm0, %v3625_v1 }
  0xd3   : > { %834 = vst.msk [vmem:[#allocation3 + $0x10] sm:$0xff] %vm823_vm0, %v3625_v1  ;;  %835 = vst.msk [vmem:[#allocation3 + $0x18] sm:$0xff] %vm823_vm0, %v3625_v1 }
  0xd4   : > { %836 = vst.msk [vmem:[#allocation3 + $0x20] sm:$0xff] %vm823_vm0, %v3625_v1  ;;  %837 = vst.msk [vmem:[#allocation3 + $0x28] sm:$0xff] %vm823_vm0, %v3625_v1 }
  0xd5   : > { %838 = vst.msk [vmem:[#allocation3 + $0x30] sm:$0xff] %vm823_vm0, %v3625_v1  ;;  %839 = vst.msk [vmem:[#allocation3 + $0x38] sm:$0xff] %vm823_vm0, %v3625_v1 }
  0xd6   : > { %841 = vst.msk [vmem:[#allocation4] sm:$0xff] %vm840_vm1, %v3625_v1  ;;  %842 = vst.msk [vmem:[#allocation4 + $0x8] sm:$0xff] %vm840_vm1, %v3625_v1 }
  0xd7   : > { %843 = vst.msk [vmem:[#allocation4 + $0x10] sm:$0xff] %vm840_vm1, %v3625_v1  ;;  %844 = vst.msk [vmem:[#allocation4 + $0x18] sm:$0xff] %vm840_vm1, %v3625_v1 }
  0xd8   : > { %845 = vst.msk [vmem:[#allocation4 + $0x20] sm:$0xff] %vm840_vm1, %v3625_v1  ;;  %846 = vst.msk [vmem:[#allocation4 + $0x28] sm:$0xff] %vm840_vm1, %v3625_v1 }
  0xd9   : > { %847 = vst.msk [vmem:[#allocation4 + $0x30] sm:$0xff] %vm840_vm1, %v3625_v1  ;;  %848 = vst.msk [vmem:[#allocation4 + $0x38] sm:$0xff] %vm840_vm1, %v3625_v1 }
  0xda PF: > { %v858_v2 = vld [vmem:[%s4021_s27 + $0x8] sm:$0xff]  ;;  %vm873_vm2 = vcmask 261120   ;;  %v860_v3 = vld [vmem:[%s4021_s27 + $0x18] sm:$0xff]  ;;  %v857_v4 = vld [vmem:[%s4021_s27] sm:$0xff]  ;;  %vm1230_vm3 = vcmask 130048   ;;  %v3626_v32 = vmov 0  }
  0xdb   : > { %2971 = vmatprep.subr.msk.mxu0 %vm873_vm2, %v858_v2  ;;  %2978 = vmatprep.subr.msk.mxu1 %vm873_vm2, %v860_v3  ;;  %v859_v5 = vld [vmem:[%s4021_s27 + $0x10] sm:$0xff]  ;;  %v849_v6 = vld [vmem:[%s4014_s21] sm:$0xff]  ;;  %v862_v8 = vld [vmem:[%s4021_s27 + $0x28] sm:$0xff]  ;;  %vm1399_vm4 = vcmask 7168   ;;  %s4461_s17 = sld [smem:[#allocation37_spill]] }
  0xdc   : > { %2972 = vmatpush3.xpose.msk.msra.mxu0 %vm873_vm2, %v858_v2  ;;  %2979 = vmatpush3.xpose.msk.msra.mxu1 %vm873_vm2, %v860_v3  ;;  %v851_v7 = vld [vmem:[%s4014_s21 + $0x10] sm:$0xff]  ;;  %v864_v9 = vld [vmem:[%s4021_s27 + $0x38] sm:$0xff]  ;;  %v850_v10 = vld [vmem:[%s4014_s21 + $0x8] sm:$0xff] }
  0xdd   : > { %2973 = vmatprep.subr.msk.mxu0 %vm873_vm2, %v857_v4  ;;  %2980 = vmatprep.subr.msk.mxu1 %vm873_vm2, %v859_v5  ;;  %v852_v11 = vld [vmem:[%s4014_s21 + $0x18] sm:$0xff]  ;;  %v853_v12 = vld [vmem:[%s4014_s21 + $0x20] sm:$0xff]  ;;  %v863_v14 = vld [vmem:[%s4021_s27 + $0x30] sm:$0xff] }
  0xde   : > { %2975 = vmatprep.mubr.msk.f32.mxu0 %vm873_vm2, %v849_v6  ;;  %2982 = vmatprep.mubr.msk.f32.mxu1 %vm873_vm2, %v851_v7  ;;  %v861_v13 = vld [vmem:[%s4021_s27 + $0x20] sm:$0xff]  ;;  %v855_v15 = vld [vmem:[%s4014_s21 + $0x30] sm:$0xff]  ;;  %v854_v16 = vld [vmem:[%s4014_s21 + $0x28] sm:$0xff] }
  0xdf   : > { %v856_v17 = vld [vmem:[%s4014_s21 + $0x38] sm:$0xff]  ;;  %3274 = vset.pattern.permute.xlu0 %v3626_v32  ;;  %3275 = vset.pattern.permute.xlu1 %v3626_v32  ;;  %v1223_v35 = vld [vmem:[#allocation2 + $0x8] sm:$0xff]  ;;  %v1222_v37 = vld [vmem:[#allocation2] sm:$0xff] }
  0xe0   : > { %2974 = vmatpush3.xpose.msk.msra.mxu0 %vm873_vm2, %v857_v4  ;;  %2981 = vmatpush3.xpose.msk.msra.mxu1 %vm873_vm2, %v859_v5  ;;  %v1225_v40 = vld [vmem:[#allocation2 + $0x18] sm:$0xff]  ;;  %v1224_v43 = vld [vmem:[#allocation2 + $0x10] sm:$0xff]  ;;  %v1226_v49 = vld [vmem:[#allocation2 + $0x20] sm:$0xff] }
  0xe1   : > { %2985 = vmatprep.subr.msk.mxu0 %vm873_vm2, %v862_v8  ;;  %2992 = vmatprep.subr.msk.mxu1 %vm873_vm2, %v864_v9  ;;  %v4144_v51 = vld [vmem:[#allocation2 + $0x30] sm:$0xff]  ;;  %v1227_v57 = vld [vmem:[#allocation2 + $0x28] sm:$0xff]  ;;  %v4150_v59 = vld [vmem:[#allocation2 + $0x38] sm:$0xff]  ;;  %p2856_p0 = scmp.ne.s32.totalorder %s4461_s17, 1 }
  0xe2   : > { %v866_v2 = vld [vmem:[%s4027_s22 + $0x8] sm:$0xff]  ;;  %v865_v5 = vld [vmem:[%s4027_s22] sm:$0xff]  ;;  %s4462_s9 = sld [smem:[#allocation50_spill]] (!%p2856_p0) }
  0xe3   : > { %2976 = vmatmul.mubr.msk.f32.vlgmr.msra.gmra.mxu0 %vm873_vm2, %v850_v10  ;;  %2983 = vmatmul.mubr.msk.f32.vlgmr.msra.gmra.mxu1 %vm873_vm2, %v852_v11  ;;  %v868_v10 = vld [vmem:[%s4027_s22 + $0x18] sm:$0xff]  ;;  %s4463_s19 = sld [smem:[#allocation51_spill]] (!%p2856_p0) }
  0xe4   : > { %2986 = vmatpush3.xpose.msk.msra.mxu0 %vm873_vm2, %v862_v8  ;;  %2989 = vmatprep.mubr.msk.f32.mxu0 %vm873_vm2, %v853_v12  ;;  %v867_v12 = vld [vmem:[%s4027_s22 + $0x10] sm:$0xff]  ;;  %s4464_s7 = sld [smem:[#allocation52_spill]] (!%p2856_p0) }
  0xe5   : > { %2987 = vmatprep.subr.msk.mxu0 %vm873_vm2, %v861_v13  ;;  %2993 = vmatpush3.xpose.msk.msra.mxu1 %vm873_vm2, %v864_v9  ;;  %s4465_s26 = sld [smem:[#allocation54_spill]] (!%p2856_p0) }
  0xe6   : > { %2994 = vmatprep.subr.msk.mxu1 %vm873_vm2, %v863_v14  ;;  %2996 = vmatprep.mubr.msk.f32.mxu1 %vm873_vm2, %v855_v15  ;;  %v870_v15 = vld [vmem:[%s4027_s22 + $0x28] sm:$0xff]  ;;  %s4466_s18 = sld [smem:[#allocation56_spill]] (!%p2856_p0) }
  0xe7   : > { %s4468_s8 = sld [smem:[#allocation58_spill]] (!%p2856_p0) }
  0xe8   : > { %2988 = vmatpush3.xpose.msk.msra.mxu0 %vm873_vm2, %v861_v13 }
  0xe9   : > { %2995 = vmatpush3.xpose.msk.msra.mxu1 %vm873_vm2, %v863_v14  ;;  %2999 = vmatprep.subr.mxu0 %v866_v2 }
  0xea   : > { %3006 = vmatprep.subr.mxu1 %v868_v10 }
  0xeb   : > { %2990 = vmatmul.mubr.msk.f32.vlgmr.msra.gmra.mxu0 %vm873_vm2, %v854_v16 }
  0xec   : > { %2997 = vmatmul.mubr.msk.f32.vlgmr.msra.gmra.mxu1 %vm873_vm2, %v856_v17  ;;  %3000 = vmatpush3.msra.mxu0 %v866_v2 }
  0xed   : > { %3001 = vmatprep.subr.mxu0 %v865_v5  ;;  %3007 = vmatpush3.msra.mxu1 %v868_v10 }
  0xee   : > { %3002 = vmatpush3.msra.mxu0 %v865_v5  ;;  %3008 = vmatprep.subr.mxu1 %v867_v12 }
  0xef   : > { %3009 = vmatpush3.msra.mxu1 %v867_v12  ;;  %3013 = vmatprep.subr.mxu0 %v870_v15 }
 0x1a3   : > { %v4108_v18 = vpop.f32.mrf.mxu0  ;;  %v4110_v19 = vpop.f32.mrf.mxu1 }
 0x1a4   : > { %v1234_v20 = vsel %vm1230_vm3, %v4108_v18, -inf  ;;  %v1240_v23 = vsel %vm1230_vm3, %v4110_v19, -inf }
 0x1a5   : > { %1235 = vmax.xlane.f32.xlu1 %v1234_v20  ;;  %v4114_v21 = vpop.f32.mrf.mxu0  ;;  %v4120_v24 = vpop.f32.mrf.mxu1 }
 0x1a6   : > { %v1231_v22 = vsel %vm1230_vm3, %v4114_v21, -inf  ;;  %v1237_v25 = vsel %vm1230_vm3, %v4120_v24, -inf }
 0x1a7   : > { %1232 = vmax.xlane.f32.xlu0 %v1231_v22  ;;  %v872_v22 = vld [vmem:[%s4027_s22 + $0x38] sm:$0xff] }
 0x1a8   : > { %3020 = vmatprep.subr.mxu1 %v872_v22 }
 0x1a9   : > { %1241 = vmax.xlane.f32.xlu1 %v1240_v23 }
 0x1ab   : > { %1238 = vmax.xlane.f32.xlu0 %v1237_v25  ;;  %v4124_v26 = vpop.f32.mrf.mxu0 }
 0x1ac   : > { %v4126_v27 = vpop.f32.mrf.mxu1  ;;  %v1246_v34 = vsel %vm1230_vm3, %v4124_v26, -inf }
 0x1ad   : > { %v4128_v28 = vpop.f32.mrf.mxu0  ;;  %v1252_v33 = vsel %vm1230_vm3, %v4126_v27, -inf }
 0x1ae   : > { %v1243_v29 = vsel %vm1230_vm3, %v4128_v28, -inf  ;;  %v4132_v30 = vpop.f32.mrf.mxu1 }
 0x1af   : > { %1244 = vmax.xlane.f32.xlu0 %v1243_v29  ;;  %v1249_v31 = vsel %vm1230_vm3, %v4132_v30, -inf }
 0x1b0   : > { %1250 = vmax.xlane.f32.xlu1 %v1249_v31 }
 0x1b3   : > { %1247 = vmax.xlane.f32.xlu0 %v1246_v34 }
 0x1b4   : > { %1253 = vmax.xlane.f32.xlu1 %v1252_v33 }
 0x22e   : > { %v1236_v36 = vpop.xlane.xlu1 %1235 }
 0x22f   : > { %v1256_v38 = vmax.f32 %v1223_v35, %v1236_v36 }
 0x230   : > { %v1233_v39 = vpop.xlane.xlu0 %1232 }
 0x231   : > { %1805 = vst.msk [vmem:[#allocation2 + $0x8] sm:$0xff] %vm1399_vm4, %v1256_v38  ;;  %v1255_v41 = vmax.f32 %v1222_v37, %v1233_v39  ;;  %1294 = vperm.xlu1 %3275, %v1256_v38   ;;  %v1264_v53 = vsub.f32 %v1223_v35, %v1256_v38 }
 0x232   : > { %v1242_v42 = vpop.xlane.xlu1 %1241 }
 0x233   : > { %1804 = vst.msk [vmem:[#allocation2] sm:$0xff] %vm1399_vm4, %v1255_v41  ;;  %v1258_v44 = vmax.f32 %v1225_v40, %v1242_v42  ;;  %1289 = vperm.xlu0 %3274, %v1255_v41   ;;  %v1263_v46 = vsub.f32 %v1222_v37, %v1255_v41  ;;  %v1273_v62 = vmul.f32 1.442695, %v1264_v53 }
 0x234   : > { %v1239_v45 = vpop.xlane.xlu0 %1238 }
 0x235   : > { %v1266_v47 = vsub.f32 %v1225_v40, %v1258_v44  ;;  %1807 = vst.msk [vmem:[#allocation2 + $0x18] sm:$0xff] %vm1399_vm4, %v1258_v44  ;;  %v1257_v48 = vmax.f32 %v1224_v43, %v1239_v45  ;;  %1304 = vperm.xlu1 %3275, %v1258_v44   ;;  %v1271_v54 = vmul.f32 1.442695, %v1263_v46 }
 0x237   : > { %v1277_v50 = vmul.f32 1.442695, %v1266_v47  ;;  %1806 = vst.msk [vmem:[#allocation2 + $0x10] sm:$0xff] %vm1399_vm4, %v1257_v48  ;;  %v1265_v63 = vsub.f32 %v1224_v43, %v1257_v48  ;;  %v869_v47 = vld [vmem:[%s4027_s22 + $0x20] sm:$0xff] }
 0x238   : > { %v1245_v52 = vpop.xlane.xlu0 %1244 }
 0x239   : > { %3276 = vpow2.f32 %v1277_v50  ;;  %v1259_v55 = vmax.f32 %v1226_v49, %v1245_v52  ;;  %1299 = vperm.xlu1 %3275, %v1257_v48   ;;  %v1251_v56 = vpop.xlane.xlu1 %1250  ;;  %v1275_v7 = vmul.f32 1.442695, %v1265_v63 }
 0x23a   : > { %v4147_v58 = vmax.f32 %v4144_v51, %v1251_v56  ;;  %3278 = vpow2.f32 %v1271_v54 }
 0x23b   : > { %1808 = vst.msk [vmem:[#allocation2 + $0x20] sm:$0xff] %vm1399_vm4, %v1259_v55  ;;  %3280 = vpow2.f32 %v1273_v62  ;;  %v1267_v8 = vsub.f32 %v1226_v49, %v1259_v55 }
 0x23c   : > { %v1248_v60 = vpop.xlane.xlu0 %1247  ;;  %v1269_v61 = vsub.f32 %v4144_v51, %v4147_v58  ;;  %1810 = vst.msk [vmem:[#allocation2 + $0x30] sm:$0xff] %vm1399_vm4, %v4147_v58 }
 0x23d   : > { %v1260_v0 = vmax.f32 %v1227_v57, %v1248_v60  ;;  %v1254_v1 = vpop.xlane.xlu1 %1253  ;;  %v1279_v11 = vmul.f32 1.442695, %v1267_v8 }
 0x23e   : > { %v4158_v3 = vmax.f32 %v4150_v59, %v1254_v1  ;;  %v1283_v2 = vmul.f32 1.442695, %v1269_v61  ;;  %v1376_v61 = vld [vmem:[#allocation3 + $0x8] sm:$0xff] }
 0x23f   : > { %v1268_v4 = vsub.f32 %v1227_v57, %v1260_v0  ;;  %1809 = vst.msk [vmem:[#allocation2 + $0x28] sm:$0xff] %vm1399_vm4, %v1260_v0  ;;  %1314 = vperm.xlu1 %3275, %v1260_v0  }
 0x240   : > { %v1270_v6 = vsub.f32 %v4150_v59, %v4158_v3  ;;  %1811 = vst.msk [vmem:[#allocation2 + $0x38] sm:$0xff] %vm1399_vm4, %v4158_v3 }
 0x241   : > { %v1281_v9 = vmul.f32 1.442695, %v1268_v4 }
 0x242   : > { %v1285_v5 = vmul.f32 1.442695, %v1270_v6 }
 0x243   : > { %3282 = vpow2.f32 %v1281_v9  ;;  %1309 = vperm.xlu1 %3275, %v1259_v55   ;;  %v871_v55 = vld [vmem:[%s4027_s22 + $0x30] sm:$0xff]  ;;  %s4467_s22 = sld [smem:[#allocation57_spill]] (!%p2856_p0) }
 0x244   : > { %3284 = vpow2.f32 %v1275_v7 }
 0x245   : > { %3286 = vpow2.f32 %v1279_v11 }
 0x246   : > { %v4168_v13 = vpop.eup %3276 }
 0x247   : > { %1757 = vperm.xlu0 %3274, %v4168_v13   ;;  %1319 = vperm.xlu1 %3275, %v4147_v58   ;;  %v4172_v14 = vpop.eup %3278 }
 0x248   : > { %v4177_v16 = vpop.eup %3280 }
 0x249   : > { %v1384_v12 = vmul.f32 %v4177_v16, %v1376_v61 }
 0x24b   : > { %1742 = vperm.xlu0 %3274, %v4172_v14   ;;  %1324 = vperm.xlu1 %3275, %v4158_v3   ;;  %v1378_v3 = vld [vmem:[#allocation3 + $0x18] sm:$0xff] }
 0x24f   : > { %1747 = vperm.xlu1 %3275, %v4177_v16  }
 0x250   : > { %v4180_v17 = vpop.eup %3282 }
 0x251   : > { %1767 = vperm.xlu0 %3274, %v4180_v17   ;;  %v4183_v20 = vpop.eup %3284 }
 0x252   : > { %v4187_v23 = vpop.eup %3286 }
 0x253   : > { %1752 = vperm.xlu1 %3275, %v4183_v20  }
 0x257   : > { %1762 = vperm.xlu1 %3275, %v4187_v23  }
 0x2ac   : > { %v1295_v25 = vpop.permute.xlu1 %1294 }
 0x2ad   : > { %v1328_v29 = vsub.f32 %v4108_v18, %v1295_v25 }
 0x2ae   : > { %v1290_v31 = vpop.permute.xlu0 %1289 }
 0x2af   : > { %v1337_v32 = vmul.f32 1.442695, %v1328_v29  ;;  %v1327_v33 = vsub.f32 %v4114_v21, %v1290_v31  ;;  %v1377_v29 = vld [vmem:[#allocation3 + $0x10] sm:$0xff] }
 0x2b0   : > { %v1305_v34 = vpop.permute.xlu1 %1304 }
 0x2b1   : > { %3288 = vpow2.f32 %v1337_v32  ;;  %v1335_v35 = vmul.f32 1.442695, %v1327_v33  ;;  %v1330_v36 = vsub.f32 %v4110_v19, %v1305_v34  ;;  %v1375_v32 = vld [vmem:[#allocation3] sm:$0xff]  ;;  %v1385_v33 = vmul.f32 %v4183_v20, %v1377_v29 }
 0x2b2   : > { %v1383_v34 = vmul.f32 %v4172_v14, %v1375_v32  ;;  %v1381_v14 = vld [vmem:[#allocation3 + $0x30] sm:$0xff] }
 0x2b3   : > { %3290 = vpow2.f32 %v1335_v35  ;;  %v1341_v37 = vmul.f32 1.442695, %v1330_v36 }
 0x2b4   : > { %v1300_v38 = vpop.permute.xlu1 %1299 }
 0x2b5   : > { %3292 = vpow2.f32 %v1341_v37  ;;  %v1329_v39 = vsub.f32 %v4120_v24, %v1300_v38  ;;  %v1380_v38 = vld [vmem:[#allocation3 + $0x28] sm:$0xff] }
 0x2b7   : > { %v1339_v40 = vmul.f32 1.442695, %v1329_v39 }
 0x2b9   : > { %3294 = vpow2.f32 %v1339_v40  ;;  %v1379_v40 = vld [vmem:[#allocation3 + $0x20] sm:$0xff] }
 0x2ba   : > { %v1315_v41 = vpop.permute.xlu1 %1314  ;;  %v1387_v20 = vmul.f32 %v4187_v23, %v1379_v40 }
 0x2bb   : > { %v1332_v18 = vsub.f32 %v4124_v26, %v1315_v41 }
 0x2bd   : > { %v1345_v42 = vmul.f32 1.442695, %v1332_v18 }
 0x2be   : > { %v3289_v43 = vpop.eup %3288  ;;  %v1310_v21 = vpop.permute.xlu1 %1309 }
 0x2bf   : > { %3296 = vpow2.f32 %v1345_v42  ;;  %v1331_v44 = vsub.f32 %v4128_v28, %v1310_v21  ;;  %v1354_v19 = vsel %vm1230_vm3, %v3289_v43, 0.0 }
 0x2c0   : > { %v3291_v45 = vpop.eup %3290  ;;  %1355 = vadd.xlane.f32.xlu0 %v1354_v19 }
 0x2c1   : > { %v1343_v46 = vmul.f32 1.442695, %v1331_v44  ;;  %3003 = vmatprep.mubr.msk.f32.mxu0 %vm1230_vm3, %v3291_v45  ;;  %v1382_v44 = vld [vmem:[#allocation3 + $0x38] sm:$0xff] }
 0x2c2   : > { %v3293_v24 = vpop.eup %3292  ;;  %v1320_v48 = vpop.permute.xlu1 %1319  ;;  %3004 = vmatmul.mubr.msk.f32.vlgmr.msra.gmra.mxu0 %vm1230_vm3, %v3289_v43 }
 0x2c3   : > { %3298 = vpow2.f32 %v1343_v46  ;;  %v1333_v26 = vsub.f32 %v4132_v30, %v1320_v48  ;;  %v1360_v49 = vsel %vm1230_vm3, %v3293_v24, 0.0  ;;  %3014 = vmatpush3.msra.mxu0 %v870_v15  ;;  %v1351_v30 = vsel %vm1230_vm3, %v3291_v45, 0.0  ;;  %v1758_v9 = vpop.permute.xlu0 %1757 }
 0x2c4   : > { %1361 = vadd.xlane.f32.xlu1 %v1360_v49  ;;  %3015 = vmatprep.subr.mxu0 %v869_v47 }
 0x2c5   : > { %v1347_v28 = vmul.f32 1.442695, %v1333_v26  ;;  %3016 = vmatpush3.msra.mxu0 %v869_v47  ;;  %v1733_v47 = vld [vmem:[#allocation4 + $0x8] sm:$0xff] }
 0x2c6   : > { %v3295_v50 = vpop.eup %3294  ;;  %v1325_v52 = vpop.permute.xlu1 %1324 }
 0x2c7   : > { %3300 = vpow2.f32 %v1347_v28  ;;  %v1334_v53 = vsub.f32 %v4126_v27, %v1325_v52  ;;  %3010 = vmatprep.mubr.msk.f32.mxu1 %vm1230_vm3, %v3295_v50  ;;  %v1357_v54 = vsel %vm1230_vm3, %v3295_v50, 0.0  ;;  %v1743_v11 = vpop.permute.xlu0 %1742  ;;  %v1735_v28 = vld [vmem:[#allocation4 + $0x18] sm:$0xff] }
 0x2c8   : > { %3011 = vmatmul.mubr.msk.f32.vlgmr.msra.gmra.mxu1 %vm1230_vm3, %v3293_v24  ;;  %1358 = vadd.xlane.f32.xlu0 %v1357_v54  ;;  %v1732_v24 = vld [vmem:[#allocation4] sm:$0xff]  ;;  %v1783_v54 = vmul.f32 %v1758_v9, %v1735_v28  ;;  %v1738_v9 = vld [vmem:[#allocation4 + $0x30] sm:$0xff] }
 0x2c9   : > { %v1349_v56 = vmul.f32 1.442695, %v1334_v53  ;;  %1352 = vadd.xlane.f32.xlu1 %v1351_v30  ;;  %3021 = vmatpush3.msra.mxu1 %v872_v22  ;;  %v1386_v22 = vmul.f32 %v4168_v13, %v1378_v3  ;;  %v1388_v13 = vmul.f32 %v4180_v17, %v1380_v38  ;;  %v1780_v26 = vmul.f32 %v1743_v11, %v1732_v24  ;;  %v1734_v53 = vld [vmem:[#allocation4 + $0x10] sm:$0xff] }
 0x2ca   : > { %3022 = vmatprep.subr.mxu1 %v871_v55  ;;  %v1748_v10 = vpop.permute.xlu1 %1747 }
 0x2cb   : > { %3302 = vpow2.f32 %v1349_v56  ;;  %3023 = vmatpush3.msra.mxu1 %v871_v55  ;;  %v1781_v48 = vmul.f32 %v1748_v10, %v1733_v47 }
 0x2cc   : > { %v3297_v57 = vpop.eup %3296  ;;  %3304 = vpow2.f32 %v1283_v2  ;;  %v4222_v58 = vpop.permute.xlu0 %1767 }
 0x2cd   : > { %v1366_v60 = vsel %vm1230_vm3, %v3297_v57, 0.0  ;;  %3306 = vpow2.f32 %v1285_v5  ;;  %v1739_v5 = vld [vmem:[#allocation4 + $0x38] sm:$0xff] }
 0x2ce   : > { %1367 = vadd.xlane.f32.xlu1 %v1366_v60  ;;  %v1753_v51 = vpop.permute.xlu1 %1752 }
 0x2cf   : > { %v1782_v30 = vmul.f32 %v1753_v51, %v1734_v53 }
 0x2d0   : > { %v3299_v27 = vpop.eup %3298 }
 0x2d1   : > { %3017 = vmatprep.mubr.msk.f32.mxu0 %vm1230_vm3, %v3299_v27  ;;  %v1363_v62 = vsel %vm1230_vm3, %v3299_v27, 0.0  ;;  %v1737_v27 = vld [vmem:[#allocation4 + $0x28] sm:$0xff] }
 0x2d2   : > { %1364 = vadd.xlane.f32.xlu0 %v1363_v62  ;;  %3018 = vmatmul.mubr.msk.f32.vlgmr.msra.gmra.mxu0 %vm1230_vm3, %v3297_v57  ;;  %v4225_v15 = vpop.permute.xlu1 %1762  ;;  %v1736_v62 = vld [vmem:[#allocation4 + $0x20] sm:$0xff] }
 0x2d4   : > { %v3301_v63 = vpop.eup %3300 }
 0x2d5   : > { %3024 = vmatprep.mubr.msk.f32.mxu1 %vm1230_vm3, %v3301_v63  ;;  %v1369_v0 = vsel %vm1230_vm3, %v3301_v63, 0.0  ;;  %v1785_v63 = vmul.f32 %v4222_v58, %v1737_v27 }
 0x2d6   : > { %1370 = vadd.xlane.f32.xlu0 %v1369_v0 }
 0x2d8   : > { %v3303_v1 = vpop.eup %3302 }
 0x2d9   : > { %3025 = vmatmul.mubr.msk.f32.vlgmr.msra.gmra.mxu1 %vm1230_vm3, %v3303_v1  ;;  %v1372_v4 = vsel %vm1230_vm3, %v3303_v1, 0.0  ;;  %v3305_v7 = vpop.eup %3304  ;;  %v1784_v1 = vmul.f32 %v4225_v15, %v1736_v62 }
 0x2da   : > { %1373 = vadd.xlane.f32.xlu1 %v1372_v4  ;;  %v3307_v8 = vpop.eup %3306  ;;  %v1389_v43 = vmul.f32 %v3305_v7, %v1381_v14 }
 0x2db   : > { %v1390_v45 = vmul.f32 %v3307_v8, %v1382_v44 }
 0x2eb   : > { %1772 = vperm.xlu1 %3275, %v3305_v7  }
 0x2ec   : > { %1777 = vperm.xlu0 %3274, %v3307_v8  }
 0x349   : > { %v1356_v59 = vpop.xlane.xlu0 %1355 }
 0x34a   : > { %v1392_v6 = vadd.f32 %v1384_v12, %v1356_v59 }
 0x34c   : > { %1401 = vst.msk [vmem:[#allocation3 + $0x8] sm:$0xff] %vm1399_vm4, %v1392_v6 }
 0x34d   : > { %v1362_v25 = vpop.xlane.xlu1 %1361 }
 0x34e   : > { %v1394_v31 = vadd.f32 %v1386_v22, %v1362_v25 }
 0x350   : > { %1403 = vst.msk [vmem:[#allocation3 + $0x18] sm:$0xff] %vm1399_vm4, %v1394_v31 }
 0x351   : > { %v1359_v16 = vpop.xlane.xlu0 %1358 }
 0x352   : > { %v1353_v35 = vpop.xlane.xlu1 %1352  ;;  %v1393_v36 = vadd.f32 %v1385_v33, %v1359_v16 }
 0x353   : > { %v1391_v37 = vadd.f32 %v1383_v34, %v1353_v35 }
 0x354   : > { %1402 = vst.msk [vmem:[#allocation3 + $0x10] sm:$0xff] %vm1399_vm4, %v1393_v36 }
 0x355   : > { %1400 = vst.msk [vmem:[#allocation3] sm:$0xff] %vm1399_vm4, %v1391_v37 }
 0x357   : > { %v1368_v39 = vpop.xlane.xlu1 %1367 }
 0x358   : > { %v1396_v41 = vadd.f32 %v1388_v13, %v1368_v39 }
 0x35a   : > { %1405 = vst.msk [vmem:[#allocation3 + $0x28] sm:$0xff] %vm1399_vm4, %v1396_v41 }
 0x35b   : > { %v1365_v18 = vpop.xlane.xlu0 %1364 }
 0x35c   : > { %v1395_v42 = vadd.f32 %v1387_v20, %v1365_v18 }
 0x35e   : > { %1404 = vst.msk [vmem:[#allocation3 + $0x20] sm:$0xff] %vm1399_vm4, %v1395_v42 }
 0x35f   : > { %v1371_v21 = vpop.xlane.xlu0 %1370 }
 0x360   : > { %v1397_v19 = vadd.f32 %v1389_v43, %v1371_v21 }
 0x362   : > { %1406 = vst.msk [vmem:[#allocation3 + $0x30] sm:$0xff] %vm1399_vm4, %v1397_v19 }
 0x363   : > { %v1374_v17 = vpop.xlane.xlu1 %1373 }
 0x364   : > { %v1398_v46 = vadd.f32 %v1390_v45, %v1374_v17 }
 0x366   : > { %1407 = vst.msk [vmem:[#allocation3 + $0x38] sm:$0xff] %vm1399_vm4, %v1398_v46 }
 0x367   : > { %v1778_v7 = vpop.permute.xlu0 %1777  ;;  %v1773_v10 = vpop.permute.xlu1 %1772 }
 0x368   : > { %v1787_v11 = vmul.f32 %v1778_v7, %v1739_v5  ;;  %v1786_v61 = vmul.f32 %v1773_v10, %v1738_v9 }
 0x382   : > { %v3005_v23 = vpop.f32.mrf.mxu0 }
 0x383   : > { %v1789_v49 = vadd.f32 %v3005_v23, %v1781_v48 }
 0x384   : > { %v1480_v50 = vpop.f32.mrf.mxu0 }
 0x385   : > { %1797 = vst.msk [vmem:[#allocation4 + $0x8] sm:$0xff] %vm873_vm2, %v1789_v49  ;;  %v1788_v52 = vadd.f32 %v1780_v26, %v1480_v50 }
 0x387   : > { %1796 = vst.msk [vmem:[#allocation4] sm:$0xff] %vm873_vm2, %v1788_v52 }
 0x388   : > { %v3012_v55 = vpop.f32.mrf.mxu1 }
 0x389   : > { %v1791_v56 = vadd.f32 %v3012_v55, %v1783_v54 }
 0x38a   : > { %v1561_v57 = vpop.f32.mrf.mxu1 }
 0x38b   : > { %1799 = vst.msk [vmem:[#allocation4 + $0x18] sm:$0xff] %vm873_vm2, %v1791_v56  ;;  %v1790_v60 = vadd.f32 %v1782_v30, %v1561_v57 }
 0x38d   : > { %1798 = vst.msk [vmem:[#allocation4 + $0x10] sm:$0xff] %vm873_vm2, %v1790_v60 }
 0x392   : > { %v3019_v0 = vpop.f32.mrf.mxu0 }
 0x393   : > { %v1793_v2 = vadd.f32 %v3019_v0, %v1785_v63 }
 0x394   : > { %v1642_v4 = vpop.f32.mrf.mxu0 }
 0x395   : > { %1801 = vst.msk [vmem:[#allocation4 + $0x28] sm:$0xff] %vm873_vm2, %v1793_v2  ;;  %v1792_v8 = vadd.f32 %v1784_v1, %v1642_v4 }
 0x397   : > { %1800 = vst.msk [vmem:[#allocation4 + $0x20] sm:$0xff] %vm873_vm2, %v1792_v8 }
 0x399   : > { %v3026_v51 = vpop.f32.mrf.mxu1 }
 0x39a   : > { %v1795_v12 = vadd.f32 %v3026_v51, %v1787_v11  ;;  %1815 = sbr.rel (%p2856_p0) target bundleno = 2302 (0x8fe), region = 120 }
 0x39b   : > { %v1723_v59 = vpop.f32.mrf.mxu1 }
 0x39c   : > { %1803 = vst.msk [vmem:[#allocation4 + $0x38] sm:$0xff] %vm873_vm2, %v1795_v12  ;;  %v1794_v58 = vadd.f32 %v1786_v61, %v1723_v59 }
 0x39e   : > { %1802 = vst.msk [vmem:[#allocation4 + $0x30] sm:$0xff] %vm873_vm2, %v1794_v58 }
 0x39f   : > { %v1818_v15 = vld [vmem:[#allocation3 + $0x10] sm:$0xff]  ;;  %v1816_v3 = vld [vmem:[#allocation3] sm:$0xff]  ;;  %v1819_v6 = vld [vmem:[#allocation3 + $0x18] sm:$0xff]  ;;  %v3627_v22 = vmov 0  }
 0x3a0   : > { %3309 = vset.pattern.permute.xlu1 %v3627_v22  ;;  %3308 = vset.pattern.permute.xlu0 %v3627_v22  ;;  %3310 = vrcp.f32 %v1818_v15  ;;  %v1817_v25 = vld [vmem:[#allocation3 + $0x8] sm:$0xff]  ;;  %v1899_v29 = vld [vmem:[#allocation13 + $0x18] sm:$0xff]  ;;  %v1898_v32 = vld [vmem:[#allocation13 + $0x10] sm:$0xff] }
 0x3a1   : > { %3312 = vrcp.f32 %v1816_v3  ;;  %3027 = vmatprep.subr.mxu0 %v1899_v29  ;;  %v1903_v31 = vld [vmem:[#allocation13 + $0x38] sm:$0xff]  ;;  %v1821_v33 = vld [vmem:[#allocation3 + $0x28] sm:$0xff]  ;;  %v1820_v34 = vld [vmem:[#allocation3 + $0x20] sm:$0xff] }
 0x3a2   : > { %3314 = vrcp.f32 %v1819_v6  ;;  %3028 = vmatpush3.msra.mxu0 %v1899_v29  ;;  %3038 = vmatprep.subr.mxu1 %v1903_v31  ;;  %v1823_v16 = vld [vmem:[#allocation3 + $0x38] sm:$0xff]  ;;  %v1822_v35 = vld [vmem:[#allocation3 + $0x30] sm:$0xff]  ;;  %v1897_v37 = vld [vmem:[#allocation13 + $0x8] sm:$0xff] }
 0x3a3   : > { %3316 = vrcp.f32 %v1817_v25  ;;  %3029 = vmatprep.subr.mxu0 %v1898_v32  ;;  %3039 = vmatpush3.msra.mxu1 %v1903_v31  ;;  %v1902_v36 = vld [vmem:[#allocation13 + $0x30] sm:$0xff]  ;;  %v1901_v38 = vld [vmem:[#allocation13 + $0x28] sm:$0xff]  ;;  %v1896_v39 = vld [vmem:[#allocation13] sm:$0xff] }
 0x3a4   : > { %3030 = vmatpush3.msra.mxu0 %v1898_v32  ;;  %3318 = vrcp.f32 %v1821_v33  ;;  %3040 = vmatprep.subr.mxu1 %v1902_v36  ;;  %v1900_v41 = vld [vmem:[#allocation13 + $0x20] sm:$0xff]  ;;  %v1907_v18 = vld [vmem:[#allocation13 + $0x58] sm:$0xff]  ;;  %v1842_v45 = vld [vmem:[#allocation4 + $0x10] sm:$0xff] }
 0x3a5   : > { %3320 = vrcp.f32 %v1820_v34  ;;  %3031 = vmatprep.subr.mxu0 %v1897_v37  ;;  %3041 = vmatpush3.msra.mxu1 %v1902_v36  ;;  %v1911_v42 = vld [vmem:[#allocation13 + $0x78] sm:$0xff]  ;;  %v1840_v17 = vld [vmem:[#allocation4] sm:$0xff]  ;;  %v1841_v26 = vld [vmem:[#allocation4 + $0x8] sm:$0xff] }
 0x3a6   : > { %3322 = vrcp.f32 %v1823_v16  ;;  %3032 = vmatpush3.msra.mxu0 %v1897_v37  ;;  %3042 = vmatprep.subr.mxu1 %v1901_v38  ;;  %v1843_v23 = vld [vmem:[#allocation4 + $0x18] sm:$0xff]  ;;  %v1910_v53 = vld [vmem:[#allocation13 + $0x70] sm:$0xff]  ;;  %v1844_v55 = vld [vmem:[#allocation4 + $0x20] sm:$0xff] }
 0x3a7   : > { %3324 = vrcp.f32 %v1822_v35  ;;  %3033 = vmatprep.subr.mxu0 %v1896_v39  ;;  %3043 = vmatpush3.msra.mxu1 %v1901_v38  ;;  %v1906_v54 = vld [vmem:[#allocation13 + $0x50] sm:$0xff]  ;;  %v1909_v56 = vld [vmem:[#allocation13 + $0x68] sm:$0xff]  ;;  %v1847_v63 = vld [vmem:[#allocation4 + $0x38] sm:$0xff] }
 0x3a8   : > { %3034 = vmatpush3.msra.mxu0 %v1896_v39  ;;  %3044 = vmatprep.subr.mxu1 %v1900_v41  ;;  %v1905_v60 = vld [vmem:[#allocation13 + $0x48] sm:$0xff]  ;;  %v1904_v0 = vld [vmem:[#allocation13 + $0x40] sm:$0xff]  ;;  %v1846_v1 = vld [vmem:[#allocation4 + $0x30] sm:$0xff] }
 0x3a9   : > { %3045 = vmatpush3.msra.mxu1 %v1900_v41  ;;  %3049 = vmatprep.subr.mxu0 %v1907_v18  ;;  %v1845_v27 = vld [vmem:[#allocation4 + $0x28] sm:$0xff]  ;;  %v1908_v2 = vld [vmem:[#allocation13 + $0x60] sm:$0xff]  ;;  %v2327_v38 = vld [vmem:[#allocation14 + $0xf8] sm:$0xff] }
 0x3aa   : > { %3060 = vmatprep.subr.mxu1 %v1911_v42  ;;  %v2865_v22 = vld [vmem:[%s4462_s9] ss:$0 sm:$0xff]  ;;  %v2252_v32 = vld [vmem:[%s4006_s5 + $0x8] sm:$0xff] }
 0x3ab   : > { %v2251_v16 = vld [vmem:[%s4006_s5] sm:$0xff]  ;;  %v2325_v39 = vld [vmem:[#allocation14 + $0xe8] sm:$0xff]  ;;  %v2323_v41 = vld [vmem:[#allocation14 + $0xd8] sm:$0xff] }
 0x3ad   : > { %v3311_v13 = vpop.eup %3310 }
 0x3ae   : > { %v3313_v40 = vpop.eup %3312  ;;  %1860 = vperm.xlu1 %3309, %v3311_v13   ;;  %v2326_v13 = vld [vmem:[#allocation14 + $0xf0] sm:$0xff] }
 0x3af   : > { %v3315_v20 = vpop.eup %3314  ;;  %1850 = vperm.xlu0 %3308, %v3313_v40   ;;  %v2324_v40 = vld [vmem:[#allocation14 + $0xe0] sm:$0xff] }
 0x3b0   : > { %v3317_v14 = vpop.eup %3316 }
 0x3b1   : > { %v3319_v43 = vpop.eup %3318 }
 0x3b2   : > { %1865 = vperm.xlu1 %3309, %v3315_v20   ;;  %v3321_v21 = vpop.eup %3320  ;;  %v2322_v20 = vld [vmem:[#allocation14 + $0xd0] sm:$0xff] }
 0x3b3   : > { %1855 = vperm.xlu0 %3308, %v3317_v14   ;;  %v3323_v44 = vpop.eup %3322  ;;  %v2320_v14 = vld [vmem:[#allocation14 + $0xc0] sm:$0xff] }
 0x3b4   : > { %v3325_v19 = vpop.eup %3324 }
 0x3b6   : > { %1875 = vperm.xlu1 %3309, %v3319_v43  }
 0x3b7   : > { %1870 = vperm.xlu0 %3308, %v3321_v21  }
 0x3ba   : > { %1885 = vperm.xlu1 %3309, %v3323_v44  }
 0x3bb   : > { %1880 = vperm.xlu0 %3308, %v3325_v19  }
 0x429   : > { %v1861_v46 = vpop.permute.xlu1 %1860 }
 0x42a   : > { %v1851_v47 = vpop.permute.xlu0 %1850  ;;  %v1890_v24 = vmul.f32 %v1861_v46, %v1842_v45 }
 0x42b   : > { %v1888_v48 = vmul.f32 %v1851_v47, %v1840_v17  ;;  %v2319_v47 = vld [vmem:[#allocation14 + $0xb8] sm:$0xff] }
 0x42c   : > { %3046 = vmatprep.mubr.msk.f32.mxu1 %vm873_vm2, %v1890_v24  ;;  %v2318_v24 = vld [vmem:[#allocation14 + $0xb0] sm:$0xff] }
 0x42d   : > { %3035 = vmatprep.mubr.msk.f32.mxu0 %vm873_vm2, %v1888_v48  ;;  %v1866_v49 = vpop.permute.xlu1 %1865  ;;  %v2317_v48 = vld [vmem:[#allocation14 + $0xa8] sm:$0xff] }
 0x42e   : > { %v1891_v28 = vmul.f32 %v1866_v49, %v1843_v23  ;;  %v1856_v50 = vpop.permute.xlu0 %1855  ;;  %v2316_v23 = vld [vmem:[#allocation14 + $0xa0] sm:$0xff]  ;;  %v2314_v49 = vld [vmem:[#allocation14 + $0x90] sm:$0xff] }
 0x42f   : > { %v1889_v52 = vmul.f32 %v1856_v50, %v1841_v26  ;;  %v2315_v26 = vld [vmem:[#allocation14 + $0x98] sm:$0xff]  ;;  %v2312_v50 = vld [vmem:[#allocation14 + $0x80] sm:$0xff] }
 0x430   : > { %3047 = vmatmul.mubr.msk.f32.vlgmr.msra.gmra.mxu1 %vm873_vm2, %v1891_v28  ;;  %v2313_v28 = vld [vmem:[#allocation14 + $0x88] sm:$0xff] }
 0x431   : > { %3036 = vmatmul.mubr.msk.f32.vlgmr.msra.gmra.mxu0 %vm873_vm2, %v1889_v52  ;;  %v1876_v30 = vpop.permute.xlu1 %1875  ;;  %3061 = vmatpush3.msra.mxu1 %v1911_v42  ;;  %v2311_v52 = vld [vmem:[#allocation14 + $0x78] sm:$0xff] }
 0x432   : > { %3050 = vmatpush3.msra.mxu0 %v1907_v18  ;;  %v1871_v57 = vpop.permute.xlu0 %1870  ;;  %3062 = vmatprep.subr.mxu1 %v1910_v53  ;;  %v1893_v8 = vmul.f32 %v1876_v30, %v1845_v27  ;;  %v2321_v18 = vld [vmem:[#allocation14 + $0xc8] sm:$0xff]  ;;  %v2307_v30 = vld [vmem:[#allocation14 + $0x58] sm:$0xff]  ;;  %v2304_v27 = vld [vmem:[#allocation14 + $0x40] sm:$0xff] }
 0x433   : > { %3051 = vmatprep.subr.mxu0 %v1906_v54  ;;  %v1892_v62 = vmul.f32 %v1871_v57, %v1844_v55  ;;  %3063 = vmatpush3.msra.mxu1 %v1910_v53  ;;  %v2310_v53 = vld [vmem:[#allocation14 + $0x70] sm:$0xff]  ;;  %v2308_v55 = vld [vmem:[#allocation14 + $0x60] sm:$0xff] }
 0x434   : > { %3052 = vmatpush3.msra.mxu0 %v1906_v54  ;;  %3064 = vmatprep.subr.mxu1 %v1909_v56  ;;  %v2309_v54 = vld [vmem:[#allocation14 + $0x68] sm:$0xff]  ;;  %v2306_v57 = vld [vmem:[#allocation14 + $0x50] sm:$0xff] }
 0x435   : > { %3053 = vmatprep.subr.mxu0 %v1905_v60  ;;  %3057 = vmatprep.mubr.msk.f32.mxu0 %vm873_vm2, %v1892_v62  ;;  %v1886_v4 = vpop.permute.xlu1 %1885  ;;  %v2303_v62 = vld [vmem:[#allocation14 + $0x38] sm:$0xff] }
 0x436   : > { %3054 = vmatpush3.msra.mxu0 %v1905_v60  ;;  %v1895_v5 = vmul.f32 %v1886_v4, %v1847_v63  ;;  %v1881_v7 = vpop.permute.xlu0 %1880  ;;  %3065 = vmatpush3.msra.mxu1 %v1909_v56  ;;  %v3628_v56 = vmov 0.0   ;;  %v2305_v60 = vld [vmem:[#allocation14 + $0x48] sm:$0xff]  ;;  %v2302_v63 = vld [vmem:[#allocation14 + $0x30] sm:$0xff] }
 0x437   : > { %3055 = vmatprep.subr.mxu0 %v1904_v0  ;;  %v1894_v9 = vmul.f32 %v1881_v7, %v1846_v1  ;;  %3066 = vmatprep.subr.mxu1 %v1908_v2  ;;  %v2300_v1 = vld [vmem:[#allocation14 + $0x20] sm:$0xff]  ;;  %v2298_v4 = vld [vmem:[#allocation14 + $0x10] sm:$0xff] }
 0x438   : > { %3056 = vmatpush3.msra.mxu0 %v1904_v0  ;;  %3067 = vmatpush3.msra.mxu1 %v1908_v2  ;;  %v2301_v0 = vld [vmem:[#allocation14 + $0x28] sm:$0xff]  ;;  %v2299_v2 = vld [vmem:[#allocation14 + $0x18] sm:$0xff]  ;;  %v2296_v7 = vld [vmem:[#allocation14] sm:$0xff] }
 0x439   : > { %3058 = vmatmul.mubr.msk.f32.vlgmr.msra.gmra.mxu0 %vm873_vm2, %v1893_v8  ;;  %3068 = vmatprep.mubr.msk.f32.mxu1 %vm873_vm2, %v1894_v9  ;;  %v2452_v8 = vld [vmem:[#allocation16 + $0xf8] sm:$0xff] }
 0x43a   : > { %3069 = vmatmul.mubr.msk.f32.vlgmr.msra.gmra.mxu1 %vm873_vm2, %v1895_v5  ;;  %2340 = vmatprep.subr.mxu0 %v2327_v38  ;;  %v2297_v5 = vld [vmem:[#allocation14 + $0x8] sm:$0xff]  ;;  %v2436_v9 = vld [vmem:[#allocation16 + $0x78] sm:$0xff]  ;;  %v2425_v38 = vld [vmem:[#allocation16 + $0x20] sm:$0xff] }
 0x43b   : > { %2341 = vmatpush1.msra.mxu0 %v2326_v13  ;;  %2404 = vmatprep.mubr.f32.mxu0 %v3628_v56 }
 0x43c   : > { %2342 = vmatprep.subr.mxu0 %v2325_v39  ;;  %2933 = vmatprep.subr.mxu1 %v2452_v8 }
 0x43d   : > { %2343 = vmatpush1.msra.mxu0 %v2324_v40  ;;  %2934 = vmatpush3.msra.mxu1 %v2436_v9 }
 0x43e   : > { %2344 = vmatprep.subr.mxu0 %v2323_v41 }
 0x43f   : > { %2345 = vmatpush1.msra.mxu0 %v2322_v20 }
 0x440   : > { %2346 = vmatprep.subr.mxu0 %v2321_v18 }
 0x441   : > { %2347 = vmatpush1.msra.mxu0 %v2320_v14 }
 0x442   : > { %2348 = vmatprep.subr.mxu0 %v2319_v47 }
 0x443   : > { %2349 = vmatpush1.msra.mxu0 %v2318_v24 }
 0x444   : > { %2350 = vmatprep.subr.mxu0 %v2317_v48 }
 0x445   : > { %2351 = vmatpush1.msra.mxu0 %v2316_v23  ;;  %v2440_v23 = vld [vmem:[#allocation16 + $0x98] sm:$0xff] }
 0x446   : > { %2352 = vmatprep.subr.mxu0 %v2315_v26  ;;  %v2424_v26 = vld [vmem:[#allocation16 + $0x18] sm:$0xff] }
 0x447   : > { %2353 = vmatpush1.msra.mxu0 %v2314_v49  ;;  %v2423_v49 = vld [vmem:[#allocation16 + $0x10] sm:$0xff] }
 0x448   : > { %2354 = vmatprep.subr.mxu0 %v2313_v28  ;;  %v2438_v28 = vld [vmem:[#allocation16 + $0x88] sm:$0xff] }
 0x449   : > { %2355 = vmatpush1.msra.mxu0 %v2312_v50  ;;  %v2422_v50 = vld [vmem:[#allocation16 + $0x8] sm:$0xff] }
 0x44a   : > { %2356 = vmatprep.subr.mxu0 %v2311_v52  ;;  %v2437_v52 = vld [vmem:[#allocation16 + $0x80] sm:$0xff] }
 0x44b   : > { %2357 = vmatpush1.msra.mxu0 %v2310_v53  ;;  %v2330_v53 = vlaneseq }
 0x44c   : > { %2358 = vmatprep.subr.mxu0 %v2309_v54 }
 0x44d   : > { %2359 = vmatpush1.msra.mxu0 %v2308_v55  ;;  %v2331_v54 = vshrl.u32 %v2330_v53, 7 }
 0x44e   : > { %2360 = vmatprep.subr.mxu0 %v2307_v30  ;;  %v2328_v30 = vld [vmem:[%s4465_s26] sm:$0x3] }
 0x44f   : > { %2361 = vmatpush1.msra.mxu0 %v2306_v57  ;;  %v2332_v55 = vsub.s32 0, %v2331_v54 }
 0x450   : > { %2362 = vmatprep.subr.mxu0 %v2305_v60 }
 0x451   : > { %2363 = vmatpush1.msra.mxu0 %v2304_v27  ;;  %v2333_v57 = vrot.slane %v2328_v30, %v2332_v55 }
 0x452   : > { %2364 = vmatprep.subr.mxu0 %v2303_v62 }
 0x453   : > { %2365 = vmatpush1.msra.mxu0 %v2302_v63 }
 0x454   : > { %2366 = vmatprep.subr.mxu0 %v2301_v0 }
 0x455   : > { %2367 = vmatpush1.msra.mxu0 %v2300_v1 }
 0x456   : > { %2368 = vmatprep.subr.mxu0 %v2299_v2 }
 0x457   : > { %2369 = vmatpush1.msra.mxu0 %v2298_v4 }
 0x458   : > { %2370 = vmatprep.subr.mxu0 %v2297_v5 }
 0x459   : > { %2371 = vmatpush1.msra.mxu0 %v2296_v7 }
 0x4f0   : > { %v3048_v11 = vpop.f32.mrf.mxu1 }
 0x4f1   : > { %v3037_v10 = vpop.f32.mrf.mxu0 }
 0x4f2   : > { %v2065_v61 = vpop.f32.mrf.mxu1  ;;  %v2239_v12 = vadd.f32 %v3048_v11, %v3037_v10  ;;  %v2451_v10 = vld [vmem:[#allocation16 + $0xf0] sm:$0xff] }
 0x4f3   : > { %v1984_v51 = vpop.f32.mrf.mxu0  ;;  %v2435_v11 = vld [vmem:[#allocation16 + $0x70] sm:$0xff]  ;;  %2935 = vmatprep.subr.mxu1 %v2451_v10 }
 0x4f4   : > { %v2236_v58 = vadd.f32 %v2065_v61, %v1984_v51  ;;  %v2450_v51 = vld [vmem:[#allocation16 + $0xe8] sm:$0xff]  ;;  %2936 = vmatpush3.msra.mxu1 %v2435_v11 }
 0x4f5   : > { %v2434_v61 = vld [vmem:[#allocation16 + $0x68] sm:$0xff]  ;;  %2937 = vmatprep.subr.mxu1 %v2450_v51  ;;  %v2868_v51 = vld [vmem:[%s4466_s18] ss:$0 sm:$0xff] }
 0x4f6   : > { %2938 = vmatpush3.msra.mxu1 %v2434_v61 }
 0x4f9   : > { %v3059_v59 = vpop.f32.mrf.mxu0 }
 0x4fa   : > { %v2240_v15 = vadd.f32 %v3059_v59, %v2239_v12  ;;  %v3070_v3 = vpop.f32.mrf.mxu1  ;;  %v2449_v12 = vld [vmem:[#allocation16 + $0xe0] sm:$0xff] }
 0x4fb   : > { %v2146_v6 = vpop.f32.mrf.mxu0  ;;  %v2433_v59 = vld [vmem:[#allocation16 + $0x60] sm:$0xff]  ;;  %2939 = vmatprep.subr.mxu1 %v2449_v12 }
 0x4fc   : > { %v2237_v25 = vadd.f32 %v2236_v58, %v2146_v6  ;;  %v2241_v29 = vadd.f32 %v3070_v3, %v2240_v15  ;;  %v2227_v31 = vpop.f32.mrf.mxu1  ;;  %v2448_v58 = vld [vmem:[#allocation16 + $0xd8] sm:$0xff]  ;;  %2940 = vmatpush3.msra.mxu1 %v2433_v59  ;;  %v2447_v3 = vld [vmem:[#allocation16 + $0xd0] sm:$0xff] }
 0x4fd   : > { %v2432_v15 = vld [vmem:[#allocation16 + $0x58] sm:$0xff]  ;;  %2941 = vmatprep.subr.mxu1 %v2448_v58  ;;  %v2431_v6 = vld [vmem:[#allocation16 + $0x50] sm:$0xff] }
 0x4fe   : > { %v2250_v33 = vadd.f32 %v2865_v22, %v2241_v29  ;;  %v2238_v34 = vadd.f32 %v2237_v25, %v2227_v31  ;;  %2942 = vmatpush3.msra.mxu1 %v2432_v15  ;;  %v2430_v25 = vld [vmem:[#allocation16 + $0x48] sm:$0xff]  ;;  %v2445_v29 = vld [vmem:[#allocation16 + $0xc0] sm:$0xff] }
 0x4ff   : > { %2943 = vmatprep.subr.mxu1 %v2447_v3  ;;  %v2429_v31 = vld [vmem:[#allocation16 + $0x40] sm:$0xff] }
 0x500   : > { %v2249_v35 = vadd.f32 %v2865_v22, %v2238_v34  ;;  %v2254_v36 = vadd.f32 %v2252_v32, %v2250_v33  ;;  %v2446_v22 = vld [vmem:[#allocation16 + $0xc8] sm:$0xff]  ;;  %2944 = vmatpush3.msra.mxu1 %v2431_v6  ;;  %v2444_v32 = vld [vmem:[#allocation16 + $0xb8] sm:$0xff]  ;;  %v2443_v34 = vld [vmem:[#allocation16 + $0xb0] sm:$0xff] }
 0x501   : > { %2945 = vmatprep.subr.mxu1 %v2446_v22  ;;  %v2428_v33 = vld [vmem:[#allocation16 + $0x38] sm:$0xff] }
 0x502   : > { %2259 = vadd.xlane.f32.xlu1 %v2254_v36  ;;  %v2253_v37 = vadd.f32 %v2251_v16, %v2249_v35  ;;  %2946 = vmatpush3.msra.mxu1 %v2430_v25  ;;  %v2427_v16 = vld [vmem:[#allocation16 + $0x30] sm:$0xff]  ;;  %v2442_v35 = vld [vmem:[#allocation16 + $0xa8] sm:$0xff] }
 0x503   : > { %2947 = vmatprep.subr.mxu1 %v2445_v29 }
 0x504   : > { %2257 = vadd.xlane.f32.xlu0 %v2253_v37  ;;  %2948 = vmatpush3.msra.mxu1 %v2429_v31 }
 0x505   : > { %2949 = vmatprep.subr.mxu1 %v2444_v32 }
 0x506   : > { %2950 = vmatpush3.msra.mxu1 %v2428_v33 }
 0x507   : > { %2951 = vmatprep.subr.mxu1 %v2443_v34 }
 0x508   : > { %2952 = vmatpush3.msra.mxu1 %v2427_v16 }
 0x509   : > { %2953 = vmatprep.subr.mxu1 %v2442_v35 }
 0x58b   : > { %v2260_v42 = vpop.xlane.xlu1 %2259 }
 0x58c   : > { %v2263_v21 = vmul.f32 0.0078125, %v2260_v42  ;;  %v2866_v42 = vld [vmem:[%s4463_s19] ss:$0 sm:$0xff] }
 0x58d   : > { %v2258_v43 = vpop.xlane.xlu0 %2257 }
 0x58e   : > { %v2262_v44 = vmul.f32 0.0078125, %v2258_v43  ;;  %v4266_v45 = vsub.f32 %v2254_v36, %v2263_v21  ;;  %v2426_v36 = vld [vmem:[#allocation16 + $0x28] sm:$0xff]  ;;  %v2867_v21 = vld [vmem:[%s4464_s7] ss:$0 sm:$0xff] }
 0x58f   : > { %2954 = vmatpush3.msra.mxu1 %v2426_v36 }
 0x590   : > { %v4264_v19 = vsub.f32 %v2253_v37, %v2262_v44  ;;  %v2267_v46 = vmul.f32 %v4266_v45, %v4266_v45  ;;  %v2441_v37 = vld [vmem:[#allocation16 + $0xa0] sm:$0xff] }
 0x591   : > { %2955 = vmatprep.subr.mxu1 %v2441_v37 }
 0x592   : > { %v2266_v17 = vmul.f32 %v4264_v19, %v4264_v19  ;;  %2956 = vmatpush3.msra.mxu1 %v2425_v38 }
 0x593   : > { %2957 = vmatprep.subr.mxu1 %v2440_v23 }
 0x594   : > { %2268 = vadd.xlane.f32.xlu0 %v2266_v17  ;;  %2958 = vmatpush3.msra.mxu1 %v2424_v26 }
 0x598   : > { %2270 = vadd.xlane.f32.xlu0 %v2267_v46 }
 0x61d   : > { %v2269_v13 = vpop.xlane.xlu0 %2268 }
 0x61e   : > { %v2272_v39 = vmul.f32 0.0078125, %v2269_v13 }
 0x620   : > { %v2274_v40 = vadd.f32 1e-05, %v2272_v39 }
 0x621   : > { %v2271_v41 = vpop.xlane.xlu0 %2270 }
 0x622   : > { %3326 = vrsqrt.f32 %v2274_v40  ;;  %v2273_v20 = vmul.f32 0.0078125, %v2271_v41 }
 0x624   : > { %v2275_v18 = vadd.f32 1e-05, %v2273_v20 }
 0x626   : > { %3328 = vrsqrt.f32 %v2275_v18  ;;  %v2869_v18 = vld [vmem:[%s4467_s22] ss:$0 sm:$0xff] }
 0x62f   : > { %v3327_v14 = vpop.eup %3326 }
 0x630   : > { %v2278_v43 = vmul.f32 %v3327_v14, %v4264_v19  ;;  %v2439_v19 = vld [vmem:[#allocation16 + $0x90] sm:$0xff] }
 0x631   : > { %2959 = vmatprep.subr.mxu1 %v2439_v19 }
 0x632   : > { %v2286_v44 = vmul.f32 %v2866_v42, %v2278_v43  ;;  %2960 = vmatpush3.msra.mxu1 %v2423_v49 }
 0x633   : > { %v3329_v17 = vpop.eup %3328  ;;  %2961 = vmatprep.subr.mxu1 %v2438_v28 }
 0x634   : > { %v2294_v46 = vadd.f32 %v2867_v21, %v2286_v44  ;;  %v2279_v47 = vmul.f32 %v3329_v17, %v4266_v45  ;;  %2962 = vmatpush3.msra.mxu1 %v2422_v50  ;;  %v2421_v45 = vld [vmem:[#allocation16] sm:$0xff] }
 0x635   : > { %2963 = vmatprep.subr.mxu1 %v2437_v52 }
 0x636   : > { %2405 = vmatmul.mubr.f32.vlgmr.msra.gmra.mxu0 %v2294_v46  ;;  %v2287_v24 = vmul.f32 %v2866_v42, %v2279_v47  ;;  %2964 = vmatpush3.msra.mxu1 %v2421_v45  ;;  %v2870_v42 = vld [vmem:[%s4468_s8] ss:$0 sm:$0xff] }
 0x637   : > { %2410 = vmatprep.mubr.f32.mxu0 %v3628_v56  ;;  %v2336_v56 = vsub.s32 1, %v2331_v54 }
 0x638   : > { %v2295_v48 = vadd.f32 %v2867_v21, %v2287_v24 }
 0x639   : > { %v2337_v60 = vrot.slane %v2328_v30, %v2336_v56 }
 0x63a   : > { %2411 = vmatmul.mubr.f32.gmra.mxu0 %v2295_v48 }
 0x6f6   : > { %v2406_v27 = vpop.f32.mrf.mxu0 }
 0x6f7   : > { %v2407_v62 = vadd.f32 %v2406_v27, %v2333_v57 }
 0x6f8   : > { %v2408_v63 = vpop.f32.mrf.mxu0 }
 0x6f9   : > { %v2409_v0 = vadd.f32 %v2408_v63, %v2337_v60  ;;  %v2417_v4 = vmax.f32 %v2407_v62, 0.0 }
 0x6fa   : > { %v2412_v1 = vpop.f32.mrf.mxu0 }
 0x6fb   : > { %v2418_v2 = vmax.f32 %v2409_v0, 0.0  ;;  %v2413_v5 = vadd.f32 %v2412_v1, %v2333_v57 }
 0x6fc   : > { %v2414_v7 = vpop.f32.mrf.mxu0 }
 0x6fd   : > { %v2415_v8 = vadd.f32 %v2414_v7, %v2337_v60  ;;  %2524 = vmatprep.mubr.f32.mxu1 %v2418_v2  ;;  %v2419_v10 = vmax.f32 %v2413_v5, 0.0 }
 0x6fe   : > { %2525 = vmatmul.mubr.f32.vlgmr.msra.gmra.mxu1 %v2417_v4 }
 0x6ff   : > { %v2420_v9 = vmax.f32 %v2415_v8, 0.0 }
 0x701   : > { %2529 = vmatprep.mubr.f32.mxu1 %v2420_v9 }
 0x702   : > { %2530 = vmatmul.mubr.f32.gmra.mxu1 %v2419_v10 }
 0x7be   : > { %v2965_v11 = vpop.f32.mrf.mxu1 }
 0x7c0   : > { %v2966_v61 = vpop.f32.mrf.mxu1 }
 0x7c1   : > { %v2967_v12 = vadd.f32 %v2966_v61, %v2965_v11 }
 0x7c2   : > { %v2968_v59 = vpop.f32.mrf.mxu1 }
 0x7c3   : > { %v2527_v58 = vadd.f32 %v2967_v12, %v2868_v51 }
 0x7c4   : > { %v2969_v15 = vpop.f32.mrf.mxu1 }
 0x7c5   : > { %v2970_v3 = vadd.f32 %v2969_v15, %v2968_v59  ;;  %v2535_v6 = vadd.f32 %v2527_v58, %v2294_v46 }
 0x7c7   : > { %v2532_v22 = vadd.f32 %v2970_v3, %v2868_v51  ;;  %2539 = vadd.xlane.f32.xlu1 %v2535_v6 }
 0x7c9   : > { %v2536_v25 = vadd.f32 %v2532_v22, %v2295_v48 }
 0x7cb   : > { %2541 = vadd.xlane.f32.xlu0 %v2536_v25 }
 0x850   : > { %v2540_v29 = vpop.xlane.xlu1 %2539 }
 0x851   : > { %v2543_v31 = vmul.f32 0.0078125, %v2540_v29 }
 0x853   : > { %v2545_v32 = vsub.f32 %v2535_v6, %v2543_v31 }
 0x854   : > { %v2542_v33 = vpop.xlane.xlu0 %2541 }
 0x855   : > { %v2544_v34 = vmul.f32 0.0078125, %v2542_v33  ;;  %v2547_v16 = vmul.f32 %v2545_v32, %v2545_v32 }
 0x857   : > { %v2546_v35 = vsub.f32 %v2536_v25, %v2544_v34  ;;  %2549 = vadd.xlane.f32.xlu1 %v2547_v16 }
 0x859   : > { %v2548_v36 = vmul.f32 %v2546_v35, %v2546_v35 }
 0x85b   : > { %2551 = vadd.xlane.f32.xlu0 %v2548_v36 }
 0x8e0   : > { %v2550_v37 = vpop.xlane.xlu1 %2549 }
 0x8e1   : > { %v2553_v38 = vmul.f32 0.0078125, %v2550_v37 }
 0x8e3   : > { %v2555_v13 = vadd.f32 1e-05, %v2553_v38 }
 0x8e4   : > { %v2552_v39 = vpop.xlane.xlu0 %2551 }
 0x8e5   : > { %3330 = vrsqrt.f32 %v2555_v13  ;;  %v2554_v40 = vmul.f32 0.0078125, %v2552_v39 }
 0x8e7   : > { %v2556_v41 = vadd.f32 1e-05, %v2554_v40 }
 0x8e9   : > { %3332 = vrsqrt.f32 %v2556_v41 }
 0x8f2   : > { %v3331_v20 = vpop.eup %3330 }
 0x8f3   : > { %v2559_v14 = vmul.f32 %v3331_v20, %v2545_v32 }
 0x8f5   : > { %v2567_v43 = vmul.f32 %v2869_v18, %v2559_v14 }
 0x8f6   : > { %v3333_v21 = vpop.eup %3332 }
 0x8f7   : > { %v2575_v44 = vadd.f32 %v2870_v42, %v2567_v43  ;;  %v2560_v17 = vmul.f32 %v3333_v21, %v2546_v35 }
 0x8f9   : > { %2577 = vst [vmem:[%s4041_s13] sm:$0xff] %v2575_v44  ;;  %v2568_v46 = vmul.f32 %v2869_v18, %v2560_v17 }
 0x8fb   : > { %v2576_v47 = vadd.f32 %v2870_v42, %v2568_v46 }
 0x8fd   : > { %2578 = vst [vmem:[%s4041_s13 + $0x8] sm:$0xff] %v2576_v47 }
 0x8fe PF: > { %s4469_s6 = sld [smem:[#allocation38_spill]]  ;;  %s2595_s5 = sshll.u32 %s4041_s13, 4  ;;  %s4299_s5 = int_to_ptr.vmem [resolvable:$true] %s2595_s5 }
 0x8ff   : > { %s4470_s9 = sld [smem:[#allocation39_spill]]  ;;  %s2580_s18 = scalar_lea.sflag [#allocation7], %s4002_s11 }
 0x900   : > { %s4471_s12 = sld [smem:[#allocation44_spill]]  ;;  %s3438_s27 = scalar_lea.vmem %s4299_s5, 256 }
 0x901   : > { %s4472_s26 = sld [smem:[#allocation59_spill]]  ;;  %p3439_p3 = scmp.ne.s32.totalorder %s4299_s5, %s3438_s27 }
 0x902   : > { %s3629_s10 = smov [#allocation17]  }
 0x903   : > { %s3442_s13 = sshll.u32 %s3629_s10, 4  ;;  %s3443_s13 = int_to_ptr.vmem [resolvable:$false] %s3442_s13 }
 0x904   : > { %s2872_s25 = sshll.u32 %s4469_s6, 1  ;;  %s3444_s22 = scalar_lea.vmem %s3443_s13, 512 }
 0x905   : > { %s2873_s19 = sshll.u32 %s4470_s9, 2  ;;  %p3445_p1 = scmp.lt.s32.totalorder %s4299_s5, %s3443_s13 }
 0x906   : > { %s2592_s20 = sadd.s32 %s2873_s19, %s2872_s25  ;;  %p4474_p4 = scmp.ne.s32.totalorder %s4471_s12, 0 }
 0x907   : > { %s2874_s7 = sshll.u32 %s2592_s20, 7  ;;  %s4473_s4 = smov %s4472_s26 }
 0x908   : > { %s4304_s23 = scalar_lea.hbm %s4472_s26, %s2874_s7  ;;  %p3440_p2 = pnand %p3439_p3, %p4474_p4 }
 0x909   : > { %p3446_p13 = scmp.lt.s32.totalorder %s3444_s22, %s3438_s27 }
 0x90a   : > { %p3441_p10 = pneg %p3440_p2 }
 0x90b   : > { %p3447_p6 = por %p3446_p13, %p3445_p1 }
 0x90d   : > { %p3448_p11 = pnand %p3447_p6, %p3441_p10 }
 0x90f   : > { %3451 = shalt.err (!%p3448_p11)
}
 0x910   : > { %s3452_s16 = scalar_lea.hbm %s4304_s23, 256  ;;  %s3456_s6 = scalar_lea.hbm %s4473_s4, 1024 }
 0x911   : > { %p3453_p12 = scmp.ne.s32.totalorder %s4304_s23, %s3452_s16  ;;  %p3457_p7 = scmp.lt.s32.totalorder %s4304_s23, %s4473_s4 }
 0x912   : > { %p3458_p5 = scmp.lt.s32.totalorder %s3456_s6, %s3452_s16 }
 0x913   : > { %p3454_p9 = pnand %p3453_p12, %p4474_p4 }
 0x914   : > { %p3459_p0 = por %p3458_p5, %p3457_p7 }
 0x915   : > { %p3455_p8 = pneg %p3454_p9 }
 0x917   : > { %p3460_p3 = pnand %p3459_p0, %p3455_p8 }
 0x919   : > { %3463 = shalt.err (!%p3460_p3)
}
 0x91a   : > { %s3630_s19 = smov 128   ;;  %s3631_s20 = smov 8  }
 0x91b   : > { %3113 = dma.vmem_to_hbm [thread:$0]  (%p4474_p4), %s4299_s5, 256, %s4304_s23, %s2580_s18, %s3630_s19, %s3630_s19, %s3631_s20  }
 0x91c PF: > { %s4475_s7 = sld [smem:[#allocation35_spill]]  ;;  %p3135_p2 = scmp.ge.s32.totalorder %s3594_s0, 2 }
 0x91d   : > { %s4476_s24 = sld [smem:[#allocation47_spill]] }
 0x922   : > { %s2610_s21 = sand.u32 1, %s4475_s7  }
 0x923   : > { %p4477_p10 = scmp.ne.s32.totalorder %s4476_s24, 0  ;;  %s2611_s26 = scalar_lea.sflag [#allocation7], %s2610_s21 }
 0x925   : > { %p3126_p1 = pnand %p3135_p2, %p4477_p10 }
 0x927   : > { %p3127_p13 = pneg %p3126_p1 }
 0x929   : > { %3541 = dma.done.wait (%p3127_p13), %s2611_s26, 256  }
 0x92a   : > { %3543 = vsyncadd (%p3127_p13), %s2611_s26, 4294967040  ;;  %s39_s0 = sadd.s32 1, %s3594_s0   ;;  %s4479_s21 = sld [smem:[#allocation34_spill]] }
 0x92b   : > { %p4334_p6 = scmp.ge.s32.totalorder %s39_s0, 10   ;;  %s4480_s11 = sld [smem:[#allocation46_spill]] }
 0x92c   : > { %s4481_s12 = sld [smem:[#allocation36_spill]]  ;;  %s4487_s22 = smov %s3554_s14 }
 0x92d   : > { %s4482_s24 = sld [smem:[#allocation45_spill]]  ;;  %s4489_s23 = smov %s3562_s15 }
 0x92e   : > { %s4483_s5 = sld [smem:[#allocation40_spill]]  ;;  %s4491_s25 = smov %s3582_s28 }
 0x92f   : > { %s4484_s18 = sld [smem:[#allocation41_spill]]  ;;  %s4492_s26 = smov %s3586_s29 }
 0x930   : > { %s4485_s10 = sld [smem:[#allocation42_spill]]  ;;  %s4493_s27 = smov %s3590_s30 }
 0x931   : > { %s4488_s14 = smov %s4480_s11 }
 0x932   : > { %s4490_s15 = smov %s4481_s12  ;;  %38 = sbr.rel (!%p4334_p6) target bundleno = 28 (0x1c), region = 201 }
 0x934   : > { %s4494_s28 = smov %s4483_s5 }
 0x935   : > { %s4495_s29 = smov %s4484_s18 }
 0x936   : > { %s4496_s30 = smov %s4485_s10 }
 0x937   :  { %2616 = vsyncpa [#allocation6], 1 }
 0x938   :  { %2618 = vsyncpa [#allocation6 + $0x1], 1 }
 0x939   :  { %2619 = vsyncpa [#allocation9], 1 }
 0x93a   :  { %2621 = vsyncpa [#allocation9 + $0x1], 1 }
 0x93b   :  { %2622 = vsyncpa [#allocation12], 1 }
 0x93c   :  { %2624 = vsyncpa [#allocation12 + $0x1], 1 }
 0x93d   :  { %2625 = vsyncpa [#allocation15], 1 }
 0x93e   :  { %2626 = vsyncpa [#allocation7], 1 }
 0x93f   :  { %2628 = vsyncpa [#allocation7 + $0x1], 1 }

// kernel: tpu_custom_call.1
= control target key start
LH: loop header
LB: loop body
LE: loop exit
PB: predicated region body
PF: predicated region fallthrough
CT: control target
= control target key end

     0   :  { %s4378_s0 = inlined_call_operand.hbm [shape: f32[2,32,128], index: 0, kind: input, shape index: {}]   ;;  %s4379_s1 = inlined_call_operand.hbm [shape: f32[2,12,32,32], index: 1, kind: input, shape index: {}]   ;;  %s4380_s2 = inlined_call_operand.hbm [shape: f32[2,12,32,32], index: 2, kind: input, shape index: {}]   ;;  %s4381_s3 = inlined_call_operand.hbm [shape: f32[2,12,32,32], index: 3, kind: input, shape index: {}]   ;;  %s4382_s4 = inlined_call_operand.hbm [shape: f32[4,32,128], index: 4, kind: input, shape index: {}]   ;;  %s4383_s5 = inlined_call_operand.vmem [shape: f32[1,128], index: 5, kind: input, shape index: {}]   ;;  %s4384_s6 = inlined_call_operand.vmem [shape: f32[1,128], index: 6, kind: input, shape index: {}]   ;;  %s4385_s7 = inlined_call_operand.vmem [shape: f32[1,128], index: 7, kind: input, shape index: {}]   ;;  %s4386_s8 = inlined_call_operand.hbm [shape: f32[128,256], index: 8, kind: input, shape index: {}]   ;;  %s4387_s9 = inlined_call_operand.vmem [shape: f32[1,256], index: 9, kind: input, shape index: {}]   ;;  %s4388_s10 = inlined_call_operand.hbm [shape: f32[256,128], index: 10, kind: input, shape index: {}]   ;;  %s4389_s11 = inlined_call_operand.vmem [shape: f32[1,128], index: 11, kind: input, shape index: {}]   ;;  %s4390_s12 = inlined_call_operand.vmem [shape: f32[1,128], index: 12, kind: input, shape index: {}]   ;;  %s4391_s13 = inlined_call_operand.vmem [shape: f32[1,128], index: 13, kind: input, shape index: {}]   ;;  %s4392_s14 = inlined_call_operand.vmem [shape: f32[1,128], index: 14, kind: input, shape index: {}]   ;;  %s4393_s15 = inlined_call_operand.vmem [shape: f32[1,128], index: 15, kind: input, shape index: {}]   ;;  %s4394_s16 = inlined_call_operand.hbm [shape: f32[2,32,128], index: 16, kind: output, shape index: {}]  }
   0x1   :  { %4411 = sst [smem:[#allocation48_spill]] %s4378_s0 }
   0x2   :  { %4412 = sst [smem:[#allocation49_spill]] %s4382_s4 }
   0x3   :  { %4413 = sst [smem:[#allocation50_spill]] %s4383_s5 }
   0x4   :  { %4414 = sst [smem:[#allocation51_spill]] %s4384_s6 }
   0x5   :  { %4415 = sst [smem:[#allocation52_spill]] %s4385_s7 }
   0x6   :  { %4416 = sst [smem:[#allocation53_spill]] %s4386_s8 }
   0x7   :  { %4417 = sst [smem:[#allocation54_spill]] %s4387_s9 }
   0x8   :  { %4418 = sst [smem:[#allocation55_spill]] %s4388_s10 }
   0x9   :  { %4419 = sst [smem:[#allocation56_spill]] %s4389_s11 }
   0xa   :  { %4420 = sst [smem:[#allocation57_spill]] %s4390_s12 }
   0xb   :  { %4421 = sst [smem:[#allocation58_spill]] %s4391_s13 }
   0xc   :  { %4422 = sst [smem:[#allocation59_spill]] %s4394_s16 }
   0xd   :  { %21 = vsyncpa [#allocation6], 0 }
   0xe   :  { %23 = vsyncpa [#allocation6 + $0x1], 0 }
   0xf   :  { %24 = vsyncpa [#allocation9], 0 }
  0x10   :  { %26 = vsyncpa [#allocation9 + $0x1], 0 }
  0x11   :  { %27 = vsyncpa [#allocation12], 0 }
  0x12   :  { %29 = vsyncpa [#allocation12 + $0x1], 0 }
  0x13   :  { %30 = vsyncpa [#allocation15], 0 }
  0x14   :  { %31 = vsyncpa [#allocation7], 0 }
  0x15   :  { %33 = vsyncpa [#allocation7 + $0x1], 0  ;;  %s3717_s21 = smov 0   ;;  %s3719_s22 = smov 0  }
  0x16   :  { %s3721_s14 = smov 0   ;;  %s3723_s23 = smov 0  }
  0x17   :  { %s3725_s15 = smov 0   ;;  %s3727_s24 = smov 0  }
  0x18   :  { %s3729_s25 = smov 0   ;;  %s3731_s26 = smov 0  }
  0x19   :  { %s3733_s27 = smov 0   ;;  %s3735_s28 = smov 0  }
  0x1a   :  { %s3737_s29 = smov 0   ;;  %s3739_s30 = smov 0  }
  0x1b   :  { %s3741_s0 = smov 0  }
  0x1c LB: > { %4423 = sst [smem:[#allocation34_spill]] %s3550_s22  ;;  %s3783_s17 = sadd.s32 4294967295, %s3594_s0   ;;  %s3594_s0 = sphi %s3741_s0, %s39_s0   ;;  %s3590_s30 = sphi %s3739_s30, %s4496_s30   ;;  %s3586_s29 = sphi %s3737_s29, %s4495_s29   ;;  %s3582_s28 = sphi %s3735_s28, %s4494_s28   ;;  %s3578_s27 = sphi %s3733_s27, %s4493_s27   ;;  %s3574_s26 = sphi %s3731_s26, %s4492_s26   ;;  %s3570_s25 = sphi %s3729_s25, %s4491_s25   ;;  %s3566_s24 = sphi %s3727_s24, %s4482_s24   ;;  %s3562_s15 = sphi %s3725_s15, %s4490_s15   ;;  %s3558_s23 = sphi %s3723_s23, %s4489_s23   ;;  %s3554_s14 = sphi %s3721_s14, %s4488_s14   ;;  %s3550_s22 = sphi %s3719_s22, %s4487_s22   ;;  %s3546_s21 = sphi %s3717_s21, %s4479_s21  }
  0x1d   : > { %4424 = sst [smem:[#allocation35_spill]] %s3558_s23  ;;  %s51_s19 = sadd.s32 1, %s3582_s28 }
  0x1e   : > { %4425 = sst [smem:[#allocation36_spill]] %s3566_s24  ;;  %s54_s20 = sadd.s32 1, %s3586_s29 }
  0x1f   : > { %4426 = sst [smem:[#allocation37_spill]] %s3570_s25  ;;  %p52_p0 = scmp.ge.s32.totalorder %s51_s19, 2 }
  0x20   : > { %4427 = sst [smem:[#allocation38_spill]] %s3574_s26  ;;  %s58_s16 = sadd.s32 1, %s3590_s30 }
  0x21   : > { %4428 = sst [smem:[#allocation39_spill]] %s3578_s27  ;;  %p74_p1 = scmp.ne.s32.totalorder %s3566_s24, %s3562_s15 }
  0x22   : > { %s4498_s19 = smov (%p52_p0, %s51_s19), 0  ;;  %s4500_s20 = smov (!%p52_p0, %s54_s20), %s3586_s29 }
  0x23   : > { %4429 = sst [smem:[#allocation40_spill]] %s4498_s19  ;;  %p75_p2 = scmp.eq.s32.totalorder %s3594_s0, 0 }
  0x24   : > { %p80_p3 = scmp.ne.s32.totalorder %s3562_s15, %s3558_s23  ;;  %p56_p4 = scmp.ge.s32.totalorder %s4500_s20, 2 }
  0x25   : > { %p4400_p5 = scmp.eq.s32.totalorder %s3783_s17, 0  ;;  %p3804_p6 = por %p75_p2, %p74_p1 }
  0x26   : > { %s119_s18 = ssub.s32 %s3582_s28, %s4498_s19  ;;  %s4502_s20 = smov (%p56_p4, %s4500_s20), 0 }
  0x27   : > { %4431 = sst [smem:[#allocation41_spill]] %s4502_s20  ;;  %s4504_s16 = smov (!%p56_p4, %s58_s16), %s3590_s30 }
  0x28   : > { %s63_s26 = ssub.s32 %s3586_s29, %s4502_s20  ;;  %p3820_p7 = por %p4400_p5, %p80_p3 }
  0x29   : > { %p60_p8 = scmp.ge.s32.totalorder %s4504_s16, 2  ;;  %s123_s12 = sadd.s32 1, %s3554_s14 }
  0x2a   : > { %s4432_s13 = scalar_select %p3820_p7, 1, 0 }
  0x2b   : > { %p130_p9 = scmp.ne.s32.totalorder %s3554_s14, %s3550_s22  ;;  %p136_p10 = scmp.ne.s32.totalorder %s3550_s22, %s3546_s21 }
  0x2c   : > { %s4506_s16 = smov (%p60_p8, %s4504_s16), 0  ;;  %p442_p13 = scmp.eq.s32.totalorder %s3783_s17, 7 }
  0x2d   : > { %4433 = sst [smem:[#allocation42_spill]] %s4506_s16  ;;  %p3833_p11 = por %p130_p9, %p75_p2 }
  0x2e   : > { %p3839_p12 = por %p136_p10, %p4400_p5  ;;  %s62_s11 = ssub.s32 %s3590_s30, %s4506_s16 }
  0x2f   : > { %s64_s9 = sor.u32 %s63_s26, %s62_s11  ;;  %s120_s7 = sor.u32 %s119_s18, %s62_s11 }
  0x30   : > { %s4435_s19 = scalar_select %p3839_p12, 1, 0 }
  0x31   : > { %p65_p0 = scmp.eq.s32.totalorder %s64_s9, 0  ;;  %p121_p4 = scmp.eq.s32.totalorder %s120_s7, 0 }
  0x32   : > { %4436 = sst [smem:[#allocation43_spill]] %s4435_s19  ;;  %p3849_p8 = por %p442_p13, %p74_p1 }
  0x33   : > { %s4439_s6 = sadd.s32 4294967294, %s3594_s0   ;;  %s4440_s5 = sadd.s32 1, %s3566_s24 }
  0x34   : > { %s4437_s21 = scalar_select %p3849_p8, 1, 0 }
  0x35   : > { %p448_p2 = scmp.eq.s32.totalorder %s4439_s6, 7  ;;  %p2798_p10 = scmp.ge.s32.totalorder %s3594_s0, 1 }
  0x36   : > { %4438 = sst [smem:[#allocation44_spill]] %s4437_s21  ;;  %p455_p5 = scmp.lt.s32.totalorder %s3594_s0, 9 }
  0x37   : > { %s3858_s25 = scalar_select %p65_p0, %s3566_s24, %s4440_s5  }
  0x38   : > { %s3861_s22 = scalar_select %p121_p4, %s3554_s14, %s123_s12  }
  0x39   : > { %4441 = sst [smem:[#allocation45_spill]] %s3858_s25  ;;  %p3866_p9 = por %p448_p2, %p80_p3 }
  0x3a   : > { %4442 = sst [smem:[#allocation46_spill]] %s3861_s22  ;;  %p3872_p12 = pnand %p2798_p10, %p455_p5 }
  0x3b   : > { %s4443_s16 = scalar_select %p3866_p9, 1, 0 }
  0x3c   : > { %s3596_s9 = smov [#allocation14]   ;;  %p3115_p1 = pneg %p3872_p12 }
  0x3d   : > { %4444 = sst [smem:[#allocation47_spill]] %s4443_s16  ;;  %s489_s11 = sshll.u32 %s3596_s9, 4  ;;  %s490_s11 = int_to_ptr.vmem [resolvable:$true] %s489_s11 }
  0x3e   : > { %p4446_p13 = scmp.eq.s32.totalorder %s3783_s17, 0  ;;  %s3345_s6 = scalar_lea.vmem %s490_s11, 4096 }
  0x3f   : > { %p3346_p5 = scmp.ne.s32.totalorder %s490_s11, %s3345_s6  ;;  %p3353_p10 = scmp.lt.s32.totalorder %s490_s11, %s490_s11 }
  0x40   : > { %p3880_p0 = pnand %p3115_p1, %p4446_p13  ;;  %p3354_p9 = scmp.lt.s32.totalorder %s3345_s6, %s3345_s6 }
  0x42   : > { %p3336_p3 = pneg %p3880_p0  ;;  %p3355_p8 = por %p3354_p9, %p3353_p10 }
  0x44   : > { %p3348_p4 = pnand %p3346_p5, %p3336_p3 }
  0x46   : > { %p3349_p2 = pneg %p3348_p4 }
  0x48   : > { %p3356_p7 = pnand %p3355_p8, %p3349_p2 }
  0x4a   : > { %3359 = shalt.err (!%p3356_p7)
}
  0x4b   : > { %s3597_s12 = smov 256   ;;  %s3598_s26 = smov 16  }
  0x4c   : > { %s4448_s8 = sld [smem:[#allocation53_spill]]  ;;  %s3599_s25 = smov [#allocation13]  }
  0x4d   : > { %s467_s22 = sshll.u32 %s3599_s25, 4  ;;  %s468_s22 = int_to_ptr.vmem [resolvable:$true] %s467_s22 }
  0x4e   : > { %s3371_s16 = scalar_lea.vmem %s468_s22, 2048  ;;  %p3379_p8 = scmp.lt.s32.totalorder %s468_s22, %s468_s22 }
  0x4f   : > { %p3372_p1 = scmp.ne.s32.totalorder %s468_s22, %s3371_s16  ;;  %p3380_p7 = scmp.lt.s32.totalorder %s3371_s16, %s3371_s16 }
  0x51   : > { %p3374_p13 = pnand %p3372_p1, %p3336_p3  ;;  %p3381_p5 = por %p3380_p7, %p3379_p8 }
  0x52   : > { %3121 = dma.hbm_to_vmem [thread:$0]  (!%p3880_p0), %s4448_s8, 4096, %s490_s11, [#allocation15], %s3597_s12, %s3597_s12, %s3598_s26  }
  0x53   : > { %p3375_p9 = pneg %p3374_p13 }
  0x55   : > { %p3382_p4 = pnand %p3381_p5, %p3375_p9 }
  0x57   : > { %3385 = shalt.err (!%p3382_p4)
}
  0x58   : > { %s3600_s6 = smov 128   ;;  %s3601_s23 = smov 8  }
  0x59   : > { %s4449_s4 = sld [smem:[#allocation49_spill]]  ;;  %s3602_s25 = smov [#allocation16]  }
  0x5a   : > { %s505_s26 = sshll.u32 %s3602_s25, 4  ;;  %s506_s26 = int_to_ptr.vmem [resolvable:$true] %s505_s26 }
  0x5b   : > { %s3397_s18 = scalar_lea.vmem %s506_s26, 4096  ;;  %p3405_p13 = scmp.lt.s32.totalorder %s506_s26, %s506_s26 }
  0x5c   : > { %p3398_p2 = scmp.ne.s32.totalorder %s506_s26, %s3397_s18  ;;  %p3406_p9 = scmp.lt.s32.totalorder %s3397_s18, %s3397_s18 }
  0x5e   : > { %p3400_p10 = pnand %p3398_p2, %p3336_p3  ;;  %p3407_p8 = por %p3406_p9, %p3405_p13 }
  0x5f   : > { %3118 = dma.hbm_to_vmem [thread:$0]  (!%p3880_p0), %s4449_s4, 2048, %s468_s22, [#allocation12], %s3600_s6, %s3600_s6, %s3601_s23  }
  0x60   : > { %p3401_p1 = pneg %p3400_p10 }
  0x62   : > { %p3408_p7 = pnand %p3407_p8, %p3401_p1 }
  0x64   : > { %3411 = shalt.err (!%p3408_p7)
}
  0x65   : > { %s4450_s10 = sld [smem:[#allocation55_spill]]  ;;  %p2802_p5 = scmp.ge.s32.totalorder %s3594_s0, 8 }
  0x66   : > { %s3912_s22 = sand.u32 (!%p2802_p5), 1, %s3566_s24   ;;  %s2804_s11 = sshll.u32 (!%p2802_p5), %s3586_s29, 1 }
  0x67   : > { %530 = sbr.rel (%p2802_p5) target bundleno = 164 (0xa4), region = 64  ;;  %s2803_s12 = sshll.u32 (!%p2802_p5), %s3912_s22, 4 }
  0x68   : > { %s2805_s25 = sshll.u32 (!%p2802_p5), %s3590_s30, 2  ;;  %s538_s18 = scalar_lea.vmem (!%p2802_p5), [#allocation5], %s2803_s12 }
  0x69   : > { %s544_s5 = sadd.s32 (!%p2802_p5), %s2805_s25, %s2804_s11  ;;  %s547_s16 = sshll.u32 (!%p2802_p5), %s538_s18, 4  ;;  %s548_s16 = int_to_ptr.vmem [resolvable:$true] %s547_s16 }
  0x6a   : > { %s4451_s9 = sld [smem:[#allocation48_spill]] (!%p2802_p5)  ;;  %s535_s8 = scalar_lea.sflag (!%p2802_p5), [#allocation6], %s3912_s22 }
  0x6b   : > { %3124 = dma.hbm_to_vmem [thread:$0]  (!%p3880_p0), %s4450_s10, 4096, %s506_s26, [#allocation15], %s3600_s6, %s3600_s6, %s3601_s23  }
  0x6c   : > { %s2806_s23 = sshll.u32 %s544_s5, 7  ;;  %s3424_s10 = scalar_lea.vmem %s548_s16, 256 }
  0x6d   : > { %p3425_p0 = scmp.ne.s32.totalorder %s548_s16, %s3424_s10  ;;  %s3603_s24 = smov [#allocation5]  }
  0x6e   : > { %s3428_s21 = sshll.u32 %s3603_s24, 4  ;;  %s3429_s21 = int_to_ptr.vmem [resolvable:$false] %s3428_s21 }
  0x6f   : > { %p3426_p3 = pnand %p3425_p0, %p3804_p6  ;;  %s3430_s19 = scalar_lea.vmem %s3429_s21, 512 }
  0x70   : > { %s546_s4 = scalar_lea.hbm %s4451_s9, %s2806_s23  ;;  %p3431_p2 = scmp.lt.s32.totalorder %s548_s16, %s3429_s21 }
  0x71   : > { %p3427_p4 = pneg %p3426_p3  ;;  %p3432_p10 = scmp.lt.s32.totalorder %s3430_s19, %s3424_s10 }
  0x73   : > { %p3433_p1 = por %p3432_p10, %p3431_p2 }
  0x75   : > { %p3434_p13 = pnand %p3433_p1, %p3427_p4 }
  0x77   : > { %3437 = shalt.err (!%p3434_p13)
}
  0x78   : > { %s3604_s12 = smov 128   ;;  %s3605_s25 = smov 8  }
  0x79   : > { %3078 = dma.hbm_to_vmem [thread:$0]  (%p3804_p6), %s546_s4, 256, %s548_s16, %s535_s8, %s3604_s12, %s3604_s12, %s3605_s25  }
  0x7a   : > { %s557_s24 = sand.u32 1, %s3594_s0   ;;  %s2807_s5 = sshll.u32 %s3912_s22, 6 }
  0x7b   : > { %s3071_s21 = smul.u32 48, %s3590_s30  ;;  %s561_s10 = scalar_lea.vmem [#allocation8], %s2807_s5 }
  0x7c   : > { %s582_s19 = sshll.u32 %s561_s10, 4  ;;  %s3606_s22 = smov 512   ;;  %s583_s19 = int_to_ptr.vmem [resolvable:$true] %s582_s19 }
  0x7d   : > { %s3079_s18 = scalar_select %p3804_p6, [#allocation0], [#allocation24] }
  0x7e   : > { %s567_s23 = sadd.s32 %s3071_s21, %s2804_s11  ;;  %3080 = sst [smem:[#allocation19]] (%p3804_p6), %s3606_s22 }
  0x7f   : > { %s2809_s4 = sshll.u32 %s567_s23, 7  ;;  %s574_s8 = sld [smem:[%s3079_s18]]  }
  0x80   : > { %s569_s26 = scalar_lea.hbm %s4379_s1, %s2809_s4  ;;  %s3607_s9 = smov 256  }
  0x81   : > { %3081 = sst [smem:[#allocation19 + $0x1]] (%p3804_p6), %s3607_s9  ;;  %s3608_s12 = smov 2  }
  0x82   : > { %3082 = sst [smem:[#allocation19 + $0x2]] (%p3804_p6), %s3608_s12  ;;  %s3609_s11 = smov 128  }
  0x83   : > { %3083 = sst [smem:[#allocation19 + $0x3]] (%p3804_p6), %s3609_s11  ;;  %s3610_s10 = smov 8  }
  0x84   : > { %3084 = sst [smem:[#allocation19 + $0x4]] (%p3804_p6), %s3609_s11  ;;  %s3951_s18 = scalar_lea.sflag [#allocation9], %s557_s24 }
  0x85   : > { %s2810_s25 = sshll.u32 %s574_s8, 26  ;;  %3085 = sst [smem:[#allocation19 + $0x5]] (%p3804_p6), %s3610_s10 }
  0x86   : > { %s2811_s5 = sadd.s32 134217728, %s2810_s25  ;;  %s3611_s23 = smov 131072  }
  0x87   : > { %3086 = dma.general (%p3804_p6), %s569_s26, 1024, %s583_s19, %s3951_s18, %s3611_s23, [#allocation19], %s2811_s5, 0  }
  0x88   : > { %s607_s4 = sand.u32 1, %s3554_s14   ;;  %s2813_s8 = sshll.u32 %s3582_s28, 1 }
  0x89   : > { %s2812_s16 = sshll.u32 %s607_s4, 6  ;;  %s2650_s6 = sadd.s32 %s3071_s21, %s2813_s8 }
  0x8a   : > { %s2814_s22 = sshll.u32 %s2650_s6, 7  ;;  %s609_s25 = scalar_lea.vmem [#allocation10], %s2812_s16 }
  0x8b   : > { %s2652_s11 = scalar_lea.hbm %s4380_s2, %s2814_s22  ;;  %s631_s27 = sshll.u32 %s609_s25, 4  ;;  %s632_s27 = int_to_ptr.vmem [resolvable:$true] %s631_s27 }
  0x8c   : > { %s3087_s19 = scalar_select %p3833_p11, [#allocation0], [#allocation25] }
  0x8d   : > { %s3612_s5 = smov 512   ;;  %s2653_s10 = scalar_lea.hbm %s2652_s11, 2048 }
  0x8e   : > { %s623_s26 = sld [smem:[%s3087_s19]]   ;;  %s3613_s21 = smov 256  }
  0x8f   : > { %3088 = sst [smem:[#allocation21]] (%p3833_p11), %s3612_s5  ;;  %s3614_s23 = smov 2  }
  0x90   : > { %3089 = sst [smem:[#allocation21 + $0x1]] (%p3833_p11), %s3613_s21  ;;  %s3615_s4 = smov 128  }
  0x91   : > { %3090 = sst [smem:[#allocation21 + $0x2]] (%p3833_p11), %s3614_s23  ;;  %s3616_s6 = smov 8  }
  0x92   : > { %3091 = sst [smem:[#allocation21 + $0x3]] (%p3833_p11), %s3615_s4  ;;  %s3617_s12 = smov 131072  }
  0x93   : > { %3092 = sst [smem:[#allocation21 + $0x4]] (%p3833_p11), %s3615_s4 }
  0x94   : > { %s2815_s8 = sshll.u32 %s623_s26, 26  ;;  %3093 = sst [smem:[#allocation21 + $0x5]] (%p3833_p11), %s3616_s6 }
  0x95   : > { %s2816_s9 = sadd.s32 134217728, %s2815_s8 }
  0x96   : > { %3094 = dma.general (%p3833_p11), %s2653_s10, 1024, %s632_s27, %s3951_s18, %s3617_s12, [#allocation21], %s2816_s9, 0  }
  0x97   : > { %s2661_s19 = scalar_lea.hbm %s4381_s3, %s2814_s22  ;;  %s658_s5 = scalar_lea.vmem [#allocation11], %s2812_s16 }
  0x98   : > { %s680_s21 = sshll.u32 %s658_s5, 4  ;;  %s3618_s4 = smov 512   ;;  %s681_s21 = int_to_ptr.vmem [resolvable:$true] %s680_s21 }
  0x99   : > { %s3095_s26 = scalar_select %p3833_p11, [#allocation0], [#allocation26] }
  0x9a   : > { %3096 = sst [smem:[#allocation23]] (%p3833_p11), %s3618_s4  ;;  %s2662_s18 = scalar_lea.hbm %s2661_s19, 4096 }
  0x9b   : > { %s672_s23 = sld [smem:[%s3095_s26]]   ;;  %s3619_s27 = smov 256  }
  0x9c   : > { %3097 = sst [smem:[#allocation23 + $0x1]] (%p3833_p11), %s3619_s27  ;;  %s3620_s10 = smov 2  }
  0x9d   : > { %3098 = sst [smem:[#allocation23 + $0x2]] (%p3833_p11), %s3620_s10  ;;  %s3621_s22 = smov 128  }
  0x9e   : > { %3099 = sst [smem:[#allocation23 + $0x3]] (%p3833_p11), %s3621_s22  ;;  %s3622_s8 = smov 8  }
  0x9f   : > { %3100 = sst [smem:[#allocation23 + $0x4]] (%p3833_p11), %s3621_s22  ;;  %s655_s9 = scalar_lea.sflag [#allocation12], %s557_s24 }
  0xa0   : > { %3101 = sst [smem:[#allocation23 + $0x5]] (%p3833_p11), %s3622_s8  ;;  %s3623_s12 = smov 131072  }
  0xa1   : > { %s2820_s16 = sshll.u32 %s672_s23, 26 }
  0xa2   : > { %s2821_s6 = sadd.s32 134217728, %s2820_s16 }
  0xa3   : > { %3102 = dma.general (%p3833_p11), %s2662_s18, 1024, %s681_s21, %s655_s9, %s3623_s12, [#allocation23], %s2821_s6, 0  }
  0xa4 PF: > { %705 = sbr.rel (%p3872_p12) target bundleno = 2332 (0x91c), region = 84  ;;  %s4002_s11 = sand.u32 (!%p3872_p12), 1, %s3562_s15  }
  0xa5   : > { %s2823_s25 = sshll.u32 (!%p3872_p12), %s4002_s11, 4  ;;  %s708_s19 = scalar_lea.sflag (!%p3872_p12), [#allocation6], %s4002_s11 }
  0xa6   : > { %s4006_s5 = scalar_lea.vmem (!%p3872_p12), [#allocation5], %s2823_s25  ;;  %p4452_p6 = scmp.ne.s32.totalorder (!%p3872_p12), %s4432_s13, 0 }
  0xa9   : > { %3517 = dma.done.wait (%p4452_p6), %s708_s19, 256  }
  0xaa   : > { %3519 = vsyncadd (%p4452_p6), %s708_s19, 4294967040  ;;  %s716_s20 = sand.u32 1, %s3783_s17   ;;  %s2824_s7 = sshll.u32 %s4002_s11, 6 }
  0xab   : > { %s717_s24 = scalar_lea.sflag [#allocation9], %s716_s20  ;;  %s4014_s21 = scalar_lea.vmem [#allocation8], %s2824_s7 }
  0xac   : > { %3521 = dma.done.wait (%p4452_p6), %s717_s24, 1024  }
  0xad   : > { %3523 = vsyncadd (%p4452_p6), %s717_s24, 4294966272  ;;  %s4453_s26 = sld [smem:[#allocation34_spill]] }
  0xae   : > { %s4454_s23 = sld [smem:[#allocation43_spill]] }
  0xb3   : > { %s727_s4 = sand.u32 1, %s4453_s26  }
  0xb4   : > { %s2825_s18 = sshll.u32 %s727_s4, 6  ;;  %p4455_p11 = scmp.ne.s32.totalorder %s4454_s23, 0 }
  0xb5   : > { %s4021_s27 = scalar_lea.vmem [#allocation10], %s2825_s18 }
  0xb6   : > { %3525 = dma.done.wait (%p4455_p11), %s717_s24, 1024  }
  0xb7   : > { %3527 = vsyncadd (%p4455_p11), %s717_s24, 4294966272  ;;  %s735_s10 = scalar_lea.sflag [#allocation12], %s716_s20  ;;  %s4027_s22 = scalar_lea.vmem [#allocation11], %s2825_s18 }
  0xb8   : > { %3529 = dma.done.wait (%p4455_p11), %s735_s10, 1024  }
  0xb9   : > { %3531 = vsyncadd (%p4455_p11), %s735_s10, 4294966272  ;;  %p4456_p12 = scmp.eq.s32.totalorder %s3783_s17, 0 }
  0xbb   : > { %3533 = dma.done.wait (%p4456_p12), [#allocation12], 2048   ;;  %p4457_p9 = pmov %p4456_p12 }
  0xbd   : > { %3535 = vsyncadd (%p4457_p9), [#allocation12], 4294965248  ;;  %p4458_p8 = pmov %p4457_p9 }
  0xbf   : > { %3537 = dma.done.wait (%p4458_p8), [#allocation15], 8192   ;;  %p4459_p7 = pmov %p4458_p8 }
  0xc0   : > { %s4041_s13 = scalar_lea.vmem [#allocation17], %s2823_s25  ;;  %s4460_s16 = sld [smem:[#allocation37_spill]] }
  0xc1   : > { %3539 = vsyncadd (%p4459_p7), [#allocation15], 4294959104 }
  0xc6   : > { %p2831_p5 = scmp.ne.s32.totalorder %s4460_s16, 0 }
  0xc8   : > { %822 = sbr.rel (%p2831_p5) target bundleno = 218 (0xda), region = 116 }
  0xcd   : > { %vm823_vm0 = vcmask 7168   ;;  %vm840_vm1 = vcmask 261120   ;;  %v3624_v0 = vmov -inf   ;;  %v3625_v1 = vmov 0.0  }
  0xce   : > { %824 = vst.msk [vmem:[#allocation2] sm:$0xff] %vm823_vm0, %v3624_v0  ;;  %825 = vst.msk [vmem:[#allocation2 + $0x8] sm:$0xff] %vm823_vm0, %v3624_v0 }
  0xcf   : > { %826 = vst.msk [vmem:[#allocation2 + $0x10] sm:$0xff] %vm823_vm0, %v3624_v0  ;;  %827 = vst.msk [vmem:[#allocation2 + $0x18] sm:$0xff] %vm823_vm0, %v3624_v0 }
  0xd0   : > { %828 = vst.msk [vmem:[#allocation2 + $0x20] sm:$0xff] %vm823_vm0, %v3624_v0  ;;  %829 = vst.msk [vmem:[#allocation2 + $0x28] sm:$0xff] %vm823_vm0, %v3624_v0 }
  0xd1   : > { %830 = vst.msk [vmem:[#allocation2 + $0x30] sm:$0xff] %vm823_vm0, %v3624_v0  ;;  %831 = vst.msk [vmem:[#allocation2 + $0x38] sm:$0xff] %vm823_vm0, %v3624_v0 }
  0xd2   : > { %832 = vst.msk [vmem:[#allocation3] sm:$0xff] %vm823_vm0, %v3625_v1  ;;  %833 = vst.msk [vmem:[#allocation3 + $0x8] sm:$0xff] %vm823_vm0, %v3625_v1 }
  0xd3   : > { %834 = vst.msk [vmem:[#allocation3 + $0x10] sm:$0xff] %vm823_vm0, %v3625_v1  ;;  %835 = vst.msk [vmem:[#allocation3 + $0x18] sm:$0xff] %vm823_vm0, %v3625_v1 }
  0xd4   : > { %836 = vst.msk [vmem:[#allocation3 + $0x20] sm:$0xff] %vm823_vm0, %v3625_v1  ;;  %837 = vst.msk [vmem:[#allocation3 + $0x28] sm:$0xff] %vm823_vm0, %v3625_v1 }
  0xd5   : > { %838 = vst.msk [vmem:[#allocation3 + $0x30] sm:$0xff] %vm823_vm0, %v3625_v1  ;;  %839 = vst.msk [vmem:[#allocation3 + $0x38] sm:$0xff] %vm823_vm0, %v3625_v1 }
  0xd6   : > { %841 = vst.msk [vmem:[#allocation4] sm:$0xff] %vm840_vm1, %v3625_v1  ;;  %842 = vst.msk [vmem:[#allocation4 + $0x8] sm:$0xff] %vm840_vm1, %v3625_v1 }
  0xd7   : > { %843 = vst.msk [vmem:[#allocation4 + $0x10] sm:$0xff] %vm840_vm1, %v3625_v1  ;;  %844 = vst.msk [vmem:[#allocation4 + $0x18] sm:$0xff] %vm840_vm1, %v3625_v1 }
  0xd8   : > { %845 = vst.msk [vmem:[#allocation4 + $0x20] sm:$0xff] %vm840_vm1, %v3625_v1  ;;  %846 = vst.msk [vmem:[#allocation4 + $0x28] sm:$0xff] %vm840_vm1, %v3625_v1 }
  0xd9   : > { %847 = vst.msk [vmem:[#allocation4 + $0x30] sm:$0xff] %vm840_vm1, %v3625_v1  ;;  %848 = vst.msk [vmem:[#allocation4 + $0x38] sm:$0xff] %vm840_vm1, %v3625_v1 }
  0xda PF: > { %v858_v2 = vld [vmem:[%s4021_s27 + $0x8] sm:$0xff]  ;;  %vm873_vm2 = vcmask 261120   ;;  %v860_v3 = vld [vmem:[%s4021_s27 + $0x18] sm:$0xff]  ;;  %v857_v4 = vld [vmem:[%s4021_s27] sm:$0xff]  ;;  %vm1230_vm3 = vcmask 130048   ;;  %v3626_v32 = vmov 0  }
  0xdb   : > { %2971 = vmatprep.subr.msk.mxu0 %vm873_vm2, %v858_v2  ;;  %2978 = vmatprep.subr.msk.mxu1 %vm873_vm2, %v860_v3  ;;  %v859_v5 = vld [vmem:[%s4021_s27 + $0x10] sm:$0xff]  ;;  %v849_v6 = vld [vmem:[%s4014_s21] sm:$0xff]  ;;  %v862_v8 = vld [vmem:[%s4021_s27 + $0x28] sm:$0xff]  ;;  %vm1399_vm4 = vcmask 7168   ;;  %s4461_s17 = sld [smem:[#allocation37_spill]] }
  0xdc   : > { %2972 = vmatpush3.xpose.msk.msra.mxu0 %vm873_vm2, %v858_v2  ;;  %2979 = vmatpush3.xpose.msk.msra.mxu1 %vm873_vm2, %v860_v3  ;;  %v851_v7 = vld [vmem:[%s4014_s21 + $0x10] sm:$0xff]  ;;  %v864_v9 = vld [vmem:[%s4021_s27 + $0x38] sm:$0xff]  ;;  %v850_v10 = vld [vmem:[%s4014_s21 + $0x8] sm:$0xff] }
  0xdd   : > { %2973 = vmatprep.subr.msk.mxu0 %vm873_vm2, %v857_v4  ;;  %2980 = vmatprep.subr.msk.mxu1 %vm873_vm2, %v859_v5  ;;  %v852_v11 = vld [vmem:[%s4014_s21 + $0x18] sm:$0xff]  ;;  %v853_v12 = vld [vmem:[%s4014_s21 + $0x20] sm:$0xff]  ;;  %v863_v14 = vld [vmem:[%s4021_s27 + $0x30] sm:$0xff] }
  0xde   : > { %2975 = vmatprep.mubr.msk.f32.mxu0 %vm873_vm2, %v849_v6  ;;  %2982 = vmatprep.mubr.msk.f32.mxu1 %vm873_vm2, %v851_v7  ;;  %v861_v13 = vld [vmem:[%s4021_s27 + $0x20] sm:$0xff]  ;;  %v855_v15 = vld [vmem:[%s4014_s21 + $0x30] sm:$0xff]  ;;  %v854_v16 = vld [vmem:[%s4014_s21 + $0x28] sm:$0xff] }
  0xdf   : > { %v856_v17 = vld [vmem:[%s4014_s21 + $0x38] sm:$0xff]  ;;  %3274 = vset.pattern.permute.xlu0 %v3626_v32  ;;  %3275 = vset.pattern.permute.xlu1 %v3626_v32  ;;  %v1223_v35 = vld [vmem:[#allocation2 + $0x8] sm:$0xff]  ;;  %v1222_v37 = vld [vmem:[#allocation2] sm:$0xff] }
  0xe0   : > { %2974 = vmatpush3.xpose.msk.msra.mxu0 %vm873_vm2, %v857_v4  ;;  %2981 = vmatpush3.xpose.msk.msra.mxu1 %vm873_vm2, %v859_v5  ;;  %v1225_v40 = vld [vmem:[#allocation2 + $0x18] sm:$0xff]  ;;  %v1224_v43 = vld [vmem:[#allocation2 + $0x10] sm:$0xff]  ;;  %v1226_v49 = vld [vmem:[#allocation2 + $0x20] sm:$0xff] }
  0xe1   : > { %2985 = vmatprep.subr.msk.mxu0 %vm873_vm2, %v862_v8  ;;  %2992 = vmatprep.subr.msk.mxu1 %vm873_vm2, %v864_v9  ;;  %v4144_v51 = vld [vmem:[#allocation2 + $0x30] sm:$0xff]  ;;  %v1227_v57 = vld [vmem:[#allocation2 + $0x28] sm:$0xff]  ;;  %v4150_v59 = vld [vmem:[#allocation2 + $0x38] sm:$0xff]  ;;  %p2856_p0 = scmp.ne.s32.totalorder %s4461_s17, 1 }
  0xe2   : > { %v866_v2 = vld [vmem:[%s4027_s22 + $0x8] sm:$0xff]  ;;  %v865_v5 = vld [vmem:[%s4027_s22] sm:$0xff]  ;;  %s4462_s9 = sld [smem:[#allocation50_spill]] (!%p2856_p0) }
  0xe3   : > { %2976 = vmatmul.mubr.msk.f32.vlgmr.msra.gmra.mxu0 %vm873_vm2, %v850_v10  ;;  %2983 = vmatmul.mubr.msk.f32.vlgmr.msra.gmra.mxu1 %vm873_vm2, %v852_v11  ;;  %v868_v10 = vld [vmem:[%s4027_s22 + $0x18] sm:$0xff]  ;;  %s4463_s19 = sld [smem:[#allocation51_spill]] (!%p2856_p0) }
  0xe4   : > { %2986 = vmatpush3.xpose.msk.msra.mxu0 %vm873_vm2, %v862_v8  ;;  %2989 = vmatprep.mubr.msk.f32.mxu0 %vm873_vm2, %v853_v12  ;;  %v867_v12 = vld [vmem:[%s4027_s22 + $0x10] sm:$0xff]  ;;  %s4464_s7 = sld [smem:[#allocation52_spill]] (!%p2856_p0) }
  0xe5   : > { %2987 = vmatprep.subr.msk.mxu0 %vm873_vm2, %v861_v13  ;;  %2993 = vmatpush3.xpose.msk.msra.mxu1 %vm873_vm2, %v864_v9  ;;  %s4465_s26 = sld [smem:[#allocation54_spill]] (!%p2856_p0) }
  0xe6   : > { %2994 = vmatprep.subr.msk.mxu1 %vm873_vm2, %v863_v14  ;;  %2996 = vmatprep.mubr.msk.f32.mxu1 %vm873_vm2, %v855_v15  ;;  %v870_v15 = vld [vmem:[%s4027_s22 + $0x28] sm:$0xff]  ;;  %s4466_s18 = sld [smem:[#allocation56_spill]] (!%p2856_p0) }
  0xe7   : > { %s4468_s8 = sld [smem:[#allocation58_spill]] (!%p2856_p0) }
  0xe8   : > { %2988 = vmatpush3.xpose.msk.msra.mxu0 %vm873_vm2, %v861_v13 }
  0xe9   : > { %2995 = vmatpush3.xpose.msk.msra.mxu1 %vm873_vm2, %v863_v14  ;;  %2999 = vmatprep.subr.mxu0 %v866_v2 }
  0xea   : > { %3006 = vmatprep.subr.mxu1 %v868_v10 }
  0xeb   : > { %2990 = vmatmul.mubr.msk.f32.vlgmr.msra.gmra.mxu0 %vm873_vm2, %v854_v16 }
  0xec   : > { %2997 = vmatmul.mubr.msk.f32.vlgmr.msra.gmra.mxu1 %vm873_vm2, %v856_v17  ;;  %3000 = vmatpush3.msra.mxu0 %v866_v2 }
  0xed   : > { %3001 = vmatprep.subr.mxu0 %v865_v5  ;;  %3007 = vmatpush3.msra.mxu1 %v868_v10 }
  0xee   : > { %3002 = vmatpush3.msra.mxu0 %v865_v5  ;;  %3008 = vmatprep.subr.mxu1 %v867_v12 }
  0xef   : > { %3009 = vmatpush3.msra.mxu1 %v867_v12  ;;  %3013 = vmatprep.subr.mxu0 %v870_v15 }
 0x1a3   : > { %v4108_v18 = vpop.f32.mrf.mxu0  ;;  %v4110_v19 = vpop.f32.mrf.mxu1 }
 0x1a4   : > { %v1234_v20 = vsel %vm1230_vm3, %v4108_v18, -inf  ;;  %v1240_v23 = vsel %vm1230_vm3, %v4110_v19, -inf }
 0x1a5   : > { %1235 = vmax.xlane.f32.xlu1 %v1234_v20  ;;  %v4114_v21 = vpop.f32.mrf.mxu0  ;;  %v4120_v24 = vpop.f32.mrf.mxu1 }
 0x1a6   : > { %v1231_v22 = vsel %vm1230_vm3, %v4114_v21, -inf  ;;  %v1237_v25 = vsel %vm1230_vm3, %v4120_v24, -inf }
 0x1a7   : > { %1232 = vmax.xlane.f32.xlu0 %v1231_v22  ;;  %v872_v22 = vld [vmem:[%s4027_s22 + $0x38] sm:$0xff] }
 0x1a8   : > { %3020 = vmatprep.subr.mxu1 %v872_v22 }
 0x1a9   : > { %1241 = vmax.xlane.f32.xlu1 %v1240_v23 }
 0x1ab   : > { %1238 = vmax.xlane.f32.xlu0 %v1237_v25  ;;  %v4124_v26 = vpop.f32.mrf.mxu0 }
 0x1ac   : > { %v4126_v27 = vpop.f32.mrf.mxu1  ;;  %v1246_v34 = vsel %vm1230_vm3, %v4124_v26, -inf }
 0x1ad   : > { %v4128_v28 = vpop.f32.mrf.mxu0  ;;  %v1252_v33 = vsel %vm1230_vm3, %v4126_v27, -inf }
 0x1ae   : > { %v1243_v29 = vsel %vm1230_vm3, %v4128_v28, -inf  ;;  %v4132_v30 = vpop.f32.mrf.mxu1 }
 0x1af   : > { %1244 = vmax.xlane.f32.xlu0 %v1243_v29  ;;  %v1249_v31 = vsel %vm1230_vm3, %v4132_v30, -inf }
 0x1b0   : > { %1250 = vmax.xlane.f32.xlu1 %v1249_v31 }
 0x1b3   : > { %1247 = vmax.xlane.f32.xlu0 %v1246_v34 }
 0x1b4   : > { %1253 = vmax.xlane.f32.xlu1 %v1252_v33 }
 0x22e   : > { %v1236_v36 = vpop.xlane.xlu1 %1235 }
 0x22f   : > { %v1256_v38 = vmax.f32 %v1223_v35, %v1236_v36 }
 0x230   : > { %v1233_v39 = vpop.xlane.xlu0 %1232 }
 0x231   : > { %1805 = vst.msk [vmem:[#allocation2 + $0x8] sm:$0xff] %vm1399_vm4, %v1256_v38  ;;  %v1255_v41 = vmax.f32 %v1222_v37, %v1233_v39  ;;  %1294 = vperm.xlu1 %3275, %v1256_v38   ;;  %v1264_v53 = vsub.f32 %v1223_v35, %v1256_v38 }
 0x232   : > { %v1242_v42 = vpop.xlane.xlu1 %1241 }
 0x233   : > { %1804 = vst.msk [vmem:[#allocation2] sm:$0xff] %vm1399_vm4, %v1255_v41  ;;  %v1258_v44 = vmax.f32 %v1225_v40, %v1242_v42  ;;  %1289 = vperm.xlu0 %3274, %v1255_v41   ;;  %v1263_v46 = vsub.f32 %v1222_v37, %v1255_v41  ;;  %v1273_v62 = vmul.f32 1.442695, %v1264_v53 }
 0x234   : > { %v1239_v45 = vpop.xlane.xlu0 %1238 }
 0x235   : > { %v1266_v47 = vsub.f32 %v1225_v40, %v1258_v44  ;;  %1807 = vst.msk [vmem:[#allocation2 + $0x18] sm:$0xff] %vm1399_vm4, %v1258_v44  ;;  %v1257_v48 = vmax.f32 %v1224_v43, %v1239_v45  ;;  %1304 = vperm.xlu1 %3275, %v1258_v44   ;;  %v1271_v54 = vmul.f32 1.442695, %v1263_v46 }
 0x237   : > { %v1277_v50 = vmul.f32 1.442695, %v1266_v47  ;;  %1806 = vst.msk [vmem:[#allocation2 + $0x10] sm:$0xff] %vm1399_vm4, %v1257_v48  ;;  %v1265_v63 = vsub.f32 %v1224_v43, %v1257_v48  ;;  %v869_v47 = vld [vmem:[%s4027_s22 + $0x20] sm:$0xff] }
 0x238   : > { %v1245_v52 = vpop.xlane.xlu0 %1244 }
 0x239   : > { %3276 = vpow2.f32 %v1277_v50  ;;  %v1259_v55 = vmax.f32 %v1226_v49, %v1245_v52  ;;  %1299 = vperm.xlu1 %3275, %v1257_v48   ;;  %v1251_v56 = vpop.xlane.xlu1 %1250  ;;  %v1275_v7 = vmul.f32 1.442695, %v1265_v63 }
 0x23a   : > { %v4147_v58 = vmax.f32 %v4144_v51, %v1251_v56  ;;  %3278 = vpow2.f32 %v1271_v54 }
 0x23b   : > { %1808 = vst.msk [vmem:[#allocation2 + $0x20] sm:$0xff] %vm1399_vm4, %v1259_v55  ;;  %3280 = vpow2.f32 %v1273_v62  ;;  %v1267_v8 = vsub.f32 %v1226_v49, %v1259_v55 }
 0x23c   : > { %v1248_v60 = vpop.xlane.xlu0 %1247  ;;  %v1269_v61 = vsub.f32 %v4144_v51, %v4147_v58  ;;  %1810 = vst.msk [vmem:[#allocation2 + $0x30] sm:$0xff] %vm1399_vm4, %v4147_v58 }
 0x23d   : > { %v1260_v0 = vmax.f32 %v1227_v57, %v1248_v60  ;;  %v1254_v1 = vpop.xlane.xlu1 %1253  ;;  %v1279_v11 = vmul.f32 1.442695, %v1267_v8 }
 0x23e   : > { %v4158_v3 = vmax.f32 %v4150_v59, %v1254_v1  ;;  %v1283_v2 = vmul.f32 1.442695, %v1269_v61  ;;  %v1376_v61 = vld [vmem:[#allocation3 + $0x8] sm:$0xff] }
 0x23f   : > { %v1268_v4 = vsub.f32 %v1227_v57, %v1260_v0  ;;  %1809 = vst.msk [vmem:[#allocation2 + $0x28] sm:$0xff] %vm1399_vm4, %v1260_v0  ;;  %1314 = vperm.xlu1 %3275, %v1260_v0  }
 0x240   : > { %v1270_v6 = vsub.f32 %v4150_v59, %v4158_v3  ;;  %1811 = vst.msk [vmem:[#allocation2 + $0x38] sm:$0xff] %vm1399_vm4, %v4158_v3 }
 0x241   : > { %v1281_v9 = vmul.f32 1.442695, %v1268_v4 }
 0x242   : > { %v1285_v5 = vmul.f32 1.442695, %v1270_v6 }
 0x243   : > { %3282 = vpow2.f32 %v1281_v9  ;;  %1309 = vperm.xlu1 %3275, %v1259_v55   ;;  %v871_v55 = vld [vmem:[%s4027_s22 + $0x30] sm:$0xff]  ;;  %s4467_s22 = sld [smem:[#allocation57_spill]] (!%p2856_p0) }
 0x244   : > { %3284 = vpow2.f32 %v1275_v7 }
 0x245   : > { %3286 = vpow2.f32 %v1279_v11 }
 0x246   : > { %v4168_v13 = vpop.eup %3276 }
 0x247   : > { %1757 = vperm.xlu0 %3274, %v4168_v13   ;;  %1319 = vperm.xlu1 %3275, %v4147_v58   ;;  %v4172_v14 = vpop.eup %3278 }
 0x248   : > { %v4177_v16 = vpop.eup %3280 }
 0x249   : > { %v1384_v12 = vmul.f32 %v4177_v16, %v1376_v61 }
 0x24b   : > { %1742 = vperm.xlu0 %3274, %v4172_v14   ;;  %1324 = vperm.xlu1 %3275, %v4158_v3   ;;  %v1378_v3 = vld [vmem:[#allocation3 + $0x18] sm:$0xff] }
 0x24f   : > { %1747 = vperm.xlu1 %3275, %v4177_v16  }
 0x250   : > { %v4180_v17 = vpop.eup %3282 }
 0x251   : > { %1767 = vperm.xlu0 %3274, %v4180_v17   ;;  %v4183_v20 = vpop.eup %3284 }
 0x252   : > { %v4187_v23 = vpop.eup %3286 }
 0x253   : > { %1752 = vperm.xlu1 %3275, %v4183_v20  }
 0x257   : > { %1762 = vperm.xlu1 %3275, %v4187_v23  }
 0x2ac   : > { %v1295_v25 = vpop.permute.xlu1 %1294 }
 0x2ad   : > { %v1328_v29 = vsub.f32 %v4108_v18, %v1295_v25 }
 0x2ae   : > { %v1290_v31 = vpop.permute.xlu0 %1289 }
 0x2af   : > { %v1337_v32 = vmul.f32 1.442695, %v1328_v29  ;;  %v1327_v33 = vsub.f32 %v4114_v21, %v1290_v31  ;;  %v1377_v29 = vld [vmem:[#allocation3 + $0x10] sm:$0xff] }
 0x2b0   : > { %v1305_v34 = vpop.permute.xlu1 %1304 }
 0x2b1   : > { %3288 = vpow2.f32 %v1337_v32  ;;  %v1335_v35 = vmul.f32 1.442695, %v1327_v33  ;;  %v1330_v36 = vsub.f32 %v4110_v19, %v1305_v34  ;;  %v1375_v32 = vld [vmem:[#allocation3] sm:$0xff]  ;;  %v1385_v33 = vmul.f32 %v4183_v20, %v1377_v29 }
 0x2b2   : > { %v1383_v34 = vmul.f32 %v4172_v14, %v1375_v32  ;;  %v1381_v14 = vld [vmem:[#allocation3 + $0x30] sm:$0xff] }
 0x2b3   : > { %3290 = vpow2.f32 %v1335_v35  ;;  %v1341_v37 = vmul.f32 1.442695, %v1330_v36 }
 0x2b4   : > { %v1300_v38 = vpop.permute.xlu1 %1299 }
 0x2b5   : > { %3292 = vpow2.f32 %v1341_v37  ;;  %v1329_v39 = vsub.f32 %v4120_v24, %v1300_v38  ;;  %v1380_v38 = vld [vmem:[#allocation3 + $0x28] sm:$0xff] }
 0x2b7   : > { %v1339_v40 = vmul.f32 1.442695, %v1329_v39 }
 0x2b9   : > { %3294 = vpow2.f32 %v1339_v40  ;;  %v1379_v40 = vld [vmem:[#allocation3 + $0x20] sm:$0xff] }
 0x2ba   : > { %v1315_v41 = vpop.permute.xlu1 %1314  ;;  %v1387_v20 = vmul.f32 %v4187_v23, %v1379_v40 }
 0x2bb   : > { %v1332_v18 = vsub.f32 %v4124_v26, %v1315_v41 }
 0x2bd   : > { %v1345_v42 = vmul.f32 1.442695, %v1332_v18 }
 0x2be   : > { %v3289_v43 = vpop.eup %3288  ;;  %v1310_v21 = vpop.permute.xlu1 %1309 }
 0x2bf   : > { %3296 = vpow2.f32 %v1345_v42  ;;  %v1331_v44 = vsub.f32 %v4128_v28, %v1310_v21  ;;  %v1354_v19 = vsel %vm1230_vm3, %v3289_v43, 0.0 }
 0x2c0   : > { %v3291_v45 = vpop.eup %3290  ;;  %1355 = vadd.xlane.f32.xlu0 %v1354_v19 }
 0x2c1   : > { %v1343_v46 = vmul.f32 1.442695, %v1331_v44  ;;  %3003 = vmatprep.mubr.msk.f32.mxu0 %vm1230_vm3, %v3291_v45  ;;  %v1382_v44 = vld [vmem:[#allocation3 + $0x38] sm:$0xff] }
 0x2c2   : > { %v3293_v24 = vpop.eup %3292  ;;  %v1320_v48 = vpop.permute.xlu1 %1319  ;;  %3004 = vmatmul.mubr.msk.f32.vlgmr.msra.gmra.mxu0 %vm1230_vm3, %v3289_v43 }
 0x2c3   : > { %3298 = vpow2.f32 %v1343_v46  ;;  %v1333_v26 = vsub.f32 %v4132_v30, %v1320_v48  ;;  %v1360_v49 = vsel %vm1230_vm3, %v3293_v24, 0.0  ;;  %3014 = vmatpush3.msra.mxu0 %v870_v15  ;;  %v1351_v30 = vsel %vm1230_vm3, %v3291_v45, 0.0  ;;  %v1758_v9 = vpop.permute.xlu0 %1757 }
 0x2c4   : > { %1361 = vadd.xlane.f32.xlu1 %v1360_v49  ;;  %3015 = vmatprep.subr.mxu0 %v869_v47 }
 0x2c5   : > { %v1347_v28 = vmul.f32 1.442695, %v1333_v26  ;;  %3016 = vmatpush3.msra.mxu0 %v869_v47  ;;  %v1733_v47 = vld [vmem:[#allocation4 + $0x8] sm:$0xff] }
 0x2c6   : > { %v3295_v50 = vpop.eup %3294  ;;  %v1325_v52 = vpop.permute.xlu1 %1324 }
 0x2c7   : > { %3300 = vpow2.f32 %v1347_v28  ;;  %v1334_v53 = vsub.f32 %v4126_v27, %v1325_v52  ;;  %3010 = vmatprep.mubr.msk.f32.mxu1 %vm1230_vm3, %v3295_v50  ;;  %v1357_v54 = vsel %vm1230_vm3, %v3295_v50, 0.0  ;;  %v1743_v11 = vpop.permute.xlu0 %1742  ;;  %v1735_v28 = vld [vmem:[#allocation4 + $0x18] sm:$0xff] }
 0x2c8   : > { %3011 = vmatmul.mubr.msk.f32.vlgmr.msra.gmra.mxu1 %vm1230_vm3, %v3293_v24  ;;  %1358 = vadd.xlane.f32.xlu0 %v1357_v54  ;;  %v1732_v24 = vld [vmem:[#allocation4] sm:$0xff]  ;;  %v1783_v54 = vmul.f32 %v1758_v9, %v1735_v28  ;;  %v1738_v9 = vld [vmem:[#allocation4 + $0x30] sm:$0xff] }
 0x2c9   : > { %v1349_v56 = vmul.f32 1.442695, %v1334_v53  ;;  %1352 = vadd.xlane.f32.xlu1 %v1351_v30  ;;  %3021 = vmatpush3.msra.mxu1 %v872_v22  ;;  %v1386_v22 = vmul.f32 %v4168_v13, %v1378_v3  ;;  %v1388_v13 = vmul.f32 %v4180_v17, %v1380_v38  ;;  %v1780_v26 = vmul.f32 %v1743_v11, %v1732_v24  ;;  %v1734_v53 = vld [vmem:[#allocation4 + $0x10] sm:$0xff] }
 0x2ca   : > { %3022 = vmatprep.subr.mxu1 %v871_v55  ;;  %v1748_v10 = vpop.permute.xlu1 %1747 }
 0x2cb   : > { %3302 = vpow2.f32 %v1349_v56  ;;  %3023 = vmatpush3.msra.mxu1 %v871_v55  ;;  %v1781_v48 = vmul.f32 %v1748_v10, %v1733_v47 }
 0x2cc   : > { %v3297_v57 = vpop.eup %3296  ;;  %3304 = vpow2.f32 %v1283_v2  ;;  %v4222_v58 = vpop.permute.xlu0 %1767 }
 0x2cd   : > { %v1366_v60 = vsel %vm1230_vm3, %v3297_v57, 0.0  ;;  %3306 = vpow2.f32 %v1285_v5  ;;  %v1739_v5 = vld [vmem:[#allocation4 + $0x38] sm:$0xff] }
 0x2ce   : > { %1367 = vadd.xlane.f32.xlu1 %v1366_v60  ;;  %v1753_v51 = vpop.permute.xlu1 %1752 }
 0x2cf   : > { %v1782_v30 = vmul.f32 %v1753_v51, %v1734_v53 }
 0x2d0   : > { %v3299_v27 = vpop.eup %3298 }
 0x2d1   : > { %3017 = vmatprep.mubr.msk.f32.mxu0 %vm1230_vm3, %v3299_v27  ;;  %v1363_v62 = vsel %vm1230_vm3, %v3299_v27, 0.0  ;;  %v1737_v27 = vld [vmem:[#allocation4 + $0x28] sm:$0xff] }
 0x2d2   : > { %1364 = vadd.xlane.f32.xlu0 %v1363_v62  ;;  %3018 = vmatmul.mubr.msk.f32.vlgmr.msra.gmra.mxu0 %vm1230_vm3, %v3297_v57  ;;  %v4225_v15 = vpop.permute.xlu1 %1762  ;;  %v1736_v62 = vld [vmem:[#allocation4 + $0x20] sm:$0xff] }
 0x2d4   : > { %v3301_v63 = vpop.eup %3300 }
 0x2d5   : > { %3024 = vmatprep.mubr.msk.f32.mxu1 %vm1230_vm3, %v3301_v63  ;;  %v1369_v0 = vsel %vm1230_vm3, %v3301_v63, 0.0  ;;  %v1785_v63 = vmul.f32 %v4222_v58, %v1737_v27 }
 0x2d6   : > { %1370 = vadd.xlane.f32.xlu0 %v1369_v0 }
 0x2d8   : > { %v3303_v1 = vpop.eup %3302 }
 0x2d9   : > { %3025 = vmatmul.mubr.msk.f32.vlgmr.msra.gmra.mxu1 %vm1230_vm3, %v3303_v1  ;;  %v1372_v4 = vsel %vm1230_vm3, %v3303_v1, 0.0  ;;  %v3305_v7 = vpop.eup %3304  ;;  %v1784_v1 = vmul.f32 %v4225_v15, %v1736_v62 }
 0x2da   : > { %1373 = vadd.xlane.f32.xlu1 %v1372_v4  ;;  %v3307_v8 = vpop.eup %3306  ;;  %v1389_v43 = vmul.f32 %v3305_v7, %v1381_v14 }
 0x2db   : > { %v1390_v45 = vmul.f32 %v3307_v8, %v1382_v44 }
 0x2eb   : > { %1772 = vperm.xlu1 %3275, %v3305_v7  }
 0x2ec   : > { %1777 = vperm.xlu0 %3274, %v3307_v8  }
 0x349   : > { %v1356_v59 = vpop.xlane.xlu0 %1355 }
 0x34a   : > { %v1392_v6 = vadd.f32 %v1384_v12, %v1356_v59 }
 0x34c   : > { %1401 = vst.msk [vmem:[#allocation3 + $0x8] sm:$0xff] %vm1399_vm4, %v1392_v6 }
 0x34d   : > { %v1362_v25 = vpop.xlane.xlu1 %1361 }
 0x34e   : > { %v1394_v31 = vadd.f32 %v1386_v22, %v1362_v25 }
 0x350   : > { %1403 = vst.msk [vmem:[#allocation3 + $0x18] sm:$0xff] %vm1399_vm4, %v1394_v31 }
 0x351   : > { %v1359_v16 = vpop.xlane.xlu0 %1358 }
 0x352   : > { %v1353_v35 = vpop.xlane.xlu1 %1352  ;;  %v1393_v36 = vadd.f32 %v1385_v33, %v1359_v16 }
 0x353   : > { %v1391_v37 = vadd.f32 %v1383_v34, %v1353_v35 }
 0x354   : > { %1402 = vst.msk [vmem:[#allocation3 + $0x10] sm:$0xff] %vm1399_vm4, %v1393_v36 }
 0x355   : > { %1400 = vst.msk [vmem:[#allocation3] sm:$0xff] %vm1399_vm4, %v1391_v37 }
 0x357   : > { %v1368_v39 = vpop.xlane.xlu1 %1367 }
 0x358   : > { %v1396_v41 = vadd.f32 %v1388_v13, %v1368_v39 }
 0x35a   : > { %1405 = vst.msk [vmem:[#allocation3 + $0x28] sm:$0xff] %vm1399_vm4, %v1396_v41 }
 0x35b   : > { %v1365_v18 = vpop.xlane.xlu0 %1364 }
 0x35c   : > { %v1395_v42 = vadd.f32 %v1387_v20, %v1365_v18 }
 0x35e   : > { %1404 = vst.msk [vmem:[#allocation3 + $0x20] sm:$0xff] %vm1399_vm4, %v1395_v42 }
 0x35f   : > { %v1371_v21 = vpop.xlane.xlu0 %1370 }
 0x360   : > { %v1397_v19 = vadd.f32 %v1389_v43, %v1371_v21 }
 0x362   : > { %1406 = vst.msk [vmem:[#allocation3 + $0x30] sm:$0xff] %vm1399_vm4, %v1397_v19 }
 0x363   : > { %v1374_v17 = vpop.xlane.xlu1 %1373 }
 0x364   : > { %v1398_v46 = vadd.f32 %v1390_v45, %v1374_v17 }
 0x366   : > { %1407 = vst.msk [vmem:[#allocation3 + $0x38] sm:$0xff] %vm1399_vm4, %v1398_v46 }
 0x367   : > { %v1778_v7 = vpop.permute.xlu0 %1777  ;;  %v1773_v10 = vpop.permute.xlu1 %1772 }
 0x368   : > { %v1787_v11 = vmul.f32 %v1778_v7, %v1739_v5  ;;  %v1786_v61 = vmul.f32 %v1773_v10, %v1738_v9 }
 0x382   : > { %v3005_v23 = vpop.f32.mrf.mxu0 }
 0x383   : > { %v1789_v49 = vadd.f32 %v3005_v23, %v1781_v48 }
 0x384   : > { %v1480_v50 = vpop.f32.mrf.mxu0 }
 0x385   : > { %1797 = vst.msk [vmem:[#allocation4 + $0x8] sm:$0xff] %vm873_vm2, %v1789_v49  ;;  %v1788_v52 = vadd.f32 %v1780_v26, %v1480_v50 }
 0x387   : > { %1796 = vst.msk [vmem:[#allocation4] sm:$0xff] %vm873_vm2, %v1788_v52 }
 0x388   : > { %v3012_v55 = vpop.f32.mrf.mxu1 }
 0x389   : > { %v1791_v56 = vadd.f32 %v3012_v55, %v1783_v54 }
 0x38a   : > { %v1561_v57 = vpop.f32.mrf.mxu1 }
 0x38b   : > { %1799 = vst.msk [vmem:[#allocation4 + $0x18] sm:$0xff] %vm873_vm2, %v1791_v56  ;;  %v1790_v60 = vadd.f32 %v1782_v30, %v1561_v57 }
 0x38d   : > { %1798 = vst.msk [vmem:[#allocation4 + $0x10] sm:$0xff] %vm873_vm2, %v1790_v60 }
 0x392   : > { %v3019_v0 = vpop.f32.mrf.mxu0 }
 0x393   : > { %v1793_v2 = vadd.f32 %v3019_v0, %v1785_v63 }
 0x394   : > { %v1642_v4 = vpop.f32.mrf.mxu0 }
 0x395   : > { %1801 = vst.msk [vmem:[#allocation4 + $0x28] sm:$0xff] %vm873_vm2, %v1793_v2  ;;  %v1792_v8 = vadd.f32 %v1784_v1, %v1642_v4 }
 0x397   : > { %1800 = vst.msk [vmem:[#allocation4 + $0x20] sm:$0xff] %vm873_vm2, %v1792_v8 }
 0x399   : > { %v3026_v51 = vpop.f32.mrf.mxu1 }
 0x39a   : > { %v1795_v12 = vadd.f32 %v3026_v51, %v1787_v11  ;;  %1815 = sbr.rel (%p2856_p0) target bundleno = 2302 (0x8fe), region = 120 }
 0x39b   : > { %v1723_v59 = vpop.f32.mrf.mxu1 }
 0x39c   : > { %1803 = vst.msk [vmem:[#allocation4 + $0x38] sm:$0xff] %vm873_vm2, %v1795_v12  ;;  %v1794_v58 = vadd.f32 %v1786_v61, %v1723_v59 }
 0x39e   : > { %1802 = vst.msk [vmem:[#allocation4 + $0x30] sm:$0xff] %vm873_vm2, %v1794_v58 }
 0x39f   : > { %v1818_v15 = vld [vmem:[#allocation3 + $0x10] sm:$0xff]  ;;  %v1816_v3 = vld [vmem:[#allocation3] sm:$0xff]  ;;  %v1819_v6 = vld [vmem:[#allocation3 + $0x18] sm:$0xff]  ;;  %v3627_v22 = vmov 0  }
 0x3a0   : > { %3309 = vset.pattern.permute.xlu1 %v3627_v22  ;;  %3308 = vset.pattern.permute.xlu0 %v3627_v22  ;;  %3310 = vrcp.f32 %v1818_v15  ;;  %v1817_v25 = vld [vmem:[#allocation3 + $0x8] sm:$0xff]  ;;  %v1899_v29 = vld [vmem:[#allocation13 + $0x18] sm:$0xff]  ;;  %v1898_v32 = vld [vmem:[#allocation13 + $0x10] sm:$0xff] }
 0x3a1   : > { %3312 = vrcp.f32 %v1816_v3  ;;  %3027 = vmatprep.subr.mxu0 %v1899_v29  ;;  %v1903_v31 = vld [vmem:[#allocation13 + $0x38] sm:$0xff]  ;;  %v1821_v33 = vld [vmem:[#allocation3 + $0x28] sm:$0xff]  ;;  %v1820_v34 = vld [vmem:[#allocation3 + $0x20] sm:$0xff] }
 0x3a2   : > { %3314 = vrcp.f32 %v1819_v6  ;;  %3028 = vmatpush3.msra.mxu0 %v1899_v29  ;;  %3038 = vmatprep.subr.mxu1 %v1903_v31  ;;  %v1823_v16 = vld [vmem:[#allocation3 + $0x38] sm:$0xff]  ;;  %v1822_v35 = vld [vmem:[#allocation3 + $0x30] sm:$0xff]  ;;  %v1897_v37 = vld [vmem:[#allocation13 + $0x8] sm:$0xff] }
 0x3a3   : > { %3316 = vrcp.f32 %v1817_v25  ;;  %3029 = vmatprep.subr.mxu0 %v1898_v32  ;;  %3039 = vmatpush3.msra.mxu1 %v1903_v31  ;;  %v1902_v36 = vld [vmem:[#allocation13 + $0x30] sm:$0xff]  ;;  %v1901_v38 = vld [vmem:[#allocation13 + $0x28] sm:$0xff]  ;;  %v1896_v39 = vld [vmem:[#allocation13] sm:$0xff] }
 0x3a4   : > { %3030 = vmatpush3.msra.mxu0 %v1898_v32  ;;  %3318 = vrcp.f32 %v1821_v33  ;;  %3040 = vmatprep.subr.mxu1 %v1902_v36  ;;  %v1900_v41 = vld [vmem:[#allocation13 + $0x20] sm:$0xff]  ;;  %v1907_v18 = vld [vmem:[#allocation13 + $0x58] sm:$0xff]  ;;  %v1842_v45 = vld [vmem:[#allocation4 + $0x10] sm:$0xff] }
 0x3a5   : > { %3320 = vrcp.f32 %v1820_v34  ;;  %3031 = vmatprep.subr.mxu0 %v1897_v37  ;;  %3041 = vmatpush3.msra.mxu1 %v1902_v36  ;;  %v1911_v42 = vld [vmem:[#allocation13 + $0x78] sm:$0xff]  ;;  %v1840_v17 = vld [vmem:[#allocation4] sm:$0xff]  ;;  %v1841_v26 = vld [vmem:[#allocation4 + $0x8] sm:$0xff] }
 0x3a6   : > { %3322 = vrcp.f32 %v1823_v16  ;;  %3032 = vmatpush3.msra.mxu0 %v1897_v37  ;;  %3042 = vmatprep.subr.mxu1 %v1901_v38  ;;  %v1843_v23 = vld [vmem:[#allocation4 + $0x18] sm:$0xff]  ;;  %v1910_v53 = vld [vmem:[#allocation13 + $0x70] sm:$0xff]  ;;  %v1844_v55 = vld [vmem:[#allocation4 + $0x20] sm:$0xff] }
 0x3a7   : > { %3324 = vrcp.f32 %v1822_v35  ;;  %3033 = vmatprep.subr.mxu0 %v1896_v39  ;;  %3043 = vmatpush3.msra.mxu1 %v1901_v38  ;;  %v1906_v54 = vld [vmem:[#allocation13 + $0x50] sm:$0xff]  ;;  %v1909_v56 = vld [vmem:[#allocation13 + $0x68] sm:$0xff]  ;;  %v1847_v63 = vld [vmem:[#allocation4 + $0x38] sm:$0xff] }
 0x3a8   : > { %3034 = vmatpush3.msra.mxu0 %v1896_v39  ;;  %3044 = vmatprep.subr.mxu1 %v1900_v41  ;;  %v1905_v60 = vld [vmem:[#allocation13 + $0x48] sm:$0xff]  ;;  %v1904_v0 = vld [vmem:[#allocation13 + $0x40] sm:$0xff]  ;;  %v1846_v1 = vld [vmem:[#allocation4 + $0x30] sm:$0xff] }
 0x3a9   : > { %3045 = vmatpush3.msra.mxu1 %v1900_v41  ;;  %3049 = vmatprep.subr.mxu0 %v1907_v18  ;;  %v1845_v27 = vld [vmem:[#allocation4 + $0x28] sm:$0xff]  ;;  %v1908_v2 = vld [vmem:[#allocation13 + $0x60] sm:$0xff]  ;;  %v2327_v38 = vld [vmem:[#allocation14 + $0xf8] sm:$0xff] }
 0x3aa   : > { %3060 = vmatprep.subr.mxu1 %v1911_v42  ;;  %v2865_v22 = vld [vmem:[%s4462_s9] ss:$0 sm:$0xff]  ;;  %v2252_v32 = vld [vmem:[%s4006_s5 + $0x8] sm:$0xff] }
 0x3ab   : > { %v2251_v16 = vld [vmem:[%s4006_s5] sm:$0xff]  ;;  %v2325_v39 = vld [vmem:[#allocation14 + $0xe8] sm:$0xff]  ;;  %v2323_v41 = vld [vmem:[#allocation14 + $0xd8] sm:$0xff] }
 0x3ad   : > { %v3311_v13 = vpop.eup %3310 }
 0x3ae   : > { %v3313_v40 = vpop.eup %3312  ;;  %1860 = vperm.xlu1 %3309, %v3311_v13   ;;  %v2326_v13 = vld [vmem:[#allocation14 + $0xf0] sm:$0xff] }
 0x3af   : > { %v3315_v20 = vpop.eup %3314  ;;  %1850 = vperm.xlu0 %3308, %v3313_v40   ;;  %v2324_v40 = vld [vmem:[#allocation14 + $0xe0] sm:$0xff] }
 0x3b0   : > { %v3317_v14 = vpop.eup %3316 }
 0x3b1   : > { %v3319_v43 = vpop.eup %3318 }
 0x3b2   : > { %1865 = vperm.xlu1 %3309, %v3315_v20   ;;  %v3321_v21 = vpop.eup %3320  ;;  %v2322_v20 = vld [vmem:[#allocation14 + $0xd0] sm:$0xff] }
 0x3b3   : > { %1855 = vperm.xlu0 %3308, %v3317_v14   ;;  %v3323_v44 = vpop.eup %3322  ;;  %v2320_v14 = vld [vmem:[#allocation14 + $0xc0] sm:$0xff] }
 0x3b4   : > { %v3325_v19 = vpop.eup %3324 }
 0x3b6   : > { %1875 = vperm.xlu1 %3309, %v3319_v43  }
 0x3b7   : > { %1870 = vperm.xlu0 %3308, %v3321_v21  }
 0x3ba   : > { %1885 = vperm.xlu1 %3309, %v3323_v44  }
 0x3bb   : > { %1880 = vperm.xlu0 %3308, %v3325_v19  }
 0x429   : > { %v1861_v46 = vpop.permute.xlu1 %1860 }
 0x42a   : > { %v1851_v47 = vpop.permute.xlu0 %1850  ;;  %v1890_v24 = vmul.f32 %v1861_v46, %v1842_v45 }
 0x42b   : > { %v1888_v48 = vmul.f32 %v1851_v47, %v1840_v17  ;;  %v2319_v47 = vld [vmem:[#allocation14 + $0xb8] sm:$0xff] }
 0x42c   : > { %3046 = vmatprep.mubr.msk.f32.mxu1 %vm873_vm2, %v1890_v24  ;;  %v2318_v24 = vld [vmem:[#allocation14 + $0xb0] sm:$0xff] }
 0x42d   : > { %3035 = vmatprep.mubr.msk.f32.mxu0 %vm873_vm2, %v1888_v48  ;;  %v1866_v49 = vpop.permute.xlu1 %1865  ;;  %v2317_v48 = vld [vmem:[#allocation14 + $0xa8] sm:$0xff] }
 0x42e   : > { %v1891_v28 = vmul.f32 %v1866_v49, %v1843_v23  ;;  %v1856_v50 = vpop.permute.xlu0 %1855  ;;  %v2316_v23 = vld [vmem:[#allocation14 + $0xa0] sm:$0xff]  ;;  %v2314_v49 = vld [vmem:[#allocation14 + $0x90] sm:$0xff] }
 0x42f   : > { %v1889_v52 = vmul.f32 %v1856_v50, %v1841_v26  ;;  %v2315_v26 = vld [vmem:[#allocation14 + $0x98] sm:$0xff]  ;;  %v2312_v50 = vld [vmem:[#allocation14 + $0x80] sm:$0xff] }
 0x430   : > { %3047 = vmatmul.mubr.msk.f32.vlgmr.msra.gmra.mxu1 %vm873_vm2, %v1891_v28  ;;  %v2313_v28 = vld [vmem:[#allocation14 + $0x88] sm:$0xff] }
 0x431   : > { %3036 = vmatmul.mubr.msk.f32.vlgmr.msra.gmra.mxu0 %vm873_vm2, %v1889_v52  ;;  %v1876_v30 = vpop.permute.xlu1 %1875  ;;  %3061 = vmatpush3.msra.mxu1 %v1911_v42  ;;  %v2311_v52 = vld [vmem:[#allocation14 + $0x78] sm:$0xff] }
 0x432   : > { %3050 = vmatpush3.msra.mxu0 %v1907_v18  ;;  %v1871_v57 = vpop.permute.xlu0 %1870  ;;  %3062 = vmatprep.subr.mxu1 %v1910_v53  ;;  %v1893_v8 = vmul.f32 %v1876_v30, %v1845_v27  ;;  %v2321_v18 = vld [vmem:[#allocation14 + $0xc8] sm:$0xff]  ;;  %v2307_v30 = vld [vmem:[#allocation14 + $0x58] sm:$0xff]  ;;  %v2304_v27 = vld [vmem:[#allocation14 + $0x40] sm:$0xff] }
 0x433   : > { %3051 = vmatprep.subr.mxu0 %v1906_v54  ;;  %v1892_v62 = vmul.f32 %v1871_v57, %v1844_v55  ;;  %3063 = vmatpush3.msra.mxu1 %v1910_v53  ;;  %v2310_v53 = vld [vmem:[#allocation14 + $0x70] sm:$0xff]  ;;  %v2308_v55 = vld [vmem:[#allocation14 + $0x60] sm:$0xff] }
 0x434   : > { %3052 = vmatpush3.msra.mxu0 %v1906_v54  ;;  %3064 = vmatprep.subr.mxu1 %v1909_v56  ;;  %v2309_v54 = vld [vmem:[#allocation14 + $0x68] sm:$0xff]  ;;  %v2306_v57 = vld [vmem:[#allocation14 + $0x50] sm:$0xff] }
 0x435   : > { %3053 = vmatprep.subr.mxu0 %v1905_v60  ;;  %3057 = vmatprep.mubr.msk.f32.mxu0 %vm873_vm2, %v1892_v62  ;;  %v1886_v4 = vpop.permute.xlu1 %1885  ;;  %v2303_v62 = vld [vmem:[#allocation14 + $0x38] sm:$0xff] }
 0x436   : > { %3054 = vmatpush3.msra.mxu0 %v1905_v60  ;;  %v1895_v5 = vmul.f32 %v1886_v4, %v1847_v63  ;;  %v1881_v7 = vpop.permute.xlu0 %1880  ;;  %3065 = vmatpush3.msra.mxu1 %v1909_v56  ;;  %v3628_v56 = vmov 0.0   ;;  %v2305_v60 = vld [vmem:[#allocation14 + $0x48] sm:$0xff]  ;;  %v2302_v63 = vld [vmem:[#allocation14 + $0x30] sm:$0xff] }
 0x437   : > { %3055 = vmatprep.subr.mxu0 %v1904_v0  ;;  %v1894_v9 = vmul.f32 %v1881_v7, %v1846_v1  ;;  %3066 = vmatprep.subr.mxu1 %v1908_v2  ;;  %v2300_v1 = vld [vmem:[#allocation14 + $0x20] sm:$0xff]  ;;  %v2298_v4 = vld [vmem:[#allocation14 + $0x10] sm:$0xff] }
 0x438   : > { %3056 = vmatpush3.msra.mxu0 %v1904_v0  ;;  %3067 = vmatpush3.msra.mxu1 %v1908_v2  ;;  %v2301_v0 = vld [vmem:[#allocation14 + $0x28] sm:$0xff]  ;;  %v2299_v2 = vld [vmem:[#allocation14 + $0x18] sm:$0xff]  ;;  %v2296_v7 = vld [vmem:[#allocation14] sm:$0xff] }
 0x439   : > { %3058 = vmatmul.mubr.msk.f32.vlgmr.msra.gmra.mxu0 %vm873_vm2, %v1893_v8  ;;  %3068 = vmatprep.mubr.msk.f32.mxu1 %vm873_vm2, %v1894_v9  ;;  %v2452_v8 = vld [vmem:[#allocation16 + $0xf8] sm:$0xff] }
 0x43a   : > { %3069 = vmatmul.mubr.msk.f32.vlgmr.msra.gmra.mxu1 %vm873_vm2, %v1895_v5  ;;  %2340 = vmatprep.subr.mxu0 %v2327_v38  ;;  %v2297_v5 = vld [vmem:[#allocation14 + $0x8] sm:$0xff]  ;;  %v2436_v9 = vld [vmem:[#allocation16 + $0x78] sm:$0xff]  ;;  %v2425_v38 = vld [vmem:[#allocation16 + $0x20] sm:$0xff] }
 0x43b   : > { %2341 = vmatpush1.msra.mxu0 %v2326_v13  ;;  %2404 = vmatprep.mubr.f32.mxu0 %v3628_v56 }
 0x43c   : > { %2342 = vmatprep.subr.mxu0 %v2325_v39  ;;  %2933 = vmatprep.subr.mxu1 %v2452_v8 }
 0x43d   : > { %2343 = vmatpush1.msra.mxu0 %v2324_v40  ;;  %2934 = vmatpush3.msra.mxu1 %v2436_v9 }
 0x43e   : > { %2344 = vmatprep.subr.mxu0 %v2323_v41 }
 0x43f   : > { %2345 = vmatpush1.msra.mxu0 %v2322_v20 }
 0x440   : > { %2346 = vmatprep.subr.mxu0 %v2321_v18 }
 0x441   : > { %2347 = vmatpush1.msra.mxu0 %v2320_v14 }
 0x442   : > { %2348 = vmatprep.subr.mxu0 %v2319_v47 }
 0x443   : > { %2349 = vmatpush1.msra.mxu0 %v2318_v24 }
 0x444   : > { %2350 = vmatprep.subr.mxu0 %v2317_v48 }
 0x445   : > { %2351 = vmatpush1.msra.mxu0 %v2316_v23  ;;  %v2440_v23 = vld [vmem:[#allocation16 + $0x98] sm:$0xff] }
 0x446   : > { %2352 = vmatprep.subr.mxu0 %v2315_v26  ;;  %v2424_v26 = vld [vmem:[#allocation16 + $0x18] sm:$0xff] }
 0x447   : > { %2353 = vmatpush1.msra.mxu0 %v2314_v49  ;;  %v2423_v49 = vld [vmem:[#allocation16 + $0x10] sm:$0xff] }
 0x448   : > { %2354 = vmatprep.subr.mxu0 %v2313_v28  ;;  %v2438_v28 = vld [vmem:[#allocation16 + $0x88] sm:$0xff] }
 0x449   : > { %2355 = vmatpush1.msra.mxu0 %v2312_v50  ;;  %v2422_v50 = vld [vmem:[#allocation16 + $0x8] sm:$0xff] }
 0x44a   : > { %2356 = vmatprep.subr.mxu0 %v2311_v52  ;;  %v2437_v52 = vld [vmem:[#allocation16 + $0x80] sm:$0xff] }
 0x44b   : > { %2357 = vmatpush1.msra.mxu0 %v2310_v53  ;;  %v2330_v53 = vlaneseq }
 0x44c   : > { %2358 = vmatprep.subr.mxu0 %v2309_v54 }
 0x44d   : > { %2359 = vmatpush1.msra.mxu0 %v2308_v55  ;;  %v2331_v54 = vshrl.u32 %v2330_v53, 7 }
 0x44e   : > { %2360 = vmatprep.subr.mxu0 %v2307_v30  ;;  %v2328_v30 = vld [vmem:[%s4465_s26] sm:$0x3] }
 0x44f   : > { %2361 = vmatpush1.msra.mxu0 %v2306_v57  ;;  %v2332_v55 = vsub.s32 0, %v2331_v54 }
 0x450   : > { %2362 = vmatprep.subr.mxu0 %v2305_v60 }
 0x451   : > { %2363 = vmatpush1.msra.mxu0 %v2304_v27  ;;  %v2333_v57 = vrot.slane %v2328_v30, %v2332_v55 }
 0x452   : > { %2364 = vmatprep.subr.mxu0 %v2303_v62 }
 0x453   : > { %2365 = vmatpush1.msra.mxu0 %v2302_v63 }
 0x454   : > { %2366 = vmatprep.subr.mxu0 %v2301_v0 }
 0x455   : > { %2367 = vmatpush1.msra.mxu0 %v2300_v1 }
 0x456   : > { %2368 = vmatprep.subr.mxu0 %v2299_v2 }
 0x457   : > { %2369 = vmatpush1.msra.mxu0 %v2298_v4 }
 0x458   : > { %2370 = vmatprep.subr.mxu0 %v2297_v5 }
 0x459   : > { %2371 = vmatpush1.msra.mxu0 %v2296_v7 }
 0x4f0   : > { %v3048_v11 = vpop.f32.mrf.mxu1 }
 0x4f1   : > { %v3037_v10 = vpop.f32.mrf.mxu0 }
 0x4f2   : > { %v2065_v61 = vpop.f32.mrf.mxu1  ;;  %v2239_v12 = vadd.f32 %v3048_v11, %v3037_v10  ;;  %v2451_v10 = vld [vmem:[#allocation16 + $0xf0] sm:$0xff] }
 0x4f3   : > { %v1984_v51 = vpop.f32.mrf.mxu0  ;;  %v2435_v11 = vld [vmem:[#allocation16 + $0x70] sm:$0xff]  ;;  %2935 = vmatprep.subr.mxu1 %v2451_v10 }
 0x4f4   : > { %v2236_v58 = vadd.f32 %v2065_v61, %v1984_v51  ;;  %v2450_v51 = vld [vmem:[#allocation16 + $0xe8] sm:$0xff]  ;;  %2936 = vmatpush3.msra.mxu1 %v2435_v11 }
 0x4f5   : > { %v2434_v61 = vld [vmem:[#allocation16 + $0x68] sm:$0xff]  ;;  %2937 = vmatprep.subr.mxu1 %v2450_v51  ;;  %v2868_v51 = vld [vmem:[%s4466_s18] ss:$0 sm:$0xff] }
 0x4f6   : > { %2938 = vmatpush3.msra.mxu1 %v2434_v61 }
 0x4f9   : > { %v3059_v59 = vpop.f32.mrf.mxu0 }
 0x4fa   : > { %v2240_v15 = vadd.f32 %v3059_v59, %v2239_v12  ;;  %v3070_v3 = vpop.f32.mrf.mxu1  ;;  %v2449_v12 = vld [vmem:[#allocation16 + $0xe0] sm:$0xff] }
 0x4fb   : > { %v2146_v6 = vpop.f32.mrf.mxu0  ;;  %v2433_v59 = vld [vmem:[#allocation16 + $0x60] sm:$0xff]  ;;  %2939 = vmatprep.subr.mxu1 %v2449_v12 }
 0x4fc   : > { %v2237_v25 = vadd.f32 %v2236_v58, %v2146_v6  ;;  %v2241_v29 = vadd.f32 %v3070_v3, %v2240_v15  ;;  %v2227_v31 = vpop.f32.mrf.mxu1  ;;  %v2448_v58 = vld [vmem:[#allocation16 + $0xd8] sm:$0xff]  ;;  %2940 = vmatpush3.msra.mxu1 %v2433_v59  ;;  %v2447_v3 = vld [vmem:[#allocation16 + $0xd0] sm:$0xff] }
 0x4fd   : > { %v2432_v15 = vld [vmem:[#allocation16 + $0x58] sm:$0xff]  ;;  %2941 = vmatprep.subr.mxu1 %v2448_v58  ;;  %v2431_v6 = vld [vmem:[#allocation16 + $0x50] sm:$0xff] }
 0x4fe   : > { %v2250_v33 = vadd.f32 %v2865_v22, %v2241_v29  ;;  %v2238_v34 = vadd.f32 %v2237_v25, %v2227_v31  ;;  %2942 = vmatpush3.msra.mxu1 %v2432_v15  ;;  %v2430_v25 = vld [vmem:[#allocation16 + $0x48] sm:$0xff]  ;;  %v2445_v29 = vld [vmem:[#allocation16 + $0xc0] sm:$0xff] }
 0x4ff   : > { %2943 = vmatprep.subr.mxu1 %v2447_v3  ;;  %v2429_v31 = vld [vmem:[#allocation16 + $0x40] sm:$0xff] }
 0x500   : > { %v2249_v35 = vadd.f32 %v2865_v22, %v2238_v34  ;;  %v2254_v36 = vadd.f32 %v2252_v32, %v2250_v33  ;;  %v2446_v22 = vld [vmem:[#allocation16 + $0xc8] sm:$0xff]  ;;  %2944 = vmatpush3.msra.mxu1 %v2431_v6  ;;  %v2444_v32 = vld [vmem:[#allocation16 + $0xb8] sm:$0xff]  ;;  %v2443_v34 = vld [vmem:[#allocation16 + $0xb0] sm:$0xff] }
 0x501   : > { %2945 = vmatprep.subr.mxu1 %v2446_v22  ;;  %v2428_v33 = vld [vmem:[#allocation16 + $0x38] sm:$0xff] }
 0x502   : > { %2259 = vadd.xlane.f32.xlu1 %v2254_v36  ;;  %v2253_v37 = vadd.f32 %v2251_v16, %v2249_v35  ;;  %2946 = vmatpush3.msra.mxu1 %v2430_v25  ;;  %v2427_v16 = vld [vmem:[#allocation16 + $0x30] sm:$0xff]  ;;  %v2442_v35 = vld [vmem:[#allocation16 + $0xa8] sm:$0xff] }
 0x503   : > { %2947 = vmatprep.subr.mxu1 %v2445_v29 }
 0x504   : > { %2257 = vadd.xlane.f32.xlu0 %v2253_v37  ;;  %2948 = vmatpush3.msra.mxu1 %v2429_v31 }
 0x505   : > { %2949 = vmatprep.subr.mxu1 %v2444_v32 }
 0x506   : > { %2950 = vmatpush3.msra.mxu1 %v2428_v33 }
 0x507   : > { %2951 = vmatprep.subr.mxu1 %v2443_v34 }
 0x508   : > { %2952 = vmatpush3.msra.mxu1 %v2427_v16 }
 0x509   : > { %2953 = vmatprep.subr.mxu1 %v2442_v35 }
 0x58b   : > { %v2260_v42 = vpop.xlane.xlu1 %2259 }
 0x58c   : > { %v2263_v21 = vmul.f32 0.0078125, %v2260_v42  ;;  %v2866_v42 = vld [vmem:[%s4463_s19] ss:$0 sm:$0xff] }
 0x58d   : > { %v2258_v43 = vpop.xlane.xlu0 %2257 }
 0x58e   : > { %v2262_v44 = vmul.f32 0.0078125, %v2258_v43  ;;  %v4266_v45 = vsub.f32 %v2254_v36, %v2263_v21  ;;  %v2426_v36 = vld [vmem:[#allocation16 + $0x28] sm:$0xff]  ;;  %v2867_v21 = vld [vmem:[%s4464_s7] ss:$0 sm:$0xff] }
 0x58f   : > { %2954 = vmatpush3.msra.mxu1 %v2426_v36 }
 0x590   : > { %v4264_v19 = vsub.f32 %v2253_v37, %v2262_v44  ;;  %v2267_v46 = vmul.f32 %v4266_v45, %v4266_v45  ;;  %v2441_v37 = vld [vmem:[#allocation16 + $0xa0] sm:$0xff] }
 0x591   : > { %2955 = vmatprep.subr.mxu1 %v2441_v37 }
 0x592   : > { %v2266_v17 = vmul.f32 %v4264_v19, %v4264_v19  ;;  %2956 = vmatpush3.msra.mxu1 %v2425_v38 }
 0x593   : > { %2957 = vmatprep.subr.mxu1 %v2440_v23 }
 0x594   : > { %2268 = vadd.xlane.f32.xlu0 %v2266_v17  ;;  %2958 = vmatpush3.msra.mxu1 %v2424_v26 }
 0x598   : > { %2270 = vadd.xlane.f32.xlu0 %v2267_v46 }
 0x61d   : > { %v2269_v13 = vpop.xlane.xlu0 %2268 }
 0x61e   : > { %v2272_v39 = vmul.f32 0.0078125, %v2269_v13 }
 0x620   : > { %v2274_v40 = vadd.f32 1e-05, %v2272_v39 }
 0x621   : > { %v2271_v41 = vpop.xlane.xlu0 %2270 }
 0x622   : > { %3326 = vrsqrt.f32 %v2274_v40  ;;  %v2273_v20 = vmul.f32 0.0078125, %v2271_v41 }
 0x624   : > { %v2275_v18 = vadd.f32 1e-05, %v2273_v20 }
 0x626   : > { %3328 = vrsqrt.f32 %v2275_v18  ;;  %v2869_v18 = vld [vmem:[%s4467_s22] ss:$0 sm:$0xff] }
 0x62f   : > { %v3327_v14 = vpop.eup %3326 }
 0x630   : > { %v2278_v43 = vmul.f32 %v3327_v14, %v4264_v19  ;;  %v2439_v19 = vld [vmem:[#allocation16 + $0x90] sm:$0xff] }
 0x631   : > { %2959 = vmatprep.subr.mxu1 %v2439_v19 }
 0x632   : > { %v2286_v44 = vmul.f32 %v2866_v42, %v2278_v43  ;;  %2960 = vmatpush3.msra.mxu1 %v2423_v49 }
 0x633   : > { %v3329_v17 = vpop.eup %3328  ;;  %2961 = vmatprep.subr.mxu1 %v2438_v28 }
 0x634   : > { %v2294_v46 = vadd.f32 %v2867_v21, %v2286_v44  ;;  %v2279_v47 = vmul.f32 %v3329_v17, %v4266_v45  ;;  %2962 = vmatpush3.msra.mxu1 %v2422_v50  ;;  %v2421_v45 = vld [vmem:[#allocation16] sm:$0xff] }
 0x635   : > { %2963 = vmatprep.subr.mxu1 %v2437_v52 }
 0x636   : > { %2405 = vmatmul.mubr.f32.vlgmr.msra.gmra.mxu0 %v2294_v46  ;;  %v2287_v24 = vmul.f32 %v2866_v42, %v2279_v47  ;;  %2964 = vmatpush3.msra.mxu1 %v2421_v45  ;;  %v2870_v42 = vld [vmem:[%s4468_s8] ss:$0 sm:$0xff] }
 0x637   : > { %2410 = vmatprep.mubr.f32.mxu0 %v3628_v56  ;;  %v2336_v56 = vsub.s32 1, %v2331_v54 }
 0x638   : > { %v2295_v48 = vadd.f32 %v2867_v21, %v2287_v24 }
 0x639   : > { %v2337_v60 = vrot.slane %v2328_v30, %v2336_v56 }
 0x63a   : > { %2411 = vmatmul.mubr.f32.gmra.mxu0 %v2295_v48 }
 0x6f6   : > { %v2406_v27 = vpop.f32.mrf.mxu0 }
 0x6f7   : > { %v2407_v62 = vadd.f32 %v2406_v27, %v2333_v57 }
 0x6f8   : > { %v2408_v63 = vpop.f32.mrf.mxu0 }
 0x6f9   : > { %v2409_v0 = vadd.f32 %v2408_v63, %v2337_v60  ;;  %v2417_v4 = vmax.f32 %v2407_v62, 0.0 }
 0x6fa   : > { %v2412_v1 = vpop.f32.mrf.mxu0 }
 0x6fb   : > { %v2418_v2 = vmax.f32 %v2409_v0, 0.0  ;;  %v2413_v5 = vadd.f32 %v2412_v1, %v2333_v57 }
 0x6fc   : > { %v2414_v7 = vpop.f32.mrf.mxu0 }
 0x6fd   : > { %v2415_v8 = vadd.f32 %v2414_v7, %v2337_v60  ;;  %2524 = vmatprep.mubr.f32.mxu1 %v2418_v2  ;;  %v2419_v10 = vmax.f32 %v2413_v5, 0.0 }
 0x6fe   : > { %2525 = vmatmul.mubr.f32.vlgmr.msra.gmra.mxu1 %v2417_v4 }
 0x6ff   : > { %v2420_v9 = vmax.f32 %v2415_v8, 0.0 }
 0x701   : > { %2529 = vmatprep.mubr.f32.mxu1 %v2420_v9 }
 0x702   : > { %2530 = vmatmul.mubr.f32.gmra.mxu1 %v2419_v10 }
 0x7be   : > { %v2965_v11 = vpop.f32.mrf.mxu1 }
 0x7c0   : > { %v2966_v61 = vpop.f32.mrf.mxu1 }
 0x7c1   : > { %v2967_v12 = vadd.f32 %v2966_v61, %v2965_v11 }
 0x7c2   : > { %v2968_v59 = vpop.f32.mrf.mxu1 }
 0x7c3   : > { %v2527_v58 = vadd.f32 %v2967_v12, %v2868_v51 }
 0x7c4   : > { %v2969_v15 = vpop.f32.mrf.mxu1 }
 0x7c5   : > { %v2970_v3 = vadd.f32 %v2969_v15, %v2968_v59  ;;  %v2535_v6 = vadd.f32 %v2527_v58, %v2294_v46 }
 0x7c7   : > { %v2532_v22 = vadd.f32 %v2970_v3, %v2868_v51  ;;  %2539 = vadd.xlane.f32.xlu1 %v2535_v6 }
 0x7c9   : > { %v2536_v25 = vadd.f32 %v2532_v22, %v2295_v48 }
 0x7cb   : > { %2541 = vadd.xlane.f32.xlu0 %v2536_v25 }
 0x850   : > { %v2540_v29 = vpop.xlane.xlu1 %2539 }
 0x851   : > { %v2543_v31 = vmul.f32 0.0078125, %v2540_v29 }
 0x853   : > { %v2545_v32 = vsub.f32 %v2535_v6, %v2543_v31 }
 0x854   : > { %v2542_v33 = vpop.xlane.xlu0 %2541 }
 0x855   : > { %v2544_v34 = vmul.f32 0.0078125, %v2542_v33  ;;  %v2547_v16 = vmul.f32 %v2545_v32, %v2545_v32 }
 0x857   : > { %v2546_v35 = vsub.f32 %v2536_v25, %v2544_v34  ;;  %2549 = vadd.xlane.f32.xlu1 %v2547_v16 }
 0x859   : > { %v2548_v36 = vmul.f32 %v2546_v35, %v2546_v35 }
 0x85b   : > { %2551 = vadd.xlane.f32.xlu0 %v2548_v36 }
 0x8e0   : > { %v2550_v37 = vpop.xlane.xlu1 %2549 }
 0x8e1   : > { %v2553_v38 = vmul.f32 0.0078125, %v2550_v37 }
 0x8e3   : > { %v2555_v13 = vadd.f32 1e-05, %v2553_v38 }
 0x8e4   : > { %v2552_v39 = vpop.xlane.xlu0 %2551 }
 0x8e5   : > { %3330 = vrsqrt.f32 %v2555_v13  ;;  %v2554_v40 = vmul.f32 0.0078125, %v2552_v39 }
 0x8e7   : > { %v2556_v41 = vadd.f32 1e-05, %v2554_v40 }
 0x8e9   : > { %3332 = vrsqrt.f32 %v2556_v41 }
 0x8f2   : > { %v3331_v20 = vpop.eup %3330 }
 0x8f3   : > { %v2559_v14 = vmul.f32 %v3331_v20, %v2545_v32 }
 0x8f5   : > { %v2567_v43 = vmul.f32 %v2869_v18, %v2559_v14 }
 0x8f6   : > { %v3333_v21 = vpop.eup %3332 }
 0x8f7   : > { %v2575_v44 = vadd.f32 %v2870_v42, %v2567_v43  ;;  %v2560_v17 = vmul.f32 %v3333_v21, %v2546_v35 }
 0x8f9   : > { %2577 = vst [vmem:[%s4041_s13] sm:$0xff] %v2575_v44  ;;  %v2568_v46 = vmul.f32 %v2869_v18, %v2560_v17 }
 0x8fb   : > { %v2576_v47 = vadd.f32 %v2870_v42, %v2568_v46 }
 0x8fd   : > { %2578 = vst [vmem:[%s4041_s13 + $0x8] sm:$0xff] %v2576_v47 }
 0x8fe PF: > { %s4469_s6 = sld [smem:[#allocation38_spill]]  ;;  %s2595_s5 = sshll.u32 %s4041_s13, 4  ;;  %s4299_s5 = int_to_ptr.vmem [resolvable:$true] %s2595_s5 }
 0x8ff   : > { %s4470_s9 = sld [smem:[#allocation39_spill]]  ;;  %s2580_s18 = scalar_lea.sflag [#allocation7], %s4002_s11 }
 0x900   : > { %s4471_s12 = sld [smem:[#allocation44_spill]]  ;;  %s3438_s27 = scalar_lea.vmem %s4299_s5, 256 }
 0x901   : > { %s4472_s26 = sld [smem:[#allocation59_spill]]  ;;  %p3439_p3 = scmp.ne.s32.totalorder %s4299_s5, %s3438_s27 }
 0x902   : > { %s3629_s10 = smov [#allocation17]  }
 0x903   : > { %s3442_s13 = sshll.u32 %s3629_s10, 4  ;;  %s3443_s13 = int_to_ptr.vmem [resolvable:$false] %s3442_s13 }
 0x904   : > { %s2872_s25 = sshll.u32 %s4469_s6, 1  ;;  %s3444_s22 = scalar_lea.vmem %s3443_s13, 512 }
 0x905   : > { %s2873_s19 = sshll.u32 %s4470_s9, 2  ;;  %p3445_p1 = scmp.lt.s32.totalorder %s4299_s5, %s3443_s13 }
 0x906   : > { %s2592_s20 = sadd.s32 %s2873_s19, %s2872_s25  ;;  %p4474_p4 = scmp.ne.s32.totalorder %s4471_s12, 0 }
 0x907   : > { %s2874_s7 = sshll.u32 %s2592_s20, 7  ;;  %s4473_s4 = smov %s4472_s26 }
 0x908   : > { %s4304_s23 = scalar_lea.hbm %s4472_s26, %s2874_s7  ;;  %p3440_p2 = pnand %p3439_p3, %p4474_p4 }
 0x909   : > { %p3446_p13 = scmp.lt.s32.totalorder %s3444_s22, %s3438_s27 }
 0x90a   : > { %p3441_p10 = pneg %p3440_p2 }
 0x90b   : > { %p3447_p6 = por %p3446_p13, %p3445_p1 }
 0x90d   : > { %p3448_p11 = pnand %p3447_p6, %p3441_p10 }
 0x90f   : > { %3451 = shalt.err (!%p3448_p11)
}
 0x910   : > { %s3452_s16 = scalar_lea.hbm %s4304_s23, 256  ;;  %s3456_s6 = scalar_lea.hbm %s4473_s4, 1024 }
 0x911   : > { %p3453_p12 = scmp.ne.s32.totalorder %s4304_s23, %s3452_s16  ;;  %p3457_p7 = scmp.lt.s32.totalorder %s4304_s23, %s4473_s4 }
 0x912   : > { %p3458_p5 = scmp.lt.s32.totalorder %s3456_s6, %s3452_s16 }
 0x913   : > { %p3454_p9 = pnand %p3453_p12, %p4474_p4 }
 0x914   : > { %p3459_p0 = por %p3458_p5, %p3457_p7 }
 0x915   : > { %p3455_p8 = pneg %p3454_p9 }
 0x917   : > { %p3460_p3 = pnand %p3459_p0, %p3455_p8 }
 0x919   : > { %3463 = shalt.err (!%p3460_p3)
}
 0x91a   : > { %s3630_s19 = smov 128   ;;  %s3631_s20 = smov 8  }
 0x91b   : > { %3113 = dma.vmem_to_hbm [thread:$0]  (%p4474_p4), %s4299_s5, 256, %s4304_s23, %s2580_s18, %s3630_s19, %s3630_s19, %s3631_s20  }
 0x91c PF: > { %s4475_s7 = sld [smem:[#allocation35_spill]]  ;;  %p3135_p2 = scmp.ge.s32.totalorder %s3594_s0, 2 }
 0x91d   : > { %s4476_s24 = sld [smem:[#allocation47_spill]] }
 0x922   : > { %s2610_s21 = sand.u32 1, %s4475_s7  }
 0x923   : > { %p4477_p10 = scmp.ne.s32.totalorder %s4476_s24, 0  ;;  %s2611_s26 = scalar_lea.sflag [#allocation7], %s2610_s21 }
 0x925   : > { %p3126_p1 = pnand %p3135_p2, %p4477_p10 }
 0x927   : > { %p3127_p13 = pneg %p3126_p1 }
 0x929   : > { %3541 = dma.done.wait (%p3127_p13), %s2611_s26, 256  }
 0x92a   : > { %3543 = vsyncadd (%p3127_p13), %s2611_s26, 4294967040  ;;  %s39_s0 = sadd.s32 1, %s3594_s0   ;;  %s4479_s21 = sld [smem:[#allocation34_spill]] }
 0x92b   : > { %p4334_p6 = scmp.ge.s32.totalorder %s39_s0, 10   ;;  %s4480_s11 = sld [smem:[#allocation46_spill]] }
 0x92c   : > { %s4481_s12 = sld [smem:[#allocation36_spill]]  ;;  %s4487_s22 = smov %s3554_s14 }
 0x92d   : > { %s4482_s24 = sld [smem:[#allocation45_spill]]  ;;  %s4489_s23 = smov %s3562_s15 }
 0x92e   : > { %s4483_s5 = sld [smem:[#allocation40_spill]]  ;;  %s4491_s25 = smov %s3582_s28 }
 0x92f   : > { %s4484_s18 = sld [smem:[#allocation41_spill]]  ;;  %s4492_s26 = smov %s3586_s29 }
 0x930   : > { %s4485_s10 = sld [smem:[#allocation42_spill]]  ;;  %s4493_s27 = smov %s3590_s30 }
 0x931   : > { %s4488_s14 = smov %s4480_s11 }
 0x932   : > { %s4490_s15 = smov %s4481_s12  ;;  %38 = sbr.rel (!%p4334_p6) target bundleno = 28 (0x1c), region = 201 }
 0x934   : > { %s4494_s28 = smov %s4483_s5 }
 0x935   : > { %s4495_s29 = smov %s4484_s18 }
 0x936   : > { %s4496_s30 = smov %s4485_s10 }
 0x937   :  { %2616 = vsyncpa [#allocation6], 1 }
 0x938   :  { %2618 = vsyncpa [#allocation6 + $0x1], 1 }
 0x939   :  { %2619 = vsyncpa [#allocation9], 1 }
 0x93a   :  { %2621 = vsyncpa [#allocation9 + $0x1], 1 }
 0x93b   :  { %2622 = vsyncpa [#allocation12], 1 }
 0x93c   :  { %2624 = vsyncpa [#allocation12 + $0x1], 1 }
 0x93d   :  { %2625 = vsyncpa [#allocation15], 1 }
 0x93e   :  { %2626 = vsyncpa [#allocation7], 1 }
 0x93f   :  { %2628 = vsyncpa [#allocation7 + $0x1], 1 }

</bundles_post_ra>
